<compile_context>
chip_gen: v5e
topology: v5e:2x2
jax: 0.10.0
libtpu: 0.0.40
codegen_flags: <defaults>
</compile_context>

<pallas_src>
import math

import jax
import jax.numpy as jnp
from jax import lax
from jax.experimental import pallas as pl
from jax.experimental.pallas import tpu as pltpu  # noqa: F401  (TPU backend)

# ---------------- model hyper-parameters (small, deterministic) -------------
D_MODEL = 32
N_LAYER = 2
VOCAB = 48                           # already a multiple of pad_vocab_size_multiple=16
D_INTER = 32                         # gated-MLP hidden size (d_intermediate)
D_STATE = 16
D_CONV = 4
EXPAND = 2
D_INNER = EXPAND * D_MODEL           # 64
DT_RANK = math.ceil(D_MODEL / 16)    # 2
EPS = 1e-5

BATCH = 2
SEQLEN = 8
BLOCK_SIZE = 64                      # "config.block_size" (seq-length bound)
LM_PAD = 128                         # lane-padded logits width (VOCAB=48 -> 128)


def _sigmoid(x):
    return 1.0 / (1.0 + jnp.exp(-x))


def _softplus(x):
    return jnp.maximum(x, 0.0) + jnp.log1p(jnp.exp(-jnp.abs(x)))


# ------------------------------ fused kernel --------------------------------
def _make_fused_kernel(batch, seqlen):
    """Build the whole-model kernel for static (batch, seqlen)."""
    BT = batch * seqlen

    def kernel(hid_ref,        # (B*T, D_MODEL)          flattened hidden states
               norm_w_ref,     # (L, 1, D_MODEL)
               in_proj_ref,    # (L, D_MODEL, 2*D_INNER)
               conv_w_ref,     # (L, D_CONV, D_INNER)
               conv_b_ref,     # (L, 1, D_INNER)
               x_proj_ref,     # (L, D_INNER, DT_RANK+2*D_STATE)
               dt_proj_ref,    # (L, DT_RANK, D_INNER)
               dt_bias_ref,    # (L, 1, D_INNER)
               A_ref,          # (L, D_STATE, D_INNER)   (A_log, transposed)
               D_ref,          # (L, 1, D_INNER)
               out_proj_ref,   # (L, D_INNER, D_MODEL)
               norm2_w_ref,    # (L, 1, D_MODEL)
               fc1_ref,        # (L, D_MODEL, 2*D_INTER)
               fc2_ref,        # (L, D_INTER, D_MODEL)
               norm_f_ref,     # (1, D_MODEL)
               lm_head_ref,    # (D_MODEL, LM_PAD)       (tied emb, padded)
               logits_ref):    # (B*T, LM_PAD)

        def rmsnorm(x, w):
            var = jnp.mean(x * x, axis=-1, keepdims=True)
            return x * lax.rsqrt(var + EPS) * w

        hidden = hid_ref[...]                              # (BT, D_MODEL)
        residual = jnp.zeros_like(hidden)                  # residual_in_fp32

        for l in range(N_LAYER):                           # static unrolled layer loop
            # ---------------- fused add + RMSNorm (pre-mixer) ----------------
            residual = hidden + residual
            normed = rmsnorm(residual, norm_w_ref[l])      # (BT, D_MODEL)

            # ---------------- Mamba mixer ----------------
            xz = jnp.dot(normed, in_proj_ref[l],
                         preferred_element_type=jnp.float32)       # (BT, 2*D_INNER)
            x = xz[:, :D_INNER]
            z = xz[:, D_INNER:]

            # depthwise causal conv (per-sequence shifted adds, in-kernel) + SiLU
            cw = conv_w_ref[l]                                     # (D_CONV, D_INNER)
            conv_parts = []
            for b in range(batch):                                 # static, segment-aligned
                xb = x[b * seqlen:(b + 1) * seqlen, :]             # (T, D_INNER)
                accb = xb * cw[D_CONV - 1:D_CONV, :]               # tap s=0 (current step)
                for s in range(1, D_CONV):                         # static taps, unrolled
                    k = D_CONV - 1 - s                             # causal left shift s
                    xs = jnp.concatenate(
                        [jnp.zeros((s, D_INNER), jnp.float32), xb[:seqlen - s, :]],
                        axis=0)
                    accb = accb + xs * cw[k:k + 1, :]
                conv_parts.append(accb)
            acc = jnp.concatenate(conv_parts, axis=0) + conv_b_ref[l]   # (BT, D_INNER)
            x_conv = acc * _sigmoid(acc)                           # SiLU

            # x_proj -> (dt, B, C); splits stay in VMEM
            x_dbl = jnp.dot(x_conv, x_proj_ref[l],
                            preferred_element_type=jnp.float32)    # (BT, DT_RANK+2*D_STATE)
            dt = x_dbl[:, :DT_RANK]
            Bm = x_dbl[:, DT_RANK:DT_RANK + D_STATE]               # (BT, D_STATE)
            Cm = x_dbl[:, DT_RANK + D_STATE:]                      # (BT, D_STATE)
            dt_full = jnp.dot(dt, dt_proj_ref[l],
                              preferred_element_type=jnp.float32) + dt_bias_ref[l]

            # ---------------- selective scan ----------------
            # Hoist everything non-recurrent out of the time loop (vectorized over
            # all B*T rows); state h kept lane-dense (d_state, d_inner).
            A_t = -jnp.exp(A_ref[l])                               # (D_STATE, D_INNER)
            dt_sp = _softplus(dt_full)                             # (BT, D_INNER)
            dA = jnp.exp(dt_sp[:, None, :] * A_t[None, :, :])      # (BT, D_STATE, D_INNER)
            dBx = (dt_sp * x_conv)[:, None, :] * Bm[:, :, None]    # (BT, D_STATE, D_INNER)
            C3 = Cm[:, :, None]                                    # (BT, D_STATE, 1)
            gate = z * _sigmoid(z)                                 # SiLU(z), (BT, D_INNER)
            Dx = D_ref[l] * x_conv                                 # (BT, D_INNER)

            ys = []
            for b in range(batch):                                 # independent per sequence
                h = jnp.zeros((D_STATE, D_INNER), jnp.float32)
                for t in range(seqlen):                            # unrolled recurrence
                    r = b * seqlen + t
                    h = dA[r] * h + dBx[r]
                    ys.append(jnp.sum(h * C3[r], axis=0, keepdims=True))  # (1, D_INNER)
            y = (jnp.concatenate(ys, axis=0) + Dx) * gate          # (BT, D_INNER)

            hidden = jnp.dot(y, out_proj_ref[l],
                             preferred_element_type=jnp.float32)   # (BT, D_MODEL)

            # ---------------- fused add + RMSNorm (pre-MLP) ----------------
            residual = hidden + residual
            normed = rmsnorm(residual, norm2_w_ref[l])

            # ---------------- gated MLP (split + SiLU gate in VMEM) ----------------
            y12 = jnp.dot(normed, fc1_ref[l],
                          preferred_element_type=jnp.float32)      # (BT, 2*D_INTER)
            g = y12[:, D_INTER:]
            gated = y12[:, :D_INTER] * (g * _sigmoid(g))
            hidden = jnp.dot(gated, fc2_ref[l],
                             preferred_element_type=jnp.float32)   # (BT, D_MODEL)

        # ---------------- final add + RMSNorm + tied lm_head ----------------
        residual = hidden + residual
        normed = rmsnorm(residual, norm_f_ref[...])
        logits_ref[...] = jnp.dot(normed, lm_head_ref[...],
                                  preferred_element_type=jnp.float32)  # (BT, LM_PAD)

    return kernel


def fused_forward(hidden0, params, lm_head_w):
    """hidden0: (B, T, D_MODEL) f32; returns lane-padded logits (B, T, LM_PAD)."""
    B, T, _ = hidden0.shape
    hid_flat = hidden0.reshape(B * T, D_MODEL)
    weights = [
        params["norm_w"], params["in_proj_w"], params["conv_w"], params["conv_b"],
        params["x_proj_w"], params["dt_proj_w"], params["dt_proj_b"],
        params["A_log_t"], params["D"], params["out_proj_w"], params["norm2_w"],
        params["fc1_w"], params["fc2_w"], params["norm_f_w"], lm_head_w,
    ]
    # No grid: every operand is a whole-array VMEM-resident ref (everything is
    # tiny), single kernel invocation processes the full (B*T) slab.
    logits_flat = pl.pallas_call(
        _make_fused_kernel(B, T),
        out_shape=jax.ShapeDtypeStruct((B * T, LM_PAD), jnp.float32),
    )(hid_flat, *weights)
    return logits_flat.reshape(B, T, LM_PAD)


# ------------------------------ model forward -------------------------------
def mamba_lm_forward(params, idx, targets=None):
    B, T = idx.shape
    assert T <= BLOCK_SIZE
    # embedding gather (plain-JAX glue)
    hidden0 = params["embedding"][idx].astype(jnp.float32)             # (B, T, D)
    # tied lm_head, pre-transposed and lane-padded to 128 output columns
    lm_head_w = jnp.pad(params["embedding"].astype(jnp.float32).T,
                        ((0, 0), (0, LM_PAD - VOCAB)))                 # (D, 128)

    logits_pad = fused_forward(hidden0, params, lm_head_w)             # (B, T, 128)
    logits = logits_pad[:, :, :VOCAB]                                  # (B, T, VOCAB)

    loss = None
    if targets is not None:
        # cross-entropy with ignore_index=-1 (plain JAX glue)
        logp = jax.nn.log_softmax(logits.reshape(-1, VOCAB), axis=-1)
        t = targets.reshape(-1)
        valid = t != -1
        tc = jnp.where(valid, t, 0)
        nll = -jnp.take_along_axis(logp, tc[:, None], axis=1)[:, 0]
        loss = jnp.sum(jnp.where(valid, nll, 0.0)) / jnp.maximum(jnp.sum(valid), 1)
    return logits, loss


# ------------------------------ parameter init ------------------------------
def init_params(key):
    keys = iter(jax.random.split(key, 32))

    def nrm(shape, scale=0.02):
        return scale * jax.random.normal(next(keys), shape, jnp.float32)

    L = N_LAYER
    params = {
        "embedding": nrm((VOCAB, D_MODEL)),
        # Per-layer weights stacked on a leading layer axis.  Linear weights are
        # stored pre-transposed to (in_features, out_features), kernel-ready.
        "norm_w":   jnp.ones((L, 1, D_MODEL), jnp.float32) + nrm((L, 1, D_MODEL), 0.01),
        "in_proj_w": nrm((L, D_MODEL, 2 * D_INNER)),
        "conv_w":    nrm((L, D_CONV, D_INNER), 0.1),
        "conv_b":    nrm((L, 1, D_INNER), 0.1),
        "x_proj_w":  nrm((L, D_INNER, DT_RANK + 2 * D_STATE)),
        "dt_proj_w": nrm((L, DT_RANK, D_INNER), 0.1),
        "dt_proj_b": nrm((L, 1, D_INNER), 0.1),
        # S4D-real init: A_log = log(1..d_state), stored transposed (d_state, d_inner)
        "A_log_t": jnp.log(jnp.broadcast_to(
            jnp.arange(1, D_STATE + 1, dtype=jnp.float32)[None, :, None],
            (L, D_STATE, D_INNER))),
        "D": jnp.ones((L, 1, D_INNER), jnp.float32),
        "out_proj_w": nrm((L, D_INNER, D_MODEL)),
        "norm2_w":  jnp.ones((L, 1, D_MODEL), jnp.float32) + nrm((L, 1, D_MODEL), 0.01),
        "fc1_w": nrm((L, D_MODEL, 2 * D_INTER)),
        "fc2_w": nrm((L, D_INTER, D_MODEL)),
        "norm_f_w": jnp.ones((1, D_MODEL), jnp.float32) + nrm((1, D_MODEL), 0.01),
    }
    return params


# TODO(synk): token sampling (generate / torch.multinomial) and optimizer
# configuration are not part of the forward pass and are not implemented.

if __name__ == "__main__":
    key = jax.random.PRNGKey(0)
    pkey, ikey, tkey = jax.random.split(key, 3)
    params = init_params(pkey)
    idx = jax.random.randint(ikey, (BATCH, SEQLEN), 0, VOCAB, dtype=jnp.int32)
    targets = jax.random.randint(tkey, (BATCH, SEQLEN), 0, VOCAB, dtype=jnp.int32)

    fwd = jax.jit(mamba_lm_forward)
    logits, loss = fwd(params, idx, targets)
    jax.block_until_ready(logits)
    jax.block_until_ready(loss)

    assert logits.shape == (BATCH, SEQLEN, VOCAB), logits.shape
    assert bool(jnp.all(jnp.isfinite(logits)))
    assert bool(jnp.isfinite(loss))
    print("KERNEL_OK")
</pallas_src>

<mosaic_0001>
module attributes {stable_mosaic.version = 11 : i64} {
  func.func @kernel(%arg0: memref<16x32xf32, #tpu.memory_space<vmem>>, %arg1: memref<2x1x32xf32, #tpu.memory_space<vmem>>, %arg2: memref<2x32x128xf32, #tpu.memory_space<vmem>>, %arg3: memref<2x4x64xf32, #tpu.memory_space<vmem>>, %arg4: memref<2x1x64xf32, #tpu.memory_space<vmem>>, %arg5: memref<2x64x34xf32, #tpu.memory_space<vmem>>, %arg6: memref<2x2x64xf32, #tpu.memory_space<vmem>>, %arg7: memref<2x1x64xf32, #tpu.memory_space<vmem>>, %arg8: memref<2x16x64xf32, #tpu.memory_space<vmem>>, %arg9: memref<2x1x64xf32, #tpu.memory_space<vmem>>, %arg10: memref<2x64x32xf32, #tpu.memory_space<vmem>>, %arg11: memref<2x1x32xf32, #tpu.memory_space<vmem>>, %arg12: memref<2x32x64xf32, #tpu.memory_space<vmem>>, %arg13: memref<2x32x32xf32, #tpu.memory_space<vmem>>, %arg14: memref<1x32xf32, #tpu.memory_space<vmem>>, %arg15: memref<32x128xf32, #tpu.memory_space<vmem>>, %arg16: memref<16x128xf32, #tpu.memory_space<vmem>>) attributes {dimension_semantics = [], scalar_prefetch = 0 : i64, scratch_operands = 0 : i64, tpu.core_type = #tpu.core_type<tc>} {
    %c0 = arith.constant 0 : index
    %c0_0 = arith.constant 0 : index
    %0 = vector.load %arg0[%c0, %c0_0] : memref<16x32xf32, #tpu.memory_space<vmem>>, vector<16x32xf32>
    %cst = arith.constant 0.000000e+00 : f32
    %1 = vector.broadcast %cst : f32 to vector<16x32xf32>
    %2 = arith.addf %0, %1 : vector<16x32xf32>
    %c0_1 = arith.constant 0 : index
    %c0_2 = arith.constant 0 : index
    %c0_3 = arith.constant 0 : index
    %3 = vector.load %arg1[%c0_1, %c0_2, %c0_3] : memref<2x1x32xf32, #tpu.memory_space<vmem>>, vector<1x1x32xf32>
    %4 = vector.shape_cast %3 : vector<1x1x32xf32> to vector<1x32xf32>
    %5 = arith.mulf %2, %2 : vector<16x32xf32>
    %cst_4 = arith.constant dense<0.000000e+00> : vector<16xf32>
    %6 = vector.multi_reduction <add>, %5, %cst_4 [1] : vector<16x32xf32> to vector<16xf32>
    %7 = vector.shape_cast %6 : vector<16xf32> to vector<16x1xf32>
    %cst_5 = arith.constant 3.200000e+01 : f32
    %8 = vector.broadcast %cst_5 : f32 to vector<16x1xf32>
    %9 = arith.divf %7, %8 : vector<16x1xf32>
    %cst_6 = arith.constant 9.99999974E-6 : f32
    %10 = vector.broadcast %cst_6 : f32 to vector<16x1xf32>
    %11 = arith.addf %9, %10 : vector<16x1xf32>
    %12 = math.rsqrt %11 : vector<16x1xf32>
    %13 = vector.broadcast %12 : vector<16x1xf32> to vector<16x32xf32>
    %14 = arith.mulf %2, %13 : vector<16x32xf32>
    %15 = vector.broadcast %4 : vector<1x32xf32> to vector<16x32xf32>
    %16 = arith.mulf %14, %15 : vector<16x32xf32>
    %c0_7 = arith.constant 0 : index
    %c0_8 = arith.constant 0 : index
    %c0_9 = arith.constant 0 : index
    %17 = vector.load %arg2[%c0_7, %c0_8, %c0_9] : memref<2x32x128xf32, #tpu.memory_space<vmem>>, vector<1x32x128xf32>
    %18 = vector.shape_cast %17 : vector<1x32x128xf32> to vector<32x128xf32>
    %cst_10 = arith.constant dense<0.000000e+00> : vector<16x128xf32>
    %19 = tpu.matmul %16, %18, %cst_10 {dimension_numbers = #tpu.dot_dimension_numbers<[1], [0], [0], [1], [0, 0, 1, 1], [], []>} : vector<16x32xf32>, vector<32x128xf32>, vector<16x128xf32> -> vector<16x128xf32>
    %20 = vector.extract_strided_slice %19 {offsets = [0, 0], sizes = [16, 64], strides = [1, 1]} : vector<16x128xf32> to vector<16x64xf32>
    %21 = vector.extract_strided_slice %19 {offsets = [0, 64], sizes = [16, 64], strides = [1, 1]} : vector<16x128xf32> to vector<16x64xf32>
    %c0_11 = arith.constant 0 : index
    %c0_12 = arith.constant 0 : index
    %c0_13 = arith.constant 0 : index
    %22 = vector.load %arg3[%c0_11, %c0_12, %c0_13] : memref<2x4x64xf32, #tpu.memory_space<vmem>>, vector<1x4x64xf32>
    %23 = vector.shape_cast %22 : vector<1x4x64xf32> to vector<4x64xf32>
    %24 = vector.extract_strided_slice %20 {offsets = [0, 0], sizes = [8, 64], strides = [1, 1]} : vector<16x64xf32> to vector<8x64xf32>
    %25 = vector.extract_strided_slice %23 {offsets = [3, 0], sizes = [1, 64], strides = [1, 1]} : vector<4x64xf32> to vector<1x64xf32>
    %26 = vector.broadcast %25 : vector<1x64xf32> to vector<8x64xf32>
    %27 = arith.mulf %24, %26 : vector<8x64xf32>
    %cst_14 = arith.constant 0.000000e+00 : f32
    %28 = vector.broadcast %cst_14 : f32 to vector<1x64xf32>
    %29 = vector.extract_strided_slice %24 {offsets = [0, 0], sizes = [7, 64], strides = [1, 1]} : vector<8x64xf32> to vector<7x64xf32>
    %30 = tpu.concatenate %28, %29 in 0 : vector<1x64xf32>, vector<7x64xf32> -> vector<8x64xf32>
    %31 = vector.extract_strided_slice %23 {offsets = [2, 0], sizes = [1, 64], strides = [1, 1]} : vector<4x64xf32> to vector<1x64xf32>
    %32 = vector.broadcast %31 : vector<1x64xf32> to vector<8x64xf32>
    %33 = arith.mulf %30, %32 : vector<8x64xf32>
    %34 = arith.addf %27, %33 : vector<8x64xf32>
    %cst_15 = arith.constant 0.000000e+00 : f32
    %35 = vector.broadcast %cst_15 : f32 to vector<2x64xf32>
    %36 = vector.extract_strided_slice %24 {offsets = [0, 0], sizes = [6, 64], strides = [1, 1]} : vector<8x64xf32> to vector<6x64xf32>
    %37 = tpu.concatenate %35, %36 in 0 : vector<2x64xf32>, vector<6x64xf32> -> vector<8x64xf32>
    %38 = vector.extract_strided_slice %23 {offsets = [1, 0], sizes = [1, 64], strides = [1, 1]} : vector<4x64xf32> to vector<1x64xf32>
    %39 = vector.broadcast %38 : vector<1x64xf32> to vector<8x64xf32>
    %40 = arith.mulf %37, %39 : vector<8x64xf32>
    %41 = arith.addf %34, %40 : vector<8x64xf32>
    %cst_16 = arith.constant 0.000000e+00 : f32
    %42 = vector.broadcast %cst_16 : f32 to vector<3x64xf32>
    %43 = vector.extract_strided_slice %24 {offsets = [0, 0], sizes = [5, 64], strides = [1, 1]} : vector<8x64xf32> to vector<5x64xf32>
    %44 = tpu.concatenate %42, %43 in 0 : vector<3x64xf32>, vector<5x64xf32> -> vector<8x64xf32>
    %45 = vector.extract_strided_slice %23 {offsets = [0, 0], sizes = [1, 64], strides = [1, 1]} : vector<4x64xf32> to vector<1x64xf32>
    %46 = vector.broadcast %45 : vector<1x64xf32> to vector<8x64xf32>
    %47 = arith.mulf %44, %46 : vector<8x64xf32>
    %48 = arith.addf %41, %47 : vector<8x64xf32>
    %49 = vector.extract_strided_slice %20 {offsets = [8, 0], sizes = [8, 64], strides = [1, 1]} : vector<16x64xf32> to vector<8x64xf32>
    %50 = vector.extract_strided_slice %23 {offsets = [3, 0], sizes = [1, 64], strides = [1, 1]} : vector<4x64xf32> to vector<1x64xf32>
    %51 = vector.broadcast %50 : vector<1x64xf32> to vector<8x64xf32>
    %52 = arith.mulf %49, %51 : vector<8x64xf32>
    %cst_17 = arith.constant 0.000000e+00 : f32
    %53 = vector.broadcast %cst_17 : f32 to vector<1x64xf32>
    %54 = vector.extract_strided_slice %49 {offsets = [0, 0], sizes = [7, 64], strides = [1, 1]} : vector<8x64xf32> to vector<7x64xf32>
    %55 = tpu.concatenate %53, %54 in 0 : vector<1x64xf32>, vector<7x64xf32> -> vector<8x64xf32>
    %56 = vector.extract_strided_slice %23 {offsets = [2, 0], sizes = [1, 64], strides = [1, 1]} : vector<4x64xf32> to vector<1x64xf32>
    %57 = vector.broadcast %56 : vector<1x64xf32> to vector<8x64xf32>
    %58 = arith.mulf %55, %57 : vector<8x64xf32>
    %59 = arith.addf %52, %58 : vector<8x64xf32>
    %cst_18 = arith.constant 0.000000e+00 : f32
    %60 = vector.broadcast %cst_18 : f32 to vector<2x64xf32>
    %61 = vector.extract_strided_slice %49 {offsets = [0, 0], sizes = [6, 64], strides = [1, 1]} : vector<8x64xf32> to vector<6x64xf32>
    %62 = tpu.concatenate %60, %61 in 0 : vector<2x64xf32>, vector<6x64xf32> -> vector<8x64xf32>
    %63 = vector.extract_strided_slice %23 {offsets = [1, 0], sizes = [1, 64], strides = [1, 1]} : vector<4x64xf32> to vector<1x64xf32>
    %64 = vector.broadcast %63 : vector<1x64xf32> to vector<8x64xf32>
    %65 = arith.mulf %62, %64 : vector<8x64xf32>
    %66 = arith.addf %59, %65 : vector<8x64xf32>
    %cst_19 = arith.constant 0.000000e+00 : f32
    %67 = vector.broadcast %cst_19 : f32 to vector<3x64xf32>
    %68 = vector.extract_strided_slice %49 {offsets = [0, 0], sizes = [5, 64], strides = [1, 1]} : vector<8x64xf32> to vector<5x64xf32>
    %69 = tpu.concatenate %67, %68 in 0 : vector<3x64xf32>, vector<5x64xf32> -> vector<8x64xf32>
    %70 = vector.extract_strided_slice %23 {offsets = [0, 0], sizes = [1, 64], strides = [1, 1]} : vector<4x64xf32> to vector<1x64xf32>
    %71 = vector.broadcast %70 : vector<1x64xf32> to vector<8x64xf32>
    %72 = arith.mulf %69, %71 : vector<8x64xf32>
    %73 = arith.addf %66, %72 : vector<8x64xf32>
    %74 = tpu.concatenate %48, %73 in 0 : vector<8x64xf32>, vector<8x64xf32> -> vector<16x64xf32>
    %c0_20 = arith.constant 0 : index
    %c0_21 = arith.constant 0 : index
    %c0_22 = arith.constant 0 : index
    %75 = vector.load %arg4[%c0_20, %c0_21, %c0_22] : memref<2x1x64xf32, #tpu.memory_space<vmem>>, vector<1x1x64xf32>
    %76 = vector.shape_cast %75 : vector<1x1x64xf32> to vector<1x64xf32>
    %77 = vector.broadcast %76 : vector<1x64xf32> to vector<16x64xf32>
    %78 = arith.addf %74, %77 : vector<16x64xf32>
    %cst_23 = arith.constant 0.000000e+00 : f32
    %79 = vector.broadcast %cst_23 : f32 to vector<16x64xf32>
    %80 = arith.subf %79, %78 : vector<16x64xf32>
    %81 = math.exp %80 : vector<16x64xf32>
    %cst_24 = arith.constant 1.000000e+00 : f32
    %82 = vector.broadcast %cst_24 : f32 to vector<16x64xf32>
    %83 = arith.addf %82, %81 : vector<16x64xf32>
    %cst_25 = arith.constant 1.000000e+00 : f32
    %84 = vector.broadcast %cst_25 : f32 to vector<16x64xf32>
    %85 = arith.divf %84, %83 : vector<16x64xf32>
    %86 = arith.mulf %78, %85 : vector<16x64xf32>
    %c0_26 = arith.constant 0 : index
    %c0_27 = arith.constant 0 : index
    %c0_28 = arith.constant 0 : index
    %87 = vector.load %arg5[%c0_26, %c0_27, %c0_28] : memref<2x64x34xf32, #tpu.memory_space<vmem>>, vector<1x64x34xf32>
    %88 = vector.shape_cast %87 : vector<1x64x34xf32> to vector<64x34xf32>
    %cst_29 = arith.constant dense<0.000000e+00> : vector<16x34xf32>
    %89 = tpu.matmul %86, %88, %cst_29 {dimension_numbers = #tpu.dot_dimension_numbers<[1], [0], [0], [1], [0, 0, 1, 1], [], []>} : vector<16x64xf32>, vector<64x34xf32>, vector<16x34xf32> -> vector<16x34xf32>
    %90 = vector.extract_strided_slice %89 {offsets = [0, 0], sizes = [16, 2], strides = [1, 1]} : vector<16x34xf32> to vector<16x2xf32>
    %91 = vector.extract_strided_slice %89 {offsets = [0, 2], sizes = [16, 16], strides = [1, 1]} : vector<16x34xf32> to vector<16x16xf32>
    %92 = vector.extract_strided_slice %89 {offsets = [0, 18], sizes = [16, 16], strides = [1, 1]} : vector<16x34xf32> to vector<16x16xf32>
    %c0_30 = arith.constant 0 : index
    %c0_31 = arith.constant 0 : index
    %c0_32 = arith.constant 0 : index
    %93 = vector.load %arg6[%c0_30, %c0_31, %c0_32] : memref<2x2x64xf32, #tpu.memory_space<vmem>>, vector<1x2x64xf32>
    %94 = vector.shape_cast %93 : vector<1x2x64xf32> to vector<2x64xf32>
    %cst_33 = arith.constant dense<0.000000e+00> : vector<16x64xf32>
    %95 = tpu.matmul %90, %94, %cst_33 {dimension_numbers = #tpu.dot_dimension_numbers<[1], [0], [0], [1], [0, 0, 1, 1], [], []>} : vector<16x2xf32>, vector<2x64xf32>, vector<16x64xf32> -> vector<16x64xf32>
    %c0_34 = arith.constant 0 : index
    %c0_35 = arith.constant 0 : index
    %c0_36 = arith.constant 0 : index
    %96 = vector.load %arg7[%c0_34, %c0_35, %c0_36] : memref<2x1x64xf32, #tpu.memory_space<vmem>>, vector<1x1x64xf32>
    %97 = vector.shape_cast %96 : vector<1x1x64xf32> to vector<1x64xf32>
    %98 = vector.broadcast %97 : vector<1x64xf32> to vector<16x64xf32>
    %99 = arith.addf %95, %98 : vector<16x64xf32>
    %c0_37 = arith.constant 0 : index
    %c0_38 = arith.constant 0 : index
    %c0_39 = arith.constant 0 : index
    %100 = vector.load %arg8[%c0_37, %c0_38, %c0_39] : memref<2x16x64xf32, #tpu.memory_space<vmem>>, vector<1x16x64xf32>
    %101 = vector.shape_cast %100 : vector<1x16x64xf32> to vector<16x64xf32>
    %102 = math.exp %101 : vector<16x64xf32>
    %cst_40 = arith.constant 0.000000e+00 : f32
    %103 = vector.broadcast %cst_40 : f32 to vector<16x64xf32>
    %104 = arith.subf %103, %102 : vector<16x64xf32>
    %cst_41 = arith.constant 0.000000e+00 : f32
    %105 = vector.broadcast %cst_41 : f32 to vector<16x64xf32>
    %106 = arith.maximumf %99, %105 : vector<16x64xf32>
    %107 = math.absf %99 : vector<16x64xf32>
    %cst_42 = arith.constant 0.000000e+00 : f32
    %108 = vector.broadcast %cst_42 : f32 to vector<16x64xf32>
    %109 = arith.subf %108, %107 : vector<16x64xf32>
    %110 = math.exp %109 : vector<16x64xf32>
    %111 = math.log1p %110 : vector<16x64xf32>
    %112 = arith.addf %106, %111 : vector<16x64xf32>
    %113 = vector.shape_cast %112 : vector<16x64xf32> to vector<16x1x64xf32>
    %114 = vector.shape_cast %104 : vector<16x64xf32> to vector<1x16x64xf32>
    %115 = vector.broadcast %113 : vector<16x1x64xf32> to vector<16x16x64xf32>
    %116 = vector.broadcast %114 : vector<1x16x64xf32> to vector<16x16x64xf32>
    %117 = arith.mulf %115, %116 : vector<16x16x64xf32>
    %118 = math.exp %117 : vector<16x16x64xf32>
    %119 = arith.mulf %112, %86 : vector<16x64xf32>
    %120 = vector.shape_cast %119 : vector<16x64xf32> to vector<16x1x64xf32>
    %121 = vector.shape_cast %91 : vector<16x16xf32> to vector<16x16x1xf32>
    %122 = vector.broadcast %120 : vector<16x1x64xf32> to vector<16x16x64xf32>
    %123 = vector.broadcast %121 : vector<16x16x1xf32> to vector<16x16x64xf32>
    %124 = arith.mulf %122, %123 : vector<16x16x64xf32>
    %125 = vector.shape_cast %92 : vector<16x16xf32> to vector<16x16x1xf32>
    %cst_43 = arith.constant 0.000000e+00 : f32
    %126 = vector.broadcast %cst_43 : f32 to vector<16x64xf32>
    %127 = arith.subf %126, %21 : vector<16x64xf32>
    %128 = math.exp %127 : vector<16x64xf32>
    %cst_44 = arith.constant 1.000000e+00 : f32
    %129 = vector.broadcast %cst_44 : f32 to vector<16x64xf32>
    %130 = arith.addf %129, %128 : vector<16x64xf32>
    %cst_45 = arith.constant 1.000000e+00 : f32
    %131 = vector.broadcast %cst_45 : f32 to vector<16x64xf32>
    %132 = arith.divf %131, %130 : vector<16x64xf32>
    %133 = arith.mulf %21, %132 : vector<16x64xf32>
    %c0_46 = arith.constant 0 : index
    %c0_47 = arith.constant 0 : index
    %c0_48 = arith.constant 0 : index
    %134 = vector.load %arg9[%c0_46, %c0_47, %c0_48] : memref<2x1x64xf32, #tpu.memory_space<vmem>>, vector<1x1x64xf32>
    %135 = vector.shape_cast %134 : vector<1x1x64xf32> to vector<1x64xf32>
    %136 = vector.broadcast %135 : vector<1x64xf32> to vector<16x64xf32>
    %137 = arith.mulf %136, %86 : vector<16x64xf32>
    %cst_49 = arith.constant 0.000000e+00 : f32
    %138 = vector.broadcast %cst_49 : f32 to vector<16x64xf32>
    %139 = vector.extract_strided_slice %118 {offsets = [0, 0, 0], sizes = [1, 16, 64], strides = [1, 1, 1]} : vector<16x16x64xf32> to vector<1x16x64xf32>
    %140 = vector.shape_cast %139 : vector<1x16x64xf32> to vector<16x64xf32>
    %141 = arith.mulf %140, %138 : vector<16x64xf32>
    %142 = vector.extract_strided_slice %124 {offsets = [0, 0, 0], sizes = [1, 16, 64], strides = [1, 1, 1]} : vector<16x16x64xf32> to vector<1x16x64xf32>
    %143 = vector.shape_cast %142 : vector<1x16x64xf32> to vector<16x64xf32>
    %144 = arith.addf %141, %143 : vector<16x64xf32>
    %145 = vector.extract_strided_slice %125 {offsets = [0, 0, 0], sizes = [1, 16, 1], strides = [1, 1, 1]} : vector<16x16x1xf32> to vector<1x16x1xf32>
    %146 = vector.shape_cast %145 : vector<1x16x1xf32> to vector<16x1xf32>
    %147 = vector.broadcast %146 : vector<16x1xf32> to vector<16x64xf32>
    %148 = arith.mulf %144, %147 : vector<16x64xf32>
    %cst_50 = arith.constant dense<0.000000e+00> : vector<64xf32>
    %149 = vector.multi_reduction <add>, %148, %cst_50 [0] : vector<16x64xf32> to vector<64xf32>
    %150 = vector.shape_cast %149 : vector<64xf32> to vector<1x64xf32>
    %151 = vector.extract_strided_slice %118 {offsets = [1, 0, 0], sizes = [1, 16, 64], strides = [1, 1, 1]} : vector<16x16x64xf32> to vector<1x16x64xf32>
    %152 = vector.shape_cast %151 : vector<1x16x64xf32> to vector<16x64xf32>
    %153 = arith.mulf %152, %144 : vector<16x64xf32>
    %154 = vector.extract_strided_slice %124 {offsets = [1, 0, 0], sizes = [1, 16, 64], strides = [1, 1, 1]} : vector<16x16x64xf32> to vector<1x16x64xf32>
    %155 = vector.shape_cast %154 : vector<1x16x64xf32> to vector<16x64xf32>
    %156 = arith.addf %153, %155 : vector<16x64xf32>
    %157 = vector.extract_strided_slice %125 {offsets = [1, 0, 0], sizes = [1, 16, 1], strides = [1, 1, 1]} : vector<16x16x1xf32> to vector<1x16x1xf32>
    %158 = vector.shape_cast %157 : vector<1x16x1xf32> to vector<16x1xf32>
    %159 = vector.broadcast %158 : vector<16x1xf32> to vector<16x64xf32>
    %160 = arith.mulf %156, %159 : vector<16x64xf32>
    %cst_51 = arith.constant dense<0.000000e+00> : vector<64xf32>
    %161 = vector.multi_reduction <add>, %160, %cst_51 [0] : vector<16x64xf32> to vector<64xf32>
    %162 = vector.shape_cast %161 : vector<64xf32> to vector<1x64xf32>
    %163 = vector.extract_strided_slice %118 {offsets = [2, 0, 0], sizes = [1, 16, 64], strides = [1, 1, 1]} : vector<16x16x64xf32> to vector<1x16x64xf32>
    %164 = vector.shape_cast %163 : vector<1x16x64xf32> to vector<16x64xf32>
    %165 = arith.mulf %164, %156 : vector<16x64xf32>
    %166 = vector.extract_strided_slice %124 {offsets = [2, 0, 0], sizes = [1, 16, 64], strides = [1, 1, 1]} : vector<16x16x64xf32> to vector<1x16x64xf32>
    %167 = vector.shape_cast %166 : vector<1x16x64xf32> to vector<16x64xf32>
    %168 = arith.addf %165, %167 : vector<16x64xf32>
    %169 = vector.extract_strided_slice %125 {offsets = [2, 0, 0], sizes = [1, 16, 1], strides = [1, 1, 1]} : vector<16x16x1xf32> to vector<1x16x1xf32>
    %170 = vector.shape_cast %169 : vector<1x16x1xf32> to vector<16x1xf32>
    %171 = vector.broadcast %170 : vector<16x1xf32> to vector<16x64xf32>
    %172 = arith.mulf %168, %171 : vector<16x64xf32>
    %cst_52 = arith.constant dense<0.000000e+00> : vector<64xf32>
    %173 = vector.multi_reduction <add>, %172, %cst_52 [0] : vector<16x64xf32> to vector<64xf32>
    %174 = vector.shape_cast %173 : vector<64xf32> to vector<1x64xf32>
    %175 = vector.extract_strided_slice %118 {offsets = [3, 0, 0], sizes = [1, 16, 64], strides = [1, 1, 1]} : vector<16x16x64xf32> to vector<1x16x64xf32>
    %176 = vector.shape_cast %175 : vector<1x16x64xf32> to vector<16x64xf32>
    %177 = arith.mulf %176, %168 : vector<16x64xf32>
    %178 = vector.extract_strided_slice %124 {offsets = [3, 0, 0], sizes = [1, 16, 64], strides = [1, 1, 1]} : vector<16x16x64xf32> to vector<1x16x64xf32>
    %179 = vector.shape_cast %178 : vector<1x16x64xf32> to vector<16x64xf32>
    %180 = arith.addf %177, %179 : vector<16x64xf32>
    %181 = vector.extract_strided_slice %125 {offsets = [3, 0, 0], sizes = [1, 16, 1], strides = [1, 1, 1]} : vector<16x16x1xf32> to vector<1x16x1xf32>
    %182 = vector.shape_cast %181 : vector<1x16x1xf32> to vector<16x1xf32>
    %183 = vector.broadcast %182 : vector<16x1xf32> to vector<16x64xf32>
    %184 = arith.mulf %180, %183 : vector<16x64xf32>
    %cst_53 = arith.constant dense<0.000000e+00> : vector<64xf32>
    %185 = vector.multi_reduction <add>, %184, %cst_53 [0] : vector<16x64xf32> to vector<64xf32>
    %186 = vector.shape_cast %185 : vector<64xf32> to vector<1x64xf32>
    %187 = vector.extract_strided_slice %118 {offsets = [4, 0, 0], sizes = [1, 16, 64], strides = [1, 1, 1]} : vector<16x16x64xf32> to vector<1x16x64xf32>
    %188 = vector.shape_cast %187 : vector<1x16x64xf32> to vector<16x64xf32>
    %189 = arith.mulf %188, %180 : vector<16x64xf32>
    %190 = vector.extract_strided_slice %124 {offsets = [4, 0, 0], sizes = [1, 16, 64], strides = [1, 1, 1]} : vector<16x16x64xf32> to vector<1x16x64xf32>
    %191 = vector.shape_cast %190 : vector<1x16x64xf32> to vector<16x64xf32>
    %192 = arith.addf %189, %191 : vector<16x64xf32>
    %193 = vector.extract_strided_slice %125 {offsets = [4, 0, 0], sizes = [1, 16, 1], strides = [1, 1, 1]} : vector<16x16x1xf32> to vector<1x16x1xf32>
    %194 = vector.shape_cast %193 : vector<1x16x1xf32> to vector<16x1xf32>
    %195 = vector.broadcast %194 : vector<16x1xf32> to vector<16x64xf32>
    %196 = arith.mulf %192, %195 : vector<16x64xf32>
    %cst_54 = arith.constant dense<0.000000e+00> : vector<64xf32>
    %197 = vector.multi_reduction <add>, %196, %cst_54 [0] : vector<16x64xf32> to vector<64xf32>
    %198 = vector.shape_cast %197 : vector<64xf32> to vector<1x64xf32>
    %199 = vector.extract_strided_slice %118 {offsets = [5, 0, 0], sizes = [1, 16, 64], strides = [1, 1, 1]} : vector<16x16x64xf32> to vector<1x16x64xf32>
    %200 = vector.shape_cast %199 : vector<1x16x64xf32> to vector<16x64xf32>
    %201 = arith.mulf %200, %192 : vector<16x64xf32>
    %202 = vector.extract_strided_slice %124 {offsets = [5, 0, 0], sizes = [1, 16, 64], strides = [1, 1, 1]} : vector<16x16x64xf32> to vector<1x16x64xf32>
    %203 = vector.shape_cast %202 : vector<1x16x64xf32> to vector<16x64xf32>
    %204 = arith.addf %201, %203 : vector<16x64xf32>
    %205 = vector.extract_strided_slice %125 {offsets = [5, 0, 0], sizes = [1, 16, 1], strides = [1, 1, 1]} : vector<16x16x1xf32> to vector<1x16x1xf32>
    %206 = vector.shape_cast %205 : vector<1x16x1xf32> to vector<16x1xf32>
    %207 = vector.broadcast %206 : vector<16x1xf32> to vector<16x64xf32>
    %208 = arith.mulf %204, %207 : vector<16x64xf32>
    %cst_55 = arith.constant dense<0.000000e+00> : vector<64xf32>
    %209 = vector.multi_reduction <add>, %208, %cst_55 [0] : vector<16x64xf32> to vector<64xf32>
    %210 = vector.shape_cast %209 : vector<64xf32> to vector<1x64xf32>
    %211 = vector.extract_strided_slice %118 {offsets = [6, 0, 0], sizes = [1, 16, 64], strides = [1, 1, 1]} : vector<16x16x64xf32> to vector<1x16x64xf32>
    %212 = vector.shape_cast %211 : vector<1x16x64xf32> to vector<16x64xf32>
    %213 = arith.mulf %212, %204 : vector<16x64xf32>
    %214 = vector.extract_strided_slice %124 {offsets = [6, 0, 0], sizes = [1, 16, 64], strides = [1, 1, 1]} : vector<16x16x64xf32> to vector<1x16x64xf32>
    %215 = vector.shape_cast %214 : vector<1x16x64xf32> to vector<16x64xf32>
    %216 = arith.addf %213, %215 : vector<16x64xf32>
    %217 = vector.extract_strided_slice %125 {offsets = [6, 0, 0], sizes = [1, 16, 1], strides = [1, 1, 1]} : vector<16x16x1xf32> to vector<1x16x1xf32>
    %218 = vector.shape_cast %217 : vector<1x16x1xf32> to vector<16x1xf32>
    %219 = vector.broadcast %218 : vector<16x1xf32> to vector<16x64xf32>
    %220 = arith.mulf %216, %219 : vector<16x64xf32>
    %cst_56 = arith.constant dense<0.000000e+00> : vector<64xf32>
    %221 = vector.multi_reduction <add>, %220, %cst_56 [0] : vector<16x64xf32> to vector<64xf32>
    %222 = vector.shape_cast %221 : vector<64xf32> to vector<1x64xf32>
    %223 = vector.extract_strided_slice %118 {offsets = [7, 0, 0], sizes = [1, 16, 64], strides = [1, 1, 1]} : vector<16x16x64xf32> to vector<1x16x64xf32>
    %224 = vector.shape_cast %223 : vector<1x16x64xf32> to vector<16x64xf32>
    %225 = arith.mulf %224, %216 : vector<16x64xf32>
    %226 = vector.extract_strided_slice %124 {offsets = [7, 0, 0], sizes = [1, 16, 64], strides = [1, 1, 1]} : vector<16x16x64xf32> to vector<1x16x64xf32>
    %227 = vector.shape_cast %226 : vector<1x16x64xf32> to vector<16x64xf32>
    %228 = arith.addf %225, %227 : vector<16x64xf32>
    %229 = vector.extract_strided_slice %125 {offsets = [7, 0, 0], sizes = [1, 16, 1], strides = [1, 1, 1]} : vector<16x16x1xf32> to vector<1x16x1xf32>
    %230 = vector.shape_cast %229 : vector<1x16x1xf32> to vector<16x1xf32>
    %231 = vector.broadcast %230 : vector<16x1xf32> to vector<16x64xf32>
    %232 = arith.mulf %228, %231 : vector<16x64xf32>
    %cst_57 = arith.constant dense<0.000000e+00> : vector<64xf32>
    %233 = vector.multi_reduction <add>, %232, %cst_57 [0] : vector<16x64xf32> to vector<64xf32>
    %234 = vector.shape_cast %233 : vector<64xf32> to vector<1x64xf32>
    %cst_58 = arith.constant 0.000000e+00 : f32
    %235 = vector.broadcast %cst_58 : f32 to vector<16x64xf32>
    %236 = vector.extract_strided_slice %118 {offsets = [8, 0, 0], sizes = [1, 16, 64], strides = [1, 1, 1]} : vector<16x16x64xf32> to vector<1x16x64xf32>
    %237 = vector.shape_cast %236 : vector<1x16x64xf32> to vector<16x64xf32>
    %238 = arith.mulf %237, %235 : vector<16x64xf32>
    %239 = vector.extract_strided_slice %124 {offsets = [8, 0, 0], sizes = [1, 16, 64], strides = [1, 1, 1]} : vector<16x16x64xf32> to vector<1x16x64xf32>
    %240 = vector.shape_cast %239 : vector<1x16x64xf32> to vector<16x64xf32>
    %241 = arith.addf %238, %240 : vector<16x64xf32>
    %242 = vector.extract_strided_slice %125 {offsets = [8, 0, 0], sizes = [1, 16, 1], strides = [1, 1, 1]} : vector<16x16x1xf32> to vector<1x16x1xf32>
    %243 = vector.shape_cast %242 : vector<1x16x1xf32> to vector<16x1xf32>
    %244 = vector.broadcast %243 : vector<16x1xf32> to vector<16x64xf32>
    %245 = arith.mulf %241, %244 : vector<16x64xf32>
    %cst_59 = arith.constant dense<0.000000e+00> : vector<64xf32>
    %246 = vector.multi_reduction <add>, %245, %cst_59 [0] : vector<16x64xf32> to vector<64xf32>
    %247 = vector.shape_cast %246 : vector<64xf32> to vector<1x64xf32>
    %248 = vector.extract_strided_slice %118 {offsets = [9, 0, 0], sizes = [1, 16, 64], strides = [1, 1, 1]} : vector<16x16x64xf32> to vector<1x16x64xf32>
    %249 = vector.shape_cast %248 : vector<1x16x64xf32> to vector<16x64xf32>
    %250 = arith.mulf %249, %241 : vector<16x64xf32>
    %251 = vector.extract_strided_slice %124 {offsets = [9, 0, 0], sizes = [1, 16, 64], strides = [1, 1, 1]} : vector<16x16x64xf32> to vector<1x16x64xf32>
    %252 = vector.shape_cast %251 : vector<1x16x64xf32> to vector<16x64xf32>
    %253 = arith.addf %250, %252 : vector<16x64xf32>
    %254 = vector.extract_strided_slice %125 {offsets = [9, 0, 0], sizes = [1, 16, 1], strides = [1, 1, 1]} : vector<16x16x1xf32> to vector<1x16x1xf32>
    %255 = vector.shape_cast %254 : vector<1x16x1xf32> to vector<16x1xf32>
    %256 = vector.broadcast %255 : vector<16x1xf32> to vector<16x64xf32>
    %257 = arith.mulf %253, %256 : vector<16x64xf32>
    %cst_60 = arith.constant dense<0.000000e+00> : vector<64xf32>
    %258 = vector.multi_reduction <add>, %257, %cst_60 [0] : vector<16x64xf32> to vector<64xf32>
    %259 = vector.shape_cast %258 : vector<64xf32> to vector<1x64xf32>
    %260 = vector.extract_strided_slice %118 {offsets = [10, 0, 0], sizes = [1, 16, 64], strides = [1, 1, 1]} : vector<16x16x64xf32> to vector<1x16x64xf32>
    %261 = vector.shape_cast %260 : vector<1x16x64xf32> to vector<16x64xf32>
    %262 = arith.mulf %261, %253 : vector<16x64xf32>
    %263 = vector.extract_strided_slice %124 {offsets = [10, 0, 0], sizes = [1, 16, 64], strides = [1, 1, 1]} : vector<16x16x64xf32> to vector<1x16x64xf32>
    %264 = vector.shape_cast %263 : vector<1x16x64xf32> to vector<16x64xf32>
    %265 = arith.addf %262, %264 : vector<16x64xf32>
    %266 = vector.extract_strided_slice %125 {offsets = [10, 0, 0], sizes = [1, 16, 1], strides = [1, 1, 1]} : vector<16x16x1xf32> to vector<1x16x1xf32>
    %267 = vector.shape_cast %266 : vector<1x16x1xf32> to vector<16x1xf32>
    %268 = vector.broadcast %267 : vector<16x1xf32> to vector<16x64xf32>
    %269 = arith.mulf %265, %268 : vector<16x64xf32>
    %cst_61 = arith.constant dense<0.000000e+00> : vector<64xf32>
    %270 = vector.multi_reduction <add>, %269, %cst_61 [0] : vector<16x64xf32> to vector<64xf32>
    %271 = vector.shape_cast %270 : vector<64xf32> to vector<1x64xf32>
    %272 = vector.extract_strided_slice %118 {offsets = [11, 0, 0], sizes = [1, 16, 64], strides = [1, 1, 1]} : vector<16x16x64xf32> to vector<1x16x64xf32>
    %273 = vector.shape_cast %272 : vector<1x16x64xf32> to vector<16x64xf32>
    %274 = arith.mulf %273, %265 : vector<16x64xf32>
    %275 = vector.extract_strided_slice %124 {offsets = [11, 0, 0], sizes = [1, 16, 64], strides = [1, 1, 1]} : vector<16x16x64xf32> to vector<1x16x64xf32>
    %276 = vector.shape_cast %275 : vector<1x16x64xf32> to vector<16x64xf32>
    %277 = arith.addf %274, %276 : vector<16x64xf32>
    %278 = vector.extract_strided_slice %125 {offsets = [11, 0, 0], sizes = [1, 16, 1], strides = [1, 1, 1]} : vector<16x16x1xf32> to vector<1x16x1xf32>
    %279 = vector.shape_cast %278 : vector<1x16x1xf32> to vector<16x1xf32>
    %280 = vector.broadcast %279 : vector<16x1xf32> to vector<16x64xf32>
    %281 = arith.mulf %277, %280 : vector<16x64xf32>
    %cst_62 = arith.constant dense<0.000000e+00> : vector<64xf32>
    %282 = vector.multi_reduction <add>, %281, %cst_62 [0] : vector<16x64xf32> to vector<64xf32>
    %283 = vector.shape_cast %282 : vector<64xf32> to vector<1x64xf32>
    %284 = vector.extract_strided_slice %118 {offsets = [12, 0, 0], sizes = [1, 16, 64], strides = [1, 1, 1]} : vector<16x16x64xf32> to vector<1x16x64xf32>
    %285 = vector.shape_cast %284 : vector<1x16x64xf32> to vector<16x64xf32>
    %286 = arith.mulf %285, %277 : vector<16x64xf32>
    %287 = vector.extract_strided_slice %124 {offsets = [12, 0, 0], sizes = [1, 16, 64], strides = [1, 1, 1]} : vector<16x16x64xf32> to vector<1x16x64xf32>
    %288 = vector.shape_cast %287 : vector<1x16x64xf32> to vector<16x64xf32>
    %289 = arith.addf %286, %288 : vector<16x64xf32>
    %290 = vector.extract_strided_slice %125 {offsets = [12, 0, 0], sizes = [1, 16, 1], strides = [1, 1, 1]} : vector<16x16x1xf32> to vector<1x16x1xf32>
    %291 = vector.shape_cast %290 : vector<1x16x1xf32> to vector<16x1xf32>
    %292 = vector.broadcast %291 : vector<16x1xf32> to vector<16x64xf32>
    %293 = arith.mulf %289, %292 : vector<16x64xf32>
    %cst_63 = arith.constant dense<0.000000e+00> : vector<64xf32>
    %294 = vector.multi_reduction <add>, %293, %cst_63 [0] : vector<16x64xf32> to vector<64xf32>
    %295 = vector.shape_cast %294 : vector<64xf32> to vector<1x64xf32>
    %296 = vector.extract_strided_slice %118 {offsets = [13, 0, 0], sizes = [1, 16, 64], strides = [1, 1, 1]} : vector<16x16x64xf32> to vector<1x16x64xf32>
    %297 = vector.shape_cast %296 : vector<1x16x64xf32> to vector<16x64xf32>
    %298 = arith.mulf %297, %289 : vector<16x64xf32>
    %299 = vector.extract_strided_slice %124 {offsets = [13, 0, 0], sizes = [1, 16, 64], strides = [1, 1, 1]} : vector<16x16x64xf32> to vector<1x16x64xf32>
    %300 = vector.shape_cast %299 : vector<1x16x64xf32> to vector<16x64xf32>
    %301 = arith.addf %298, %300 : vector<16x64xf32>
    %302 = vector.extract_strided_slice %125 {offsets = [13, 0, 0], sizes = [1, 16, 1], strides = [1, 1, 1]} : vector<16x16x1xf32> to vector<1x16x1xf32>
    %303 = vector.shape_cast %302 : vector<1x16x1xf32> to vector<16x1xf32>
    %304 = vector.broadcast %303 : vector<16x1xf32> to vector<16x64xf32>
    %305 = arith.mulf %301, %304 : vector<16x64xf32>
    %cst_64 = arith.constant dense<0.000000e+00> : vector<64xf32>
    %306 = vector.multi_reduction <add>, %305, %cst_64 [0] : vector<16x64xf32> to vector<64xf32>
    %307 = vector.shape_cast %306 : vector<64xf32> to vector<1x64xf32>
    %308 = vector.extract_strided_slice %118 {offsets = [14, 0, 0], sizes = [1, 16, 64], strides = [1, 1, 1]} : vector<16x16x64xf32> to vector<1x16x64xf32>
    %309 = vector.shape_cast %308 : vector<1x16x64xf32> to vector<16x64xf32>
    %310 = arith.mulf %309, %301 : vector<16x64xf32>
    %311 = vector.extract_strided_slice %124 {offsets = [14, 0, 0], sizes = [1, 16, 64], strides = [1, 1, 1]} : vector<16x16x64xf32> to vector<1x16x64xf32>
    %312 = vector.shape_cast %311 : vector<1x16x64xf32> to vector<16x64xf32>
    %313 = arith.addf %310, %312 : vector<16x64xf32>
    %314 = vector.extract_strided_slice %125 {offsets = [14, 0, 0], sizes = [1, 16, 1], strides = [1, 1, 1]} : vector<16x16x1xf32> to vector<1x16x1xf32>
    %315 = vector.shape_cast %314 : vector<1x16x1xf32> to vector<16x1xf32>
    %316 = vector.broadcast %315 : vector<16x1xf32> to vector<16x64xf32>
    %317 = arith.mulf %313, %316 : vector<16x64xf32>
    %cst_65 = arith.constant dense<0.000000e+00> : vector<64xf32>
    %318 = vector.multi_reduction <add>, %317, %cst_65 [0] : vector<16x64xf32> to vector<64xf32>
    %319 = vector.shape_cast %318 : vector<64xf32> to vector<1x64xf32>
    %320 = vector.extract_strided_slice %118 {offsets = [15, 0, 0], sizes = [1, 16, 64], strides = [1, 1, 1]} : vector<16x16x64xf32> to vector<1x16x64xf32>
    %321 = vector.shape_cast %320 : vector<1x16x64xf32> to vector<16x64xf32>
    %322 = arith.mulf %321, %313 : vector<16x64xf32>
    %323 = vector.extract_strided_slice %124 {offsets = [15, 0, 0], sizes = [1, 16, 64], strides = [1, 1, 1]} : vector<16x16x64xf32> to vector<1x16x64xf32>
    %324 = vector.shape_cast %323 : vector<1x16x64xf32> to vector<16x64xf32>
    %325 = arith.addf %322, %324 : vector<16x64xf32>
    %326 = vector.extract_strided_slice %125 {offsets = [15, 0, 0], sizes = [1, 16, 1], strides = [1, 1, 1]} : vector<16x16x1xf32> to vector<1x16x1xf32>
    %327 = vector.shape_cast %326 : vector<1x16x1xf32> to vector<16x1xf32>
    %328 = vector.broadcast %327 : vector<16x1xf32> to vector<16x64xf32>
    %329 = arith.mulf %325, %328 : vector<16x64xf32>
    %cst_66 = arith.constant dense<0.000000e+00> : vector<64xf32>
    %330 = vector.multi_reduction <add>, %329, %cst_66 [0] : vector<16x64xf32> to vector<64xf32>
    %331 = vector.shape_cast %330 : vector<64xf32> to vector<1x64xf32>
    %332 = tpu.concatenate %150, %162, %174, %186, %198, %210, %222, %234, %247, %259, %271, %283, %295, %307, %319, %331 in 0 : vector<1x64xf32>, vector<1x64xf32>, vector<1x64xf32>, vector<1x64xf32>, vector<1x64xf32>, vector<1x64xf32>, vector<1x64xf32>, vector<1x64xf32>, vector<1x64xf32>, vector<1x64xf32>, vector<1x64xf32>, vector<1x64xf32>, vector<1x64xf32>, vector<1x64xf32>, vector<1x64xf32>, vector<1x64xf32> -> vector<16x64xf32>
    %333 = arith.addf %332, %137 : vector<16x64xf32>
    %334 = arith.mulf %333, %133 : vector<16x64xf32>
    %c0_67 = arith.constant 0 : index
    %c0_68 = arith.constant 0 : index
    %c0_69 = arith.constant 0 : index
    %335 = vector.load %arg10[%c0_67, %c0_68, %c0_69] : memref<2x64x32xf32, #tpu.memory_space<vmem>>, vector<1x64x32xf32>
    %336 = vector.shape_cast %335 : vector<1x64x32xf32> to vector<64x32xf32>
    %cst_70 = arith.constant dense<0.000000e+00> : vector<16x32xf32>
    %337 = tpu.matmul %334, %336, %cst_70 {dimension_numbers = #tpu.dot_dimension_numbers<[1], [0], [0], [1], [0, 0, 1, 1], [], []>} : vector<16x64xf32>, vector<64x32xf32>, vector<16x32xf32> -> vector<16x32xf32>
    %338 = arith.addf %337, %2 : vector<16x32xf32>
    %c0_71 = arith.constant 0 : index
    %c0_72 = arith.constant 0 : index
    %c0_73 = arith.constant 0 : index
    %339 = vector.load %arg11[%c0_71, %c0_72, %c0_73] : memref<2x1x32xf32, #tpu.memory_space<vmem>>, vector<1x1x32xf32>
    %340 = vector.shape_cast %339 : vector<1x1x32xf32> to vector<1x32xf32>
    %341 = arith.mulf %338, %338 : vector<16x32xf32>
    %cst_74 = arith.constant dense<0.000000e+00> : vector<16xf32>
    %342 = vector.multi_reduction <add>, %341, %cst_74 [1] : vector<16x32xf32> to vector<16xf32>
    %343 = vector.shape_cast %342 : vector<16xf32> to vector<16x1xf32>
    %cst_75 = arith.constant 3.200000e+01 : f32
    %344 = vector.broadcast %cst_75 : f32 to vector<16x1xf32>
    %345 = arith.divf %343, %344 : vector<16x1xf32>
    %cst_76 = arith.constant 9.99999974E-6 : f32
    %346 = vector.broadcast %cst_76 : f32 to vector<16x1xf32>
    %347 = arith.addf %345, %346 : vector<16x1xf32>
    %348 = math.rsqrt %347 : vector<16x1xf32>
    %349 = vector.broadcast %348 : vector<16x1xf32> to vector<16x32xf32>
    %350 = arith.mulf %338, %349 : vector<16x32xf32>
    %351 = vector.broadcast %340 : vector<1x32xf32> to vector<16x32xf32>
    %352 = arith.mulf %350, %351 : vector<16x32xf32>
    %c0_77 = arith.constant 0 : index
    %c0_78 = arith.constant 0 : index
    %c0_79 = arith.constant 0 : index
    %353 = vector.load %arg12[%c0_77, %c0_78, %c0_79] : memref<2x32x64xf32, #tpu.memory_space<vmem>>, vector<1x32x64xf32>
    %354 = vector.shape_cast %353 : vector<1x32x64xf32> to vector<32x64xf32>
    %cst_80 = arith.constant dense<0.000000e+00> : vector<16x64xf32>
    %355 = tpu.matmul %352, %354, %cst_80 {dimension_numbers = #tpu.dot_dimension_numbers<[1], [0], [0], [1], [0, 0, 1, 1], [], []>} : vector<16x32xf32>, vector<32x64xf32>, vector<16x64xf32> -> vector<16x64xf32>
    %356 = vector.extract_strided_slice %355 {offsets = [0, 32], sizes = [16, 32], strides = [1, 1]} : vector<16x64xf32> to vector<16x32xf32>
    %357 = vector.extract_strided_slice %355 {offsets = [0, 0], sizes = [16, 32], strides = [1, 1]} : vector<16x64xf32> to vector<16x32xf32>
    %cst_81 = arith.constant 0.000000e+00 : f32
    %358 = vector.broadcast %cst_81 : f32 to vector<16x32xf32>
    %359 = arith.subf %358, %356 : vector<16x32xf32>
    %360 = math.exp %359 : vector<16x32xf32>
    %cst_82 = arith.constant 1.000000e+00 : f32
    %361 = vector.broadcast %cst_82 : f32 to vector<16x32xf32>
    %362 = arith.addf %361, %360 : vector<16x32xf32>
    %cst_83 = arith.constant 1.000000e+00 : f32
    %363 = vector.broadcast %cst_83 : f32 to vector<16x32xf32>
    %364 = arith.divf %363, %362 : vector<16x32xf32>
    %365 = arith.mulf %356, %364 : vector<16x32xf32>
    %366 = arith.mulf %357, %365 : vector<16x32xf32>
    %c0_84 = arith.constant 0 : index
    %c0_85 = arith.constant 0 : index
    %c0_86 = arith.constant 0 : index
    %367 = vector.load %arg13[%c0_84, %c0_85, %c0_86] : memref<2x32x32xf32, #tpu.memory_space<vmem>>, vector<1x32x32xf32>
    %368 = vector.shape_cast %367 : vector<1x32x32xf32> to vector<32x32xf32>
    %cst_87 = arith.constant dense<0.000000e+00> : vector<16x32xf32>
    %369 = tpu.matmul %366, %368, %cst_87 {dimension_numbers = #tpu.dot_dimension_numbers<[1], [0], [0], [1], [0, 0, 1, 1], [], []>} : vector<16x32xf32>, vector<32x32xf32>, vector<16x32xf32> -> vector<16x32xf32>
    %370 = arith.addf %369, %338 : vector<16x32xf32>
    %c1 = arith.constant 1 : index
    %c0_88 = arith.constant 0 : index
    %c0_89 = arith.constant 0 : index
    %371 = vector.load %arg1[%c1, %c0_88, %c0_89] : memref<2x1x32xf32, #tpu.memory_space<vmem>>, vector<1x1x32xf32>
    %372 = vector.shape_cast %371 : vector<1x1x32xf32> to vector<1x32xf32>
    %373 = arith.mulf %370, %370 : vector<16x32xf32>
    %cst_90 = arith.constant dense<0.000000e+00> : vector<16xf32>
    %374 = vector.multi_reduction <add>, %373, %cst_90 [1] : vector<16x32xf32> to vector<16xf32>
    %375 = vector.shape_cast %374 : vector<16xf32> to vector<16x1xf32>
    %cst_91 = arith.constant 3.200000e+01 : f32
    %376 = vector.broadcast %cst_91 : f32 to vector<16x1xf32>
    %377 = arith.divf %375, %376 : vector<16x1xf32>
    %cst_92 = arith.constant 9.99999974E-6 : f32
    %378 = vector.broadcast %cst_92 : f32 to vector<16x1xf32>
    %379 = arith.addf %377, %378 : vector<16x1xf32>
    %380 = math.rsqrt %379 : vector<16x1xf32>
    %381 = vector.broadcast %380 : vector<16x1xf32> to vector<16x32xf32>
    %382 = arith.mulf %370, %381 : vector<16x32xf32>
    %383 = vector.broadcast %372 : vector<1x32xf32> to vector<16x32xf32>
    %384 = arith.mulf %382, %383 : vector<16x32xf32>
    %c1_93 = arith.constant 1 : index
    %c0_94 = arith.constant 0 : index
    %c0_95 = arith.constant 0 : index
    %385 = vector.load %arg2[%c1_93, %c0_94, %c0_95] : memref<2x32x128xf32, #tpu.memory_space<vmem>>, vector<1x32x128xf32>
    %386 = vector.shape_cast %385 : vector<1x32x128xf32> to vector<32x128xf32>
    %cst_96 = arith.constant dense<0.000000e+00> : vector<16x128xf32>
    %387 = tpu.matmul %384, %386, %cst_96 {dimension_numbers = #tpu.dot_dimension_numbers<[1], [0], [0], [1], [0, 0, 1, 1], [], []>} : vector<16x32xf32>, vector<32x128xf32>, vector<16x128xf32> -> vector<16x128xf32>
    %388 = vector.extract_strided_slice %387 {offsets = [0, 0], sizes = [16, 64], strides = [1, 1]} : vector<16x128xf32> to vector<16x64xf32>
    %389 = vector.extract_strided_slice %387 {offsets = [0, 64], sizes = [16, 64], strides = [1, 1]} : vector<16x128xf32> to vector<16x64xf32>
    %c1_97 = arith.constant 1 : index
    %c0_98 = arith.constant 0 : index
    %c0_99 = arith.constant 0 : index
    %390 = vector.load %arg3[%c1_97, %c0_98, %c0_99] : memref<2x4x64xf32, #tpu.memory_space<vmem>>, vector<1x4x64xf32>
    %391 = vector.shape_cast %390 : vector<1x4x64xf32> to vector<4x64xf32>
    %392 = vector.extract_strided_slice %388 {offsets = [0, 0], sizes = [8, 64], strides = [1, 1]} : vector<16x64xf32> to vector<8x64xf32>
    %393 = vector.extract_strided_slice %391 {offsets = [3, 0], sizes = [1, 64], strides = [1, 1]} : vector<4x64xf32> to vector<1x64xf32>
    %394 = vector.broadcast %393 : vector<1x64xf32> to vector<8x64xf32>
    %395 = arith.mulf %392, %394 : vector<8x64xf32>
    %cst_100 = arith.constant 0.000000e+00 : f32
    %396 = vector.broadcast %cst_100 : f32 to vector<1x64xf32>
    %397 = vector.extract_strided_slice %392 {offsets = [0, 0], sizes = [7, 64], strides = [1, 1]} : vector<8x64xf32> to vector<7x64xf32>
    %398 = tpu.concatenate %396, %397 in 0 : vector<1x64xf32>, vector<7x64xf32> -> vector<8x64xf32>
    %399 = vector.extract_strided_slice %391 {offsets = [2, 0], sizes = [1, 64], strides = [1, 1]} : vector<4x64xf32> to vector<1x64xf32>
    %400 = vector.broadcast %399 : vector<1x64xf32> to vector<8x64xf32>
    %401 = arith.mulf %398, %400 : vector<8x64xf32>
    %402 = arith.addf %395, %401 : vector<8x64xf32>
    %cst_101 = arith.constant 0.000000e+00 : f32
    %403 = vector.broadcast %cst_101 : f32 to vector<2x64xf32>
    %404 = vector.extract_strided_slice %392 {offsets = [0, 0], sizes = [6, 64], strides = [1, 1]} : vector<8x64xf32> to vector<6x64xf32>
    %405 = tpu.concatenate %403, %404 in 0 : vector<2x64xf32>, vector<6x64xf32> -> vector<8x64xf32>
    %406 = vector.extract_strided_slice %391 {offsets = [1, 0], sizes = [1, 64], strides = [1, 1]} : vector<4x64xf32> to vector<1x64xf32>
    %407 = vector.broadcast %406 : vector<1x64xf32> to vector<8x64xf32>
    %408 = arith.mulf %405, %407 : vector<8x64xf32>
    %409 = arith.addf %402, %408 : vector<8x64xf32>
    %cst_102 = arith.constant 0.000000e+00 : f32
    %410 = vector.broadcast %cst_102 : f32 to vector<3x64xf32>
    %411 = vector.extract_strided_slice %392 {offsets = [0, 0], sizes = [5, 64], strides = [1, 1]} : vector<8x64xf32> to vector<5x64xf32>
    %412 = tpu.concatenate %410, %411 in 0 : vector<3x64xf32>, vector<5x64xf32> -> vector<8x64xf32>
    %413 = vector.extract_strided_slice %391 {offsets = [0, 0], sizes = [1, 64], strides = [1, 1]} : vector<4x64xf32> to vector<1x64xf32>
    %414 = vector.broadcast %413 : vector<1x64xf32> to vector<8x64xf32>
    %415 = arith.mulf %412, %414 : vector<8x64xf32>
    %416 = arith.addf %409, %415 : vector<8x64xf32>
    %417 = vector.extract_strided_slice %388 {offsets = [8, 0], sizes = [8, 64], strides = [1, 1]} : vector<16x64xf32> to vector<8x64xf32>
    %418 = vector.extract_strided_slice %391 {offsets = [3, 0], sizes = [1, 64], strides = [1, 1]} : vector<4x64xf32> to vector<1x64xf32>
    %419 = vector.broadcast %418 : vector<1x64xf32> to vector<8x64xf32>
    %420 = arith.mulf %417, %419 : vector<8x64xf32>
    %cst_103 = arith.constant 0.000000e+00 : f32
    %421 = vector.broadcast %cst_103 : f32 to vector<1x64xf32>
    %422 = vector.extract_strided_slice %417 {offsets = [0, 0], sizes = [7, 64], strides = [1, 1]} : vector<8x64xf32> to vector<7x64xf32>
    %423 = tpu.concatenate %421, %422 in 0 : vector<1x64xf32>, vector<7x64xf32> -> vector<8x64xf32>
    %424 = vector.extract_strided_slice %391 {offsets = [2, 0], sizes = [1, 64], strides = [1, 1]} : vector<4x64xf32> to vector<1x64xf32>
    %425 = vector.broadcast %424 : vector<1x64xf32> to vector<8x64xf32>
    %426 = arith.mulf %423, %425 : vector<8x64xf32>
    %427 = arith.addf %420, %426 : vector<8x64xf32>
    %cst_104 = arith.constant 0.000000e+00 : f32
    %428 = vector.broadcast %cst_104 : f32 to vector<2x64xf32>
    %429 = vector.extract_strided_slice %417 {offsets = [0, 0], sizes = [6, 64], strides = [1, 1]} : vector<8x64xf32> to vector<6x64xf32>
    %430 = tpu.concatenate %428, %429 in 0 : vector<2x64xf32>, vector<6x64xf32> -> vector<8x64xf32>
    %431 = vector.extract_strided_slice %391 {offsets = [1, 0], sizes = [1, 64], strides = [1, 1]} : vector<4x64xf32> to vector<1x64xf32>
    %432 = vector.broadcast %431 : vector<1x64xf32> to vector<8x64xf32>
    %433 = arith.mulf %430, %432 : vector<8x64xf32>
    %434 = arith.addf %427, %433 : vector<8x64xf32>
    %cst_105 = arith.constant 0.000000e+00 : f32
    %435 = vector.broadcast %cst_105 : f32 to vector<3x64xf32>
    %436 = vector.extract_strided_slice %417 {offsets = [0, 0], sizes = [5, 64], strides = [1, 1]} : vector<8x64xf32> to vector<5x64xf32>
    %437 = tpu.concatenate %435, %436 in 0 : vector<3x64xf32>, vector<5x64xf32> -> vector<8x64xf32>
    %438 = vector.extract_strided_slice %391 {offsets = [0, 0], sizes = [1, 64], strides = [1, 1]} : vector<4x64xf32> to vector<1x64xf32>
    %439 = vector.broadcast %438 : vector<1x64xf32> to vector<8x64xf32>
    %440 = arith.mulf %437, %439 : vector<8x64xf32>
    %441 = arith.addf %434, %440 : vector<8x64xf32>
    %442 = tpu.concatenate %416, %441 in 0 : vector<8x64xf32>, vector<8x64xf32> -> vector<16x64xf32>
    %c1_106 = arith.constant 1 : index
    %c0_107 = arith.constant 0 : index
    %c0_108 = arith.constant 0 : index
    %443 = vector.load %arg4[%c1_106, %c0_107, %c0_108] : memref<2x1x64xf32, #tpu.memory_space<vmem>>, vector<1x1x64xf32>
    %444 = vector.shape_cast %443 : vector<1x1x64xf32> to vector<1x64xf32>
    %445 = vector.broadcast %444 : vector<1x64xf32> to vector<16x64xf32>
    %446 = arith.addf %442, %445 : vector<16x64xf32>
    %cst_109 = arith.constant 0.000000e+00 : f32
    %447 = vector.broadcast %cst_109 : f32 to vector<16x64xf32>
    %448 = arith.subf %447, %446 : vector<16x64xf32>
    %449 = math.exp %448 : vector<16x64xf32>
    %cst_110 = arith.constant 1.000000e+00 : f32
    %450 = vector.broadcast %cst_110 : f32 to vector<16x64xf32>
    %451 = arith.addf %450, %449 : vector<16x64xf32>
    %cst_111 = arith.constant 1.000000e+00 : f32
    %452 = vector.broadcast %cst_111 : f32 to vector<16x64xf32>
    %453 = arith.divf %452, %451 : vector<16x64xf32>
    %454 = arith.mulf %446, %453 : vector<16x64xf32>
    %c1_112 = arith.constant 1 : index
    %c0_113 = arith.constant 0 : index
    %c0_114 = arith.constant 0 : index
    %455 = vector.load %arg5[%c1_112, %c0_113, %c0_114] : memref<2x64x34xf32, #tpu.memory_space<vmem>>, vector<1x64x34xf32>
    %456 = vector.shape_cast %455 : vector<1x64x34xf32> to vector<64x34xf32>
    %cst_115 = arith.constant dense<0.000000e+00> : vector<16x34xf32>
    %457 = tpu.matmul %454, %456, %cst_115 {dimension_numbers = #tpu.dot_dimension_numbers<[1], [0], [0], [1], [0, 0, 1, 1], [], []>} : vector<16x64xf32>, vector<64x34xf32>, vector<16x34xf32> -> vector<16x34xf32>
    %458 = vector.extract_strided_slice %457 {offsets = [0, 0], sizes = [16, 2], strides = [1, 1]} : vector<16x34xf32> to vector<16x2xf32>
    %459 = vector.extract_strided_slice %457 {offsets = [0, 2], sizes = [16, 16], strides = [1, 1]} : vector<16x34xf32> to vector<16x16xf32>
    %460 = vector.extract_strided_slice %457 {offsets = [0, 18], sizes = [16, 16], strides = [1, 1]} : vector<16x34xf32> to vector<16x16xf32>
    %c1_116 = arith.constant 1 : index
    %c0_117 = arith.constant 0 : index
    %c0_118 = arith.constant 0 : index
    %461 = vector.load %arg6[%c1_116, %c0_117, %c0_118] : memref<2x2x64xf32, #tpu.memory_space<vmem>>, vector<1x2x64xf32>
    %462 = vector.shape_cast %461 : vector<1x2x64xf32> to vector<2x64xf32>
    %cst_119 = arith.constant dense<0.000000e+00> : vector<16x64xf32>
    %463 = tpu.matmul %458, %462, %cst_119 {dimension_numbers = #tpu.dot_dimension_numbers<[1], [0], [0], [1], [0, 0, 1, 1], [], []>} : vector<16x2xf32>, vector<2x64xf32>, vector<16x64xf32> -> vector<16x64xf32>
    %c1_120 = arith.constant 1 : index
    %c0_121 = arith.constant 0 : index
    %c0_122 = arith.constant 0 : index
    %464 = vector.load %arg7[%c1_120, %c0_121, %c0_122] : memref<2x1x64xf32, #tpu.memory_space<vmem>>, vector<1x1x64xf32>
    %465 = vector.shape_cast %464 : vector<1x1x64xf32> to vector<1x64xf32>
    %466 = vector.broadcast %465 : vector<1x64xf32> to vector<16x64xf32>
    %467 = arith.addf %463, %466 : vector<16x64xf32>
    %c1_123 = arith.constant 1 : index
    %c0_124 = arith.constant 0 : index
    %c0_125 = arith.constant 0 : index
    %468 = vector.load %arg8[%c1_123, %c0_124, %c0_125] : memref<2x16x64xf32, #tpu.memory_space<vmem>>, vector<1x16x64xf32>
    %469 = vector.shape_cast %468 : vector<1x16x64xf32> to vector<16x64xf32>
    %470 = math.exp %469 : vector<16x64xf32>
    %cst_126 = arith.constant 0.000000e+00 : f32
    %471 = vector.broadcast %cst_126 : f32 to vector<16x64xf32>
    %472 = arith.subf %471, %470 : vector<16x64xf32>
    %cst_127 = arith.constant 0.000000e+00 : f32
    %473 = vector.broadcast %cst_127 : f32 to vector<16x64xf32>
    %474 = arith.maximumf %467, %473 : vector<16x64xf32>
    %475 = math.absf %467 : vector<16x64xf32>
    %cst_128 = arith.constant 0.000000e+00 : f32
    %476 = vector.broadcast %cst_128 : f32 to vector<16x64xf32>
    %477 = arith.subf %476, %475 : vector<16x64xf32>
    %478 = math.exp %477 : vector<16x64xf32>
    %479 = math.log1p %478 : vector<16x64xf32>
    %480 = arith.addf %474, %479 : vector<16x64xf32>
    %481 = vector.shape_cast %480 : vector<16x64xf32> to vector<16x1x64xf32>
    %482 = vector.shape_cast %472 : vector<16x64xf32> to vector<1x16x64xf32>
    %483 = vector.broadcast %481 : vector<16x1x64xf32> to vector<16x16x64xf32>
    %484 = vector.broadcast %482 : vector<1x16x64xf32> to vector<16x16x64xf32>
    %485 = arith.mulf %483, %484 : vector<16x16x64xf32>
    %486 = math.exp %485 : vector<16x16x64xf32>
    %487 = arith.mulf %480, %454 : vector<16x64xf32>
    %488 = vector.shape_cast %487 : vector<16x64xf32> to vector<16x1x64xf32>
    %489 = vector.shape_cast %459 : vector<16x16xf32> to vector<16x16x1xf32>
    %490 = vector.broadcast %488 : vector<16x1x64xf32> to vector<16x16x64xf32>
    %491 = vector.broadcast %489 : vector<16x16x1xf32> to vector<16x16x64xf32>
    %492 = arith.mulf %490, %491 : vector<16x16x64xf32>
    %493 = vector.shape_cast %460 : vector<16x16xf32> to vector<16x16x1xf32>
    %cst_129 = arith.constant 0.000000e+00 : f32
    %494 = vector.broadcast %cst_129 : f32 to vector<16x64xf32>
    %495 = arith.subf %494, %389 : vector<16x64xf32>
    %496 = math.exp %495 : vector<16x64xf32>
    %cst_130 = arith.constant 1.000000e+00 : f32
    %497 = vector.broadcast %cst_130 : f32 to vector<16x64xf32>
    %498 = arith.addf %497, %496 : vector<16x64xf32>
    %cst_131 = arith.constant 1.000000e+00 : f32
    %499 = vector.broadcast %cst_131 : f32 to vector<16x64xf32>
    %500 = arith.divf %499, %498 : vector<16x64xf32>
    %501 = arith.mulf %389, %500 : vector<16x64xf32>
    %c1_132 = arith.constant 1 : index
    %c0_133 = arith.constant 0 : index
    %c0_134 = arith.constant 0 : index
    %502 = vector.load %arg9[%c1_132, %c0_133, %c0_134] : memref<2x1x64xf32, #tpu.memory_space<vmem>>, vector<1x1x64xf32>
    %503 = vector.shape_cast %502 : vector<1x1x64xf32> to vector<1x64xf32>
    %504 = vector.broadcast %503 : vector<1x64xf32> to vector<16x64xf32>
    %505 = arith.mulf %504, %454 : vector<16x64xf32>
    %cst_135 = arith.constant 0.000000e+00 : f32
    %506 = vector.broadcast %cst_135 : f32 to vector<16x64xf32>
    %507 = vector.extract_strided_slice %486 {offsets = [0, 0, 0], sizes = [1, 16, 64], strides = [1, 1, 1]} : vector<16x16x64xf32> to vector<1x16x64xf32>
    %508 = vector.shape_cast %507 : vector<1x16x64xf32> to vector<16x64xf32>
    %509 = arith.mulf %508, %506 : vector<16x64xf32>
    %510 = vector.extract_strided_slice %492 {offsets = [0, 0, 0], sizes = [1, 16, 64], strides = [1, 1, 1]} : vector<16x16x64xf32> to vector<1x16x64xf32>
    %511 = vector.shape_cast %510 : vector<1x16x64xf32> to vector<16x64xf32>
    %512 = arith.addf %509, %511 : vector<16x64xf32>
    %513 = vector.extract_strided_slice %493 {offsets = [0, 0, 0], sizes = [1, 16, 1], strides = [1, 1, 1]} : vector<16x16x1xf32> to vector<1x16x1xf32>
    %514 = vector.shape_cast %513 : vector<1x16x1xf32> to vector<16x1xf32>
    %515 = vector.broadcast %514 : vector<16x1xf32> to vector<16x64xf32>
    %516 = arith.mulf %512, %515 : vector<16x64xf32>
    %cst_136 = arith.constant dense<0.000000e+00> : vector<64xf32>
    %517 = vector.multi_reduction <add>, %516, %cst_136 [0] : vector<16x64xf32> to vector<64xf32>
    %518 = vector.shape_cast %517 : vector<64xf32> to vector<1x64xf32>
    %519 = vector.extract_strided_slice %486 {offsets = [1, 0, 0], sizes = [1, 16, 64], strides = [1, 1, 1]} : vector<16x16x64xf32> to vector<1x16x64xf32>
    %520 = vector.shape_cast %519 : vector<1x16x64xf32> to vector<16x64xf32>
    %521 = arith.mulf %520, %512 : vector<16x64xf32>
    %522 = vector.extract_strided_slice %492 {offsets = [1, 0, 0], sizes = [1, 16, 64], strides = [1, 1, 1]} : vector<16x16x64xf32> to vector<1x16x64xf32>
    %523 = vector.shape_cast %522 : vector<1x16x64xf32> to vector<16x64xf32>
    %524 = arith.addf %521, %523 : vector<16x64xf32>
    %525 = vector.extract_strided_slice %493 {offsets = [1, 0, 0], sizes = [1, 16, 1], strides = [1, 1, 1]} : vector<16x16x1xf32> to vector<1x16x1xf32>
    %526 = vector.shape_cast %525 : vector<1x16x1xf32> to vector<16x1xf32>
    %527 = vector.broadcast %526 : vector<16x1xf32> to vector<16x64xf32>
    %528 = arith.mulf %524, %527 : vector<16x64xf32>
    %cst_137 = arith.constant dense<0.000000e+00> : vector<64xf32>
    %529 = vector.multi_reduction <add>, %528, %cst_137 [0] : vector<16x64xf32> to vector<64xf32>
    %530 = vector.shape_cast %529 : vector<64xf32> to vector<1x64xf32>
    %531 = vector.extract_strided_slice %486 {offsets = [2, 0, 0], sizes = [1, 16, 64], strides = [1, 1, 1]} : vector<16x16x64xf32> to vector<1x16x64xf32>
    %532 = vector.shape_cast %531 : vector<1x16x64xf32> to vector<16x64xf32>
    %533 = arith.mulf %532, %524 : vector<16x64xf32>
    %534 = vector.extract_strided_slice %492 {offsets = [2, 0, 0], sizes = [1, 16, 64], strides = [1, 1, 1]} : vector<16x16x64xf32> to vector<1x16x64xf32>
    %535 = vector.shape_cast %534 : vector<1x16x64xf32> to vector<16x64xf32>
    %536 = arith.addf %533, %535 : vector<16x64xf32>
    %537 = vector.extract_strided_slice %493 {offsets = [2, 0, 0], sizes = [1, 16, 1], strides = [1, 1, 1]} : vector<16x16x1xf32> to vector<1x16x1xf32>
    %538 = vector.shape_cast %537 : vector<1x16x1xf32> to vector<16x1xf32>
    %539 = vector.broadcast %538 : vector<16x1xf32> to vector<16x64xf32>
    %540 = arith.mulf %536, %539 : vector<16x64xf32>
    %cst_138 = arith.constant dense<0.000000e+00> : vector<64xf32>
    %541 = vector.multi_reduction <add>, %540, %cst_138 [0] : vector<16x64xf32> to vector<64xf32>
    %542 = vector.shape_cast %541 : vector<64xf32> to vector<1x64xf32>
    %543 = vector.extract_strided_slice %486 {offsets = [3, 0, 0], sizes = [1, 16, 64], strides = [1, 1, 1]} : vector<16x16x64xf32> to vector<1x16x64xf32>
    %544 = vector.shape_cast %543 : vector<1x16x64xf32> to vector<16x64xf32>
    %545 = arith.mulf %544, %536 : vector<16x64xf32>
    %546 = vector.extract_strided_slice %492 {offsets = [3, 0, 0], sizes = [1, 16, 64], strides = [1, 1, 1]} : vector<16x16x64xf32> to vector<1x16x64xf32>
    %547 = vector.shape_cast %546 : vector<1x16x64xf32> to vector<16x64xf32>
    %548 = arith.addf %545, %547 : vector<16x64xf32>
    %549 = vector.extract_strided_slice %493 {offsets = [3, 0, 0], sizes = [1, 16, 1], strides = [1, 1, 1]} : vector<16x16x1xf32> to vector<1x16x1xf32>
    %550 = vector.shape_cast %549 : vector<1x16x1xf32> to vector<16x1xf32>
    %551 = vector.broadcast %550 : vector<16x1xf32> to vector<16x64xf32>
    %552 = arith.mulf %548, %551 : vector<16x64xf32>
    %cst_139 = arith.constant dense<0.000000e+00> : vector<64xf32>
    %553 = vector.multi_reduction <add>, %552, %cst_139 [0] : vector<16x64xf32> to vector<64xf32>
    %554 = vector.shape_cast %553 : vector<64xf32> to vector<1x64xf32>
    %555 = vector.extract_strided_slice %486 {offsets = [4, 0, 0], sizes = [1, 16, 64], strides = [1, 1, 1]} : vector<16x16x64xf32> to vector<1x16x64xf32>
    %556 = vector.shape_cast %555 : vector<1x16x64xf32> to vector<16x64xf32>
    %557 = arith.mulf %556, %548 : vector<16x64xf32>
    %558 = vector.extract_strided_slice %492 {offsets = [4, 0, 0], sizes = [1, 16, 64], strides = [1, 1, 1]} : vector<16x16x64xf32> to vector<1x16x64xf32>
    %559 = vector.shape_cast %558 : vector<1x16x64xf32> to vector<16x64xf32>
    %560 = arith.addf %557, %559 : vector<16x64xf32>
    %561 = vector.extract_strided_slice %493 {offsets = [4, 0, 0], sizes = [1, 16, 1], strides = [1, 1, 1]} : vector<16x16x1xf32> to vector<1x16x1xf32>
    %562 = vector.shape_cast %561 : vector<1x16x1xf32> to vector<16x1xf32>
    %563 = vector.broadcast %562 : vector<16x1xf32> to vector<16x64xf32>
    %564 = arith.mulf %560, %563 : vector<16x64xf32>
    %cst_140 = arith.constant dense<0.000000e+00> : vector<64xf32>
    %565 = vector.multi_reduction <add>, %564, %cst_140 [0] : vector<16x64xf32> to vector<64xf32>
    %566 = vector.shape_cast %565 : vector<64xf32> to vector<1x64xf32>
    %567 = vector.extract_strided_slice %486 {offsets = [5, 0, 0], sizes = [1, 16, 64], strides = [1, 1, 1]} : vector<16x16x64xf32> to vector<1x16x64xf32>
    %568 = vector.shape_cast %567 : vector<1x16x64xf32> to vector<16x64xf32>
    %569 = arith.mulf %568, %560 : vector<16x64xf32>
    %570 = vector.extract_strided_slice %492 {offsets = [5, 0, 0], sizes = [1, 16, 64], strides = [1, 1, 1]} : vector<16x16x64xf32> to vector<1x16x64xf32>
    %571 = vector.shape_cast %570 : vector<1x16x64xf32> to vector<16x64xf32>
    %572 = arith.addf %569, %571 : vector<16x64xf32>
    %573 = vector.extract_strided_slice %493 {offsets = [5, 0, 0], sizes = [1, 16, 1], strides = [1, 1, 1]} : vector<16x16x1xf32> to vector<1x16x1xf32>
    %574 = vector.shape_cast %573 : vector<1x16x1xf32> to vector<16x1xf32>
    %575 = vector.broadcast %574 : vector<16x1xf32> to vector<16x64xf32>
    %576 = arith.mulf %572, %575 : vector<16x64xf32>
    %cst_141 = arith.constant dense<0.000000e+00> : vector<64xf32>
    %577 = vector.multi_reduction <add>, %576, %cst_141 [0] : vector<16x64xf32> to vector<64xf32>
    %578 = vector.shape_cast %577 : vector<64xf32> to vector<1x64xf32>
    %579 = vector.extract_strided_slice %486 {offsets = [6, 0, 0], sizes = [1, 16, 64], strides = [1, 1, 1]} : vector<16x16x64xf32> to vector<1x16x64xf32>
    %580 = vector.shape_cast %579 : vector<1x16x64xf32> to vector<16x64xf32>
    %581 = arith.mulf %580, %572 : vector<16x64xf32>
    %582 = vector.extract_strided_slice %492 {offsets = [6, 0, 0], sizes = [1, 16, 64], strides = [1, 1, 1]} : vector<16x16x64xf32> to vector<1x16x64xf32>
    %583 = vector.shape_cast %582 : vector<1x16x64xf32> to vector<16x64xf32>
    %584 = arith.addf %581, %583 : vector<16x64xf32>
    %585 = vector.extract_strided_slice %493 {offsets = [6, 0, 0], sizes = [1, 16, 1], strides = [1, 1, 1]} : vector<16x16x1xf32> to vector<1x16x1xf32>
    %586 = vector.shape_cast %585 : vector<1x16x1xf32> to vector<16x1xf32>
    %587 = vector.broadcast %586 : vector<16x1xf32> to vector<16x64xf32>
    %588 = arith.mulf %584, %587 : vector<16x64xf32>
    %cst_142 = arith.constant dense<0.000000e+00> : vector<64xf32>
    %589 = vector.multi_reduction <add>, %588, %cst_142 [0] : vector<16x64xf32> to vector<64xf32>
    %590 = vector.shape_cast %589 : vector<64xf32> to vector<1x64xf32>
    %591 = vector.extract_strided_slice %486 {offsets = [7, 0, 0], sizes = [1, 16, 64], strides = [1, 1, 1]} : vector<16x16x64xf32> to vector<1x16x64xf32>
    %592 = vector.shape_cast %591 : vector<1x16x64xf32> to vector<16x64xf32>
    %593 = arith.mulf %592, %584 : vector<16x64xf32>
    %594 = vector.extract_strided_slice %492 {offsets = [7, 0, 0], sizes = [1, 16, 64], strides = [1, 1, 1]} : vector<16x16x64xf32> to vector<1x16x64xf32>
    %595 = vector.shape_cast %594 : vector<1x16x64xf32> to vector<16x64xf32>
    %596 = arith.addf %593, %595 : vector<16x64xf32>
    %597 = vector.extract_strided_slice %493 {offsets = [7, 0, 0], sizes = [1, 16, 1], strides = [1, 1, 1]} : vector<16x16x1xf32> to vector<1x16x1xf32>
    %598 = vector.shape_cast %597 : vector<1x16x1xf32> to vector<16x1xf32>
    %599 = vector.broadcast %598 : vector<16x1xf32> to vector<16x64xf32>
    %600 = arith.mulf %596, %599 : vector<16x64xf32>
    %cst_143 = arith.constant dense<0.000000e+00> : vector<64xf32>
    %601 = vector.multi_reduction <add>, %600, %cst_143 [0] : vector<16x64xf32> to vector<64xf32>
    %602 = vector.shape_cast %601 : vector<64xf32> to vector<1x64xf32>
    %cst_144 = arith.constant 0.000000e+00 : f32
    %603 = vector.broadcast %cst_144 : f32 to vector<16x64xf32>
    %604 = vector.extract_strided_slice %486 {offsets = [8, 0, 0], sizes = [1, 16, 64], strides = [1, 1, 1]} : vector<16x16x64xf32> to vector<1x16x64xf32>
    %605 = vector.shape_cast %604 : vector<1x16x64xf32> to vector<16x64xf32>
    %606 = arith.mulf %605, %603 : vector<16x64xf32>
    %607 = vector.extract_strided_slice %492 {offsets = [8, 0, 0], sizes = [1, 16, 64], strides = [1, 1, 1]} : vector<16x16x64xf32> to vector<1x16x64xf32>
    %608 = vector.shape_cast %607 : vector<1x16x64xf32> to vector<16x64xf32>
    %609 = arith.addf %606, %608 : vector<16x64xf32>
    %610 = vector.extract_strided_slice %493 {offsets = [8, 0, 0], sizes = [1, 16, 1], strides = [1, 1, 1]} : vector<16x16x1xf32> to vector<1x16x1xf32>
    %611 = vector.shape_cast %610 : vector<1x16x1xf32> to vector<16x1xf32>
    %612 = vector.broadcast %611 : vector<16x1xf32> to vector<16x64xf32>
    %613 = arith.mulf %609, %612 : vector<16x64xf32>
    %cst_145 = arith.constant dense<0.000000e+00> : vector<64xf32>
    %614 = vector.multi_reduction <add>, %613, %cst_145 [0] : vector<16x64xf32> to vector<64xf32>
    %615 = vector.shape_cast %614 : vector<64xf32> to vector<1x64xf32>
    %616 = vector.extract_strided_slice %486 {offsets = [9, 0, 0], sizes = [1, 16, 64], strides = [1, 1, 1]} : vector<16x16x64xf32> to vector<1x16x64xf32>
    %617 = vector.shape_cast %616 : vector<1x16x64xf32> to vector<16x64xf32>
    %618 = arith.mulf %617, %609 : vector<16x64xf32>
    %619 = vector.extract_strided_slice %492 {offsets = [9, 0, 0], sizes = [1, 16, 64], strides = [1, 1, 1]} : vector<16x16x64xf32> to vector<1x16x64xf32>
    %620 = vector.shape_cast %619 : vector<1x16x64xf32> to vector<16x64xf32>
    %621 = arith.addf %618, %620 : vector<16x64xf32>
    %622 = vector.extract_strided_slice %493 {offsets = [9, 0, 0], sizes = [1, 16, 1], strides = [1, 1, 1]} : vector<16x16x1xf32> to vector<1x16x1xf32>
    %623 = vector.shape_cast %622 : vector<1x16x1xf32> to vector<16x1xf32>
    %624 = vector.broadcast %623 : vector<16x1xf32> to vector<16x64xf32>
    %625 = arith.mulf %621, %624 : vector<16x64xf32>
    %cst_146 = arith.constant dense<0.000000e+00> : vector<64xf32>
    %626 = vector.multi_reduction <add>, %625, %cst_146 [0] : vector<16x64xf32> to vector<64xf32>
    %627 = vector.shape_cast %626 : vector<64xf32> to vector<1x64xf32>
    %628 = vector.extract_strided_slice %486 {offsets = [10, 0, 0], sizes = [1, 16, 64], strides = [1, 1, 1]} : vector<16x16x64xf32> to vector<1x16x64xf32>
    %629 = vector.shape_cast %628 : vector<1x16x64xf32> to vector<16x64xf32>
    %630 = arith.mulf %629, %621 : vector<16x64xf32>
    %631 = vector.extract_strided_slice %492 {offsets = [10, 0, 0], sizes = [1, 16, 64], strides = [1, 1, 1]} : vector<16x16x64xf32> to vector<1x16x64xf32>
    %632 = vector.shape_cast %631 : vector<1x16x64xf32> to vector<16x64xf32>
    %633 = arith.addf %630, %632 : vector<16x64xf32>
    %634 = vector.extract_strided_slice %493 {offsets = [10, 0, 0], sizes = [1, 16, 1], strides = [1, 1, 1]} : vector<16x16x1xf32> to vector<1x16x1xf32>
    %635 = vector.shape_cast %634 : vector<1x16x1xf32> to vector<16x1xf32>
    %636 = vector.broadcast %635 : vector<16x1xf32> to vector<16x64xf32>
    %637 = arith.mulf %633, %636 : vector<16x64xf32>
    %cst_147 = arith.constant dense<0.000000e+00> : vector<64xf32>
    %638 = vector.multi_reduction <add>, %637, %cst_147 [0] : vector<16x64xf32> to vector<64xf32>
    %639 = vector.shape_cast %638 : vector<64xf32> to vector<1x64xf32>
    %640 = vector.extract_strided_slice %486 {offsets = [11, 0, 0], sizes = [1, 16, 64], strides = [1, 1, 1]} : vector<16x16x64xf32> to vector<1x16x64xf32>
    %641 = vector.shape_cast %640 : vector<1x16x64xf32> to vector<16x64xf32>
    %642 = arith.mulf %641, %633 : vector<16x64xf32>
    %643 = vector.extract_strided_slice %492 {offsets = [11, 0, 0], sizes = [1, 16, 64], strides = [1, 1, 1]} : vector<16x16x64xf32> to vector<1x16x64xf32>
    %644 = vector.shape_cast %643 : vector<1x16x64xf32> to vector<16x64xf32>
    %645 = arith.addf %642, %644 : vector<16x64xf32>
    %646 = vector.extract_strided_slice %493 {offsets = [11, 0, 0], sizes = [1, 16, 1], strides = [1, 1, 1]} : vector<16x16x1xf32> to vector<1x16x1xf32>
    %647 = vector.shape_cast %646 : vector<1x16x1xf32> to vector<16x1xf32>
    %648 = vector.broadcast %647 : vector<16x1xf32> to vector<16x64xf32>
    %649 = arith.mulf %645, %648 : vector<16x64xf32>
    %cst_148 = arith.constant dense<0.000000e+00> : vector<64xf32>
    %650 = vector.multi_reduction <add>, %649, %cst_148 [0] : vector<16x64xf32> to vector<64xf32>
    %651 = vector.shape_cast %650 : vector<64xf32> to vector<1x64xf32>
    %652 = vector.extract_strided_slice %486 {offsets = [12, 0, 0], sizes = [1, 16, 64], strides = [1, 1, 1]} : vector<16x16x64xf32> to vector<1x16x64xf32>
    %653 = vector.shape_cast %652 : vector<1x16x64xf32> to vector<16x64xf32>
    %654 = arith.mulf %653, %645 : vector<16x64xf32>
    %655 = vector.extract_strided_slice %492 {offsets = [12, 0, 0], sizes = [1, 16, 64], strides = [1, 1, 1]} : vector<16x16x64xf32> to vector<1x16x64xf32>
    %656 = vector.shape_cast %655 : vector<1x16x64xf32> to vector<16x64xf32>
    %657 = arith.addf %654, %656 : vector<16x64xf32>
    %658 = vector.extract_strided_slice %493 {offsets = [12, 0, 0], sizes = [1, 16, 1], strides = [1, 1, 1]} : vector<16x16x1xf32> to vector<1x16x1xf32>
    %659 = vector.shape_cast %658 : vector<1x16x1xf32> to vector<16x1xf32>
    %660 = vector.broadcast %659 : vector<16x1xf32> to vector<16x64xf32>
    %661 = arith.mulf %657, %660 : vector<16x64xf32>
    %cst_149 = arith.constant dense<0.000000e+00> : vector<64xf32>
    %662 = vector.multi_reduction <add>, %661, %cst_149 [0] : vector<16x64xf32> to vector<64xf32>
    %663 = vector.shape_cast %662 : vector<64xf32> to vector<1x64xf32>
    %664 = vector.extract_strided_slice %486 {offsets = [13, 0, 0], sizes = [1, 16, 64], strides = [1, 1, 1]} : vector<16x16x64xf32> to vector<1x16x64xf32>
    %665 = vector.shape_cast %664 : vector<1x16x64xf32> to vector<16x64xf32>
    %666 = arith.mulf %665, %657 : vector<16x64xf32>
    %667 = vector.extract_strided_slice %492 {offsets = [13, 0, 0], sizes = [1, 16, 64], strides = [1, 1, 1]} : vector<16x16x64xf32> to vector<1x16x64xf32>
    %668 = vector.shape_cast %667 : vector<1x16x64xf32> to vector<16x64xf32>
    %669 = arith.addf %666, %668 : vector<16x64xf32>
    %670 = vector.extract_strided_slice %493 {offsets = [13, 0, 0], sizes = [1, 16, 1], strides = [1, 1, 1]} : vector<16x16x1xf32> to vector<1x16x1xf32>
    %671 = vector.shape_cast %670 : vector<1x16x1xf32> to vector<16x1xf32>
    %672 = vector.broadcast %671 : vector<16x1xf32> to vector<16x64xf32>
    %673 = arith.mulf %669, %672 : vector<16x64xf32>
    %cst_150 = arith.constant dense<0.000000e+00> : vector<64xf32>
    %674 = vector.multi_reduction <add>, %673, %cst_150 [0] : vector<16x64xf32> to vector<64xf32>
    %675 = vector.shape_cast %674 : vector<64xf32> to vector<1x64xf32>
    %676 = vector.extract_strided_slice %486 {offsets = [14, 0, 0], sizes = [1, 16, 64], strides = [1, 1, 1]} : vector<16x16x64xf32> to vector<1x16x64xf32>
    %677 = vector.shape_cast %676 : vector<1x16x64xf32> to vector<16x64xf32>
    %678 = arith.mulf %677, %669 : vector<16x64xf32>
    %679 = vector.extract_strided_slice %492 {offsets = [14, 0, 0], sizes = [1, 16, 64], strides = [1, 1, 1]} : vector<16x16x64xf32> to vector<1x16x64xf32>
    %680 = vector.shape_cast %679 : vector<1x16x64xf32> to vector<16x64xf32>
    %681 = arith.addf %678, %680 : vector<16x64xf32>
    %682 = vector.extract_strided_slice %493 {offsets = [14, 0, 0], sizes = [1, 16, 1], strides = [1, 1, 1]} : vector<16x16x1xf32> to vector<1x16x1xf32>
    %683 = vector.shape_cast %682 : vector<1x16x1xf32> to vector<16x1xf32>
    %684 = vector.broadcast %683 : vector<16x1xf32> to vector<16x64xf32>
    %685 = arith.mulf %681, %684 : vector<16x64xf32>
    %cst_151 = arith.constant dense<0.000000e+00> : vector<64xf32>
    %686 = vector.multi_reduction <add>, %685, %cst_151 [0] : vector<16x64xf32> to vector<64xf32>
    %687 = vector.shape_cast %686 : vector<64xf32> to vector<1x64xf32>
    %688 = vector.extract_strided_slice %486 {offsets = [15, 0, 0], sizes = [1, 16, 64], strides = [1, 1, 1]} : vector<16x16x64xf32> to vector<1x16x64xf32>
    %689 = vector.shape_cast %688 : vector<1x16x64xf32> to vector<16x64xf32>
    %690 = arith.mulf %689, %681 : vector<16x64xf32>
    %691 = vector.extract_strided_slice %492 {offsets = [15, 0, 0], sizes = [1, 16, 64], strides = [1, 1, 1]} : vector<16x16x64xf32> to vector<1x16x64xf32>
    %692 = vector.shape_cast %691 : vector<1x16x64xf32> to vector<16x64xf32>
    %693 = arith.addf %690, %692 : vector<16x64xf32>
    %694 = vector.extract_strided_slice %493 {offsets = [15, 0, 0], sizes = [1, 16, 1], strides = [1, 1, 1]} : vector<16x16x1xf32> to vector<1x16x1xf32>
    %695 = vector.shape_cast %694 : vector<1x16x1xf32> to vector<16x1xf32>
    %696 = vector.broadcast %695 : vector<16x1xf32> to vector<16x64xf32>
    %697 = arith.mulf %693, %696 : vector<16x64xf32>
    %cst_152 = arith.constant dense<0.000000e+00> : vector<64xf32>
    %698 = vector.multi_reduction <add>, %697, %cst_152 [0] : vector<16x64xf32> to vector<64xf32>
    %699 = vector.shape_cast %698 : vector<64xf32> to vector<1x64xf32>
    %700 = tpu.concatenate %518, %530, %542, %554, %566, %578, %590, %602, %615, %627, %639, %651, %663, %675, %687, %699 in 0 : vector<1x64xf32>, vector<1x64xf32>, vector<1x64xf32>, vector<1x64xf32>, vector<1x64xf32>, vector<1x64xf32>, vector<1x64xf32>, vector<1x64xf32>, vector<1x64xf32>, vector<1x64xf32>, vector<1x64xf32>, vector<1x64xf32>, vector<1x64xf32>, vector<1x64xf32>, vector<1x64xf32>, vector<1x64xf32> -> vector<16x64xf32>
    %701 = arith.addf %700, %505 : vector<16x64xf32>
    %702 = arith.mulf %701, %501 : vector<16x64xf32>
    %c1_153 = arith.constant 1 : index
    %c0_154 = arith.constant 0 : index
    %c0_155 = arith.constant 0 : index
    %703 = vector.load %arg10[%c1_153, %c0_154, %c0_155] : memref<2x64x32xf32, #tpu.memory_space<vmem>>, vector<1x64x32xf32>
    %704 = vector.shape_cast %703 : vector<1x64x32xf32> to vector<64x32xf32>
    %cst_156 = arith.constant dense<0.000000e+00> : vector<16x32xf32>
    %705 = tpu.matmul %702, %704, %cst_156 {dimension_numbers = #tpu.dot_dimension_numbers<[1], [0], [0], [1], [0, 0, 1, 1], [], []>} : vector<16x64xf32>, vector<64x32xf32>, vector<16x32xf32> -> vector<16x32xf32>
    %706 = arith.addf %705, %370 : vector<16x32xf32>
    %c1_157 = arith.constant 1 : index
    %c0_158 = arith.constant 0 : index
    %c0_159 = arith.constant 0 : index
    %707 = vector.load %arg11[%c1_157, %c0_158, %c0_159] : memref<2x1x32xf32, #tpu.memory_space<vmem>>, vector<1x1x32xf32>
    %708 = vector.shape_cast %707 : vector<1x1x32xf32> to vector<1x32xf32>
    %709 = arith.mulf %706, %706 : vector<16x32xf32>
    %cst_160 = arith.constant dense<0.000000e+00> : vector<16xf32>
    %710 = vector.multi_reduction <add>, %709, %cst_160 [1] : vector<16x32xf32> to vector<16xf32>
    %711 = vector.shape_cast %710 : vector<16xf32> to vector<16x1xf32>
    %cst_161 = arith.constant 3.200000e+01 : f32
    %712 = vector.broadcast %cst_161 : f32 to vector<16x1xf32>
    %713 = arith.divf %711, %712 : vector<16x1xf32>
    %cst_162 = arith.constant 9.99999974E-6 : f32
    %714 = vector.broadcast %cst_162 : f32 to vector<16x1xf32>
    %715 = arith.addf %713, %714 : vector<16x1xf32>
    %716 = math.rsqrt %715 : vector<16x1xf32>
    %717 = vector.broadcast %716 : vector<16x1xf32> to vector<16x32xf32>
    %718 = arith.mulf %706, %717 : vector<16x32xf32>
    %719 = vector.broadcast %708 : vector<1x32xf32> to vector<16x32xf32>
    %720 = arith.mulf %718, %719 : vector<16x32xf32>
    %c1_163 = arith.constant 1 : index
    %c0_164 = arith.constant 0 : index
    %c0_165 = arith.constant 0 : index
    %721 = vector.load %arg12[%c1_163, %c0_164, %c0_165] : memref<2x32x64xf32, #tpu.memory_space<vmem>>, vector<1x32x64xf32>
    %722 = vector.shape_cast %721 : vector<1x32x64xf32> to vector<32x64xf32>
    %cst_166 = arith.constant dense<0.000000e+00> : vector<16x64xf32>
    %723 = tpu.matmul %720, %722, %cst_166 {dimension_numbers = #tpu.dot_dimension_numbers<[1], [0], [0], [1], [0, 0, 1, 1], [], []>} : vector<16x32xf32>, vector<32x64xf32>, vector<16x64xf32> -> vector<16x64xf32>
    %724 = vector.extract_strided_slice %723 {offsets = [0, 32], sizes = [16, 32], strides = [1, 1]} : vector<16x64xf32> to vector<16x32xf32>
    %725 = vector.extract_strided_slice %723 {offsets = [0, 0], sizes = [16, 32], strides = [1, 1]} : vector<16x64xf32> to vector<16x32xf32>
    %cst_167 = arith.constant 0.000000e+00 : f32
    %726 = vector.broadcast %cst_167 : f32 to vector<16x32xf32>
    %727 = arith.subf %726, %724 : vector<16x32xf32>
    %728 = math.exp %727 : vector<16x32xf32>
    %cst_168 = arith.constant 1.000000e+00 : f32
    %729 = vector.broadcast %cst_168 : f32 to vector<16x32xf32>
    %730 = arith.addf %729, %728 : vector<16x32xf32>
    %cst_169 = arith.constant 1.000000e+00 : f32
    %731 = vector.broadcast %cst_169 : f32 to vector<16x32xf32>
    %732 = arith.divf %731, %730 : vector<16x32xf32>
    %733 = arith.mulf %724, %732 : vector<16x32xf32>
    %734 = arith.mulf %725, %733 : vector<16x32xf32>
    %c1_170 = arith.constant 1 : index
    %c0_171 = arith.constant 0 : index
    %c0_172 = arith.constant 0 : index
    %735 = vector.load %arg13[%c1_170, %c0_171, %c0_172] : memref<2x32x32xf32, #tpu.memory_space<vmem>>, vector<1x32x32xf32>
    %736 = vector.shape_cast %735 : vector<1x32x32xf32> to vector<32x32xf32>
    %cst_173 = arith.constant dense<0.000000e+00> : vector<16x32xf32>
    %737 = tpu.matmul %734, %736, %cst_173 {dimension_numbers = #tpu.dot_dimension_numbers<[1], [0], [0], [1], [0, 0, 1, 1], [], []>} : vector<16x32xf32>, vector<32x32xf32>, vector<16x32xf32> -> vector<16x32xf32>
    %738 = arith.addf %737, %706 : vector<16x32xf32>
    %c0_174 = arith.constant 0 : index
    %c0_175 = arith.constant 0 : index
    %739 = vector.load %arg14[%c0_174, %c0_175] : memref<1x32xf32, #tpu.memory_space<vmem>>, vector<1x32xf32>
    %740 = arith.mulf %738, %738 : vector<16x32xf32>
    %cst_176 = arith.constant dense<0.000000e+00> : vector<16xf32>
    %741 = vector.multi_reduction <add>, %740, %cst_176 [1] : vector<16x32xf32> to vector<16xf32>
    %742 = vector.shape_cast %741 : vector<16xf32> to vector<16x1xf32>
    %cst_177 = arith.constant 3.200000e+01 : f32
    %743 = vector.broadcast %cst_177 : f32 to vector<16x1xf32>
    %744 = arith.divf %742, %743 : vector<16x1xf32>
    %cst_178 = arith.constant 9.99999974E-6 : f32
    %745 = vector.broadcast %cst_178 : f32 to vector<16x1xf32>
    %746 = arith.addf %744, %745 : vector<16x1xf32>
    %747 = math.rsqrt %746 : vector<16x1xf32>
    %748 = vector.broadcast %747 : vector<16x1xf32> to vector<16x32xf32>
    %749 = arith.mulf %738, %748 : vector<16x32xf32>
    %750 = vector.broadcast %739 : vector<1x32xf32> to vector<16x32xf32>
    %751 = arith.mulf %749, %750 : vector<16x32xf32>
    %c0_179 = arith.constant 0 : index
    %c0_180 = arith.constant 0 : index
    %752 = vector.load %arg15[%c0_179, %c0_180] : memref<32x128xf32, #tpu.memory_space<vmem>>, vector<32x128xf32>
    %cst_181 = arith.constant dense<0.000000e+00> : vector<16x128xf32>
    %753 = tpu.matmul %751, %752, %cst_181 {dimension_numbers = #tpu.dot_dimension_numbers<[1], [0], [0], [1], [0, 0, 1, 1], [], []>} : vector<16x32xf32>, vector<32x128xf32>, vector<16x128xf32> -> vector<16x128xf32>
    %c0_182 = arith.constant 0 : index
    %c0_183 = arith.constant 0 : index
    %754 = vector.load %arg16[%c0_182, %c0_183] : memref<16x128xf32, #tpu.memory_space<vmem>>, vector<16x128xf32>
    tpu.vector_store %arg16[%c0_182, %c0_183], %753 {strides = array<i32>} : memref<16x128xf32, #tpu.memory_space<vmem>>, vector<16x128xf32>,
    return
  }
}

</mosaic_0001>

<bundles_post_ra>
// kernel: mamba_lm_forward.1
= control target key start
LH: loop header
LB: loop body
LE: loop exit
PB: predicated region body
PF: predicated region fallthrough
CT: control target
= control target key end

     0   :  { %vm4800_vm0 = vcmask 261120   ;;  %v3358_v6 = vmov 32.0   ;;  %vm144_vm8 = vcmask 1040384   ;;  %vm151_vm9 = vcmask 1041408   ;;  %s3359_s21 = smov 64   ;;  %s3360_s29 = smov 96   ;;  %s4782_s0 = inlined_call_operand.vmem [shape: f32[16,32], index: 0, kind: input, shape index: {}]   ;;  %s4783_s1 = inlined_call_operand.vmem [shape: f32[2,1,32], index: 1, kind: input, shape index: {}]   ;;  %s4784_s2 = inlined_call_operand.vmem [shape: f32[2,32,128], index: 2, kind: input, shape index: {}]   ;;  %s4785_s4 = inlined_call_operand.vmem [shape: f32[2,1,64], index: 4, kind: input, shape index: {}]   ;;  %s4786_s9 = inlined_call_operand.vmem [shape: f32[2,1,64], index: 9, kind: input, shape index: {}]   ;;  %s4787_s5 = inlined_call_operand.vmem [shape: f32[2,64,34], index: 5, kind: input, shape index: {}]   ;;  %s4788_s3 = inlined_call_operand.vmem [shape: f32[2,4,64], index: 3, kind: input, shape index: {}]   ;;  %s4789_s6 = inlined_call_operand.vmem [shape: f32[2,2,64], index: 6, kind: input, shape index: {}]   ;;  %s4790_s7 = inlined_call_operand.vmem [shape: f32[2,1,64], index: 7, kind: input, shape index: {}]   ;;  %s4791_s8 = inlined_call_operand.vmem [shape: f32[2,16,64], index: 8, kind: input, shape index: {}]   ;;  %s4792_s10 = inlined_call_operand.vmem [shape: f32[2,64,32], index: 10, kind: input, shape index: {}]   ;;  %s4793_s11 = inlined_call_operand.vmem [shape: f32[2,1,32], index: 11, kind: input, shape index: {}]   ;;  %s4794_s12 = inlined_call_operand.vmem [shape: f32[2,32,64], index: 12, kind: input, shape index: {}]   ;;  %s4795_s13 = inlined_call_operand.vmem [shape: f32[2,32,32], index: 13, kind: input, shape index: {}]   ;;  %s4796_s14 = inlined_call_operand.vmem [shape: f32[1,32], index: 14, kind: input, shape index: {}]   ;;  %s4797_s15 = inlined_call_operand.vmem [shape: f32[32,128], index: 15, kind: input, shape index: {}]   ;;  %s4798_s16 = inlined_call_operand.vmem [shape: f32[16,128], index: 16, kind: output, shape index: {}]  }
   0x1   :  { %4801 = sst [smem:[#allocation2_spill]] %s4782_s0  ;;  %3134 = vrcp.f32 %v3358_v6  ;;  %v108_v10 = vld [vmem:[%s4784_s2 + $0x18] sm:$0xff]  ;;  %v107_v11 = vld [vmem:[%s4784_s2 + $0x10] sm:$0xff]  ;;  %v106_v13 = vld [vmem:[%s4784_s2 + $0x8] sm:$0xff]  ;;  %vm158_vm10 = vcmask 1042432   ;;  %vm234_vm15 = vcmask 523264  }
   0x2   :  { %s4802_s23 = sld [smem:[#allocation2_spill]]  ;;  %127 = vmatpush.msra.mxu0 %v108_v10  ;;  %v105_v14 = vld [vmem:[%s4784_s2] sm:$0xff]  ;;  %v233_v42 = vld [vmem:[%s4787_s5 + $0x38] sm:$0xff]  ;;  %v232_v43 = vld [vmem:[%s4787_s5 + $0x30] sm:$0xff] }
   0x3   :  { %v3123_v31 = vld [vmem:[%s4783_s1] ss:$0 sm:$0xff]  ;;  %249 = vmatpush.msra.mxu1 %v233_v42  ;;  %v231_v44 = vld [vmem:[%s4787_s5 + $0x28] sm:$0xff]  ;;  %v229_v47 = vld [vmem:[%s4787_s5 + $0x18] sm:$0xff] }
   0x4   :  { %128 = vmatpush.msra.mxu0 %v107_v11  ;;  %v230_v45 = vld [vmem:[%s4787_s5 + $0x20] sm:$0xff]  ;;  %v228_v48 = vld [vmem:[%s4787_s5 + $0x10] sm:$0xff]  ;;  %v227_v55 = vld [vmem:[%s4787_s5 + $0x8] sm:$0xff] }
   0x5   :  { %250 = vmatpush.msra.mxu1 %v232_v43  ;;  %v138_v46 = vld [vmem:[%s4788_s3] sm:$0xf] }
   0x6   :  { %129 = vmatpush.msra.mxu0 %v106_v13  ;;  %v139_v50 = vperm.slane %v138_v46, 3  ;;  %v146_v51 = vperm.slane %v138_v46, 2  ;;  %v153_v56 = vperm.slane %v138_v46, 1  ;;  %v226_v58 = vld [vmem:[%s4787_s5] sm:$0xff]  ;;  %v160_v62 = vperm.slane %v138_v46, 0 }
   0x7   :  { %v3135_v7 = vpop.eup %3134  ;;  %251 = vmatpush.msra.mxu1 %v231_v44 }
   0x8   :  { %v53_v0 = vld [vmem:[%s4802_s23] sm:$0xff]  ;;  %v54_v2 = vld [vmem:[%s4802_s23 + $0x8] sm:$0xff]  ;;  %v68_v8 = vmul.f32 32.0, %v3135_v7  ;;  %130 = vmatpush.msra.mxu0 %v105_v14  ;;  %vm72_vm1 = vweird.f32 %v3135_v7 }
   0x9   :  { %v58_v1 = vmul.f32 %v53_v0, %v53_v0  ;;  %v59_v4 = vmul.f32 %v54_v2, %v54_v2  ;;  %252 = vmatpush.msra.mxu1 %v230_v45 }
   0xa   :  { %v69_v9 = vsub.f32 1.0, %v68_v8 }
   0xb   :  { %v61_v3 = vsel %vm4800_vm0, %v58_v1, 0.0  ;;  %v64_v5 = vsel %vm4800_vm0, %v59_v4, 0.0  ;;  %253 = vmatpush.msra.mxu1 %v229_v47 }
   0xc   :  { %62 = vadd.xlane.f32.xlu0 %v61_v3  ;;  %v70_v12 = vmul.f32 %v3135_v7, %v69_v9 }
   0xd   :  { %254 = vmatpush.msra.mxu1 %v228_v48 }
   0xe   :  { %v71_v15 = vadd.f32 %v3135_v7, %v70_v12 }
   0xf   :  { %255 = vmatpush.msra.mxu1 %v227_v55 }
  0x10   :  { %v3466_v16 = vsel %vm72_vm1, %v3135_v7, %v71_v15 }
  0x11   :  { %256 = vmatpush.msra.mxu1 %v226_v58 }
  0x14   :  { %65 = vadd.xlane.f32.xlu0 %v64_v5  ;;  %v3125_v5 = vld [vmem:[%s4785_s4] ss:$0 sm:$0xff] }
  0x7f   :  { %v63_v17 = vpop.xlane.xlu0 %62 }
  0x80   :  { %v74_v18 = vmul.f32 %v3466_v16, %v63_v17 }
  0x82   :  { %v76_v19 = vadd.f32 1e-05, %v74_v18 }
  0x84   :  { %3136 = vrsqrt.f32 %v76_v19  ;;  %vm84_vm3 = vweird.f32 %v76_v19 }
  0x87   :  { %v66_v20 = vpop.xlane.xlu0 %65 }
  0x88   :  { %v75_v21 = vmul.f32 %v3466_v16, %v66_v20 }
  0x8a   :  { %v3137_v22 = vpop.eup %3136  ;;  %v77_v23 = vadd.f32 1e-05, %v75_v21 }
  0x8b   :  { %v79_v24 = vmul.f32 %v3137_v22, %v76_v19  ;;  %vm85_vm2 = vweird.f32 %v3137_v22 }
  0x8c   :  { %3138 = vrsqrt.f32 %v77_v23  ;;  %vm86_vm4 = vmor %vm84_vm3, %vm85_vm2  ;;  %vm94_vm5 = vweird.f32 %v77_v23 }
  0x8d   :  { %v80_v25 = vmul.f32 %v3137_v22, %v79_v24 }
  0x8f   :  { %v81_v26 = vmul.f32 0.5, %v80_v25 }
  0x91   :  { %v82_v27 = vsub.f32 1.5, %v81_v26  ;;  %v503_v26 = vlaneseq }
  0x92   :  { %v3139_v28 = vpop.eup %3138 }
  0x93   :  { %v83_v29 = vmul.f32 %v3137_v22, %v82_v27  ;;  %v89_v30 = vmul.f32 %v3139_v28, %v77_v23  ;;  %vm95_vm6 = vweird.f32 %v3139_v28 }
  0x94   :  { %vm96_vm7 = vmor %vm94_vm5, %vm95_vm6  ;;  %vm269_vm5 = vcmask 15360  }
  0x95   :  { %v90_v32 = vmul.f32 %v3139_v28, %v89_v30  ;;  %v87_v33 = vsel %vm86_vm4, %v3137_v22, %v83_v29  ;;  %v3523_v29 = vshrl.u32 %v503_v26, 7 }
  0x96   :  { %v98_v34 = vmul.f32 %v87_v33, %v53_v0 }
  0x97   :  { %v91_v35 = vmul.f32 0.5, %v90_v32 }
  0x98   :  { %v103_v36 = vmul.f32 %v3123_v31, %v98_v34 }
  0x99   :  { %v92_v37 = vsub.f32 1.5, %v91_v35 }
  0x9a   :  { %2968 = vmatmul.msk.f32.vlgmr.msra.gmra.mxu0 %vm4800_vm0, %v103_v36 }
  0x9b   :  { %v93_v38 = vmul.f32 %v3139_v28, %v92_v37 }
  0x9d   :  { %v97_v39 = vsel %vm96_vm7, %v3139_v28, %v93_v38 }
  0x9e   :  { %v99_v40 = vmul.f32 %v97_v39, %v54_v2 }
  0xa0   :  { %v104_v41 = vmul.f32 %v3123_v31, %v99_v40  ;;  %v3526_v31 = vadd.s32 2, %v3523_v29 }
  0xa2   :  { %2969 = vmatmul.msk.f32.gmra.mxu0 %vm4800_vm0, %v104_v41  ;;  %3041 = vset.pattern.permute.xlu0 %v3526_v31 }
  0xa3   :  { %3039 = vset.pattern.permute.xlu2 %v3526_v31  ;;  %3037 = vset.pattern.permute.xlu1 %v3526_v31 }
 0x117   :  { %v3496_v49 = vpop.f32.mrf.mxu0 }
 0x118   :  { %v142_v52 = vrot.slane %v3496_v49, 7  ;;  %v149_v53 = vrot.slane %v3496_v49, 6  ;;  %v156_v54 = vrot.slane %v3496_v49, 5  ;;  %v140_v60 = vmul.f32 %v139_v50, %v3496_v49 }
 0x11a   :  { %v145_v57 = vsel %vm144_vm8, 0.0, %v142_v52  ;;  %v152_v59 = vsel %vm151_vm9, 0.0, %v149_v53  ;;  %v159_v63 = vsel %vm158_vm10, 0.0, %v156_v54 }
 0x11b   :  { %v147_v61 = vmul.f32 %v146_v51, %v145_v57  ;;  %v154_v1 = vmul.f32 %v153_v56, %v152_v59  ;;  %v161_v4 = vmul.f32 %v160_v62, %v159_v63  ;;  %v264_v57 = vld [vmem:[%s4789_s6] sm:$0x3] }
 0x11c   :  { %2972 = vmatpush.msk.msrb.mxu0 %vm151_vm9, %v264_v57  ;;  %3033 = vmatpush.msk.msra.mxu2 %vm151_vm9, %v264_v57 }
 0x11d   :  { %v148_v0 = vadd.f32 %v147_v61, %v140_v60 }
 0x11f   :  { %v3511_v2 = vpop.f32.mrf.mxu0  ;;  %v155_v3 = vadd.f32 %v154_v1, %v148_v0  ;;  %v3558_v1 = vadd.s32 26, %v3523_v29 }
 0x120   :  { %v165_v6 = vrot.slane %v3511_v2, 7  ;;  %v170_v7 = vrot.slane %v3511_v2, 6  ;;  %v175_v8 = vrot.slane %v3511_v2, 5  ;;  %v163_v9 = vmul.f32 %v139_v50, %v3511_v2 }
 0x121   :  { %v162_v10 = vadd.f32 %v161_v4, %v155_v3 }
 0x122   :  { %v167_v11 = vsel %vm144_vm8, 0.0, %v165_v6  ;;  %v172_v12 = vsel %vm151_vm9, 0.0, %v170_v7  ;;  %v177_v13 = vsel %vm158_vm10, 0.0, %v175_v8  ;;  %v3570_v7 = vadd.s32 18, %v3523_v29 }
 0x123   :  { %v184_v14 = vadd.f32 %v3125_v5, %v162_v10  ;;  %v168_v15 = vmul.f32 %v167_v11, %v146_v51  ;;  %v173_v17 = vmul.f32 %v172_v12, %v153_v56  ;;  %v178_v20 = vmul.f32 %v177_v13, %v160_v62  ;;  %v3596_v12 = vld [vmem:[%s4790_s7] ss:$0 sm:$0xff] }
 0x124   :  { %v3546_v62 = vadd.s32 10, %v3523_v29 }
 0x125   :  { %v186_v18 = vsub.f32 0.0, %v184_v14  ;;  %v169_v19 = vadd.f32 %v168_v15, %v163_v9  ;;  %v967_v9 = vsub.f32 0.0, %v3511_v2 }
 0x127   :  { %v188_v21 = vmul.f32 1.442695, %v186_v18  ;;  %v174_v22 = vadd.f32 %v173_v17, %v169_v19  ;;  %v970_v10 = vmul.f32 1.442695, %v967_v9 }
 0x129   :  { %3140 = vpow2.f32 %v188_v21  ;;  %v179_v23 = vadd.f32 %v178_v20, %v174_v22 }
 0x12b   :  { %v185_v24 = vadd.f32 %v3125_v5, %v179_v23  ;;  %v302_v23 = vld [vmem:[%s4791_s8] sm:$0xff] }
 0x12d   :  { %v187_v25 = vsub.f32 0.0, %v185_v24 }
 0x12f   :  { %v3141_v27 = vpop.eup %3140  ;;  %v190_v28 = vmul.f32 1.442695, %v187_v25 }
 0x130   :  { %v192_v30 = vadd.f32 1.0, %v3141_v27  ;;  %v304_v27 = vmul.f32 1.442695, %v302_v23 }
 0x131   :  { %3142 = vpow2.f32 %v190_v28 }
 0x132   :  { %3144 = vrcp.f32 %v192_v30  ;;  %v205_v37 = vand.u32 2147483648, %v192_v30  ;;  %v203_v39 = vand.u32 2147483647, %v192_v30  ;;  %vm199_vm12 = vweird.f32 %v192_v30 }
 0x134   :  { %v206_v42 = vor.u32 1.1754944e-38, %v205_v37  ;;  %vm204_vm14 = vcmp.eq.f32.partialorder %v203_v39, 8.507059e+37 }
 0x137   :  { %v3143_v32 = vpop.eup %3142 }
 0x138   :  { %v3145_v33 = vpop.eup %3144  ;;  %v193_v34 = vadd.f32 1.0, %v3143_v32 }
 0x139   :  { %v195_v35 = vmul.f32 %v3145_v33, %v192_v30  ;;  %vm200_vm11 = vweird.f32 %v3145_v33 }
 0x13a   :  { %3146 = vrcp.f32 %v193_v34  ;;  %vm201_vm13 = vmor %vm199_vm12, %vm200_vm11  ;;  %vm214_vm1 = vweird.f32 %v193_v34  ;;  %v220_v46 = vand.u32 2147483648, %v193_v34  ;;  %v218_v50 = vand.u32 2147483647, %v193_v34 }
 0x13b   :  { %v196_v36 = vsub.f32 1.0, %v195_v35  ;;  %3148 = vpow2.f32 %v970_v10 }
 0x13c   :  { %v221_v52 = vor.u32 1.1754944e-38, %v220_v46  ;;  %vm219_vm4 = vcmp.eq.f32.partialorder %v218_v50, 8.507059e+37 }
 0x13d   :  { %v197_v38 = vmul.f32 %v3145_v33, %v196_v36 }
 0x13f   :  { %v198_v40 = vadd.f32 %v3145_v33, %v197_v38 }
 0x140   :  { %v3147_v41 = vpop.eup %3146 }
 0x141   :  { %v202_v43 = vsel %vm201_vm13, %v3145_v33, %v198_v40  ;;  %v210_v44 = vmul.f32 %v3147_v41, %v193_v34  ;;  %vm215_vm2 = vweird.f32 %v3147_v41  ;;  %v3149_v11 = vpop.eup %3148  ;;  %v303_v34 = vld [vmem:[%s4791_s8 + $0x8] sm:$0xff] }
 0x142   :  { %v207_v45 = vsel %vm204_vm14, %v206_v42, %v202_v43  ;;  %vm216_vm3 = vmor %vm214_vm1, %vm215_vm2  ;;  %v973_v13 = vadd.f32 1.0, %v3149_v11  ;;  %v306_v38 = vmul.f32 1.442695, %v303_v34  ;;  %vm1255_vm1 = vcmask 1043456  }
 0x143   :  { %v3531_v47 = vmul.f32 %v207_v45, %v184_v14  ;;  %v211_v48 = vsub.f32 1.0, %v210_v44  ;;  %vm1257_vm2 = vcmask 1044480  }
 0x144   :  { %3150 = vrcp.f32 %v973_v13  ;;  %vm994_vm6 = vweird.f32 %v973_v13  ;;  %v1000_v39 = vand.u32 2147483648, %v973_v13  ;;  %v998_v43 = vand.u32 2147483647, %v973_v13 }
 0x145   :  { %2970 = vmatmul.msk.f32.vlgmr.msra.gmra.mxu1 %vm234_vm15, %v3531_v47  ;;  %v212_v51 = vmul.f32 %v3147_v41, %v211_v48 }
 0x146   :  { %vm999_vm13 = vcmp.eq.f32.partialorder %v998_v43, 8.507059e+37 }
 0x147   :  { %v213_v53 = vadd.f32 %v3147_v41, %v212_v51 }
 0x149   :  { %v217_v54 = vsel %vm216_vm3, %v3147_v41, %v213_v53  ;;  %v1001_v53 = vor.u32 1.1754944e-38, %v1000_v39  ;;  %vm1259_vm3 = vcmask 1045504  }
 0x14a   :  { %v222_v55 = vsel %vm219_vm4, %v221_v52, %v217_v54  ;;  %v3151_v20 = vpop.eup %3150  ;;  %vm1261_vm4 = vcmask 1046528  }
 0x14b   :  { %v3535_v56 = vmul.f32 %v222_v55, %v185_v24  ;;  %v990_v24 = vmul.f32 %v3151_v20, %v973_v13  ;;  %vm995_vm7 = vweird.f32 %v3151_v20 }
 0x14c   :  { %vm996_vm12 = vmor %vm994_vm6, %vm995_vm7 }
 0x14d   :  { %2971 = vmatmul.msk.f32.gmra.mxu1 %vm234_vm15, %v3535_v56  ;;  %v991_v29 = vsub.f32 1.0, %v990_v24 }
 0x14f   :  { %v992_v35 = vmul.f32 %v3151_v20, %v991_v29 }
 0x151   :  { %v993_v42 = vadd.f32 %v3151_v20, %v992_v35 }
 0x153   :  { %v997_v55 = vsel %vm996_vm12, %v3151_v20, %v993_v42 }
 0x1c2   :  { %v258_v58 = vpop.f32.mrf.mxu1 }
 0x1c3   :  { %2973 = vmatmul.msk.f32.vlgmr.msrb.gmra.mxu0 %vm269_vm5, %v258_v58  ;;  %v528_v59 = vperm.slane %v258_v58, 2  ;;  %v515_v60 = vperm.slane %v258_v58, 1  ;;  %v502_v61 = vperm.slane %v258_v58, 0  ;;  %v3552_v0 = vperm.slane %v258_v58, 6 }
 0x1c4   :  { %v541_v3 = vperm.slane %v258_v58, 3  ;;  %v554_v4 = vperm.slane %v258_v58, 4  ;;  %v3563_v5 = vperm.slane %v258_v58, 7  ;;  %v567_v6 = vperm.slane %v258_v58, 5 }
 0x1c5   :  { %533 = vperm.xlu0 %3041, %v528_v59   ;;  %520 = vperm.xlu2 %3039, %v515_v60   ;;  %v1002_v58 = vsel %vm999_vm13, %v1001_v53, %v997_v55 }
 0x1c6   :  { %507 = vperm.xlu1 %3037, %v502_v61  }
 0x1ca   :  { %v3548_v63 = vpop.f32.mrf.mxu1 }
 0x1cb   :  { %2974 = vmatmul.msk.f32.vlgmr.msra.gmra.mxu2 %vm269_vm5, %v3548_v63  ;;  %v3583_v8 = vperm.slane %v3548_v63, 2  ;;  %v3604_v22 = vperm.slane %v3548_v63, 3  ;;  %v3623_v51 = vperm.slane %v3548_v63, 6  ;;  %v3670_v35 = vperm.slane %v3548_v63, 1 }
 0x1cd   :  { %585 = vperm.xlu0 %3041, %v3552_v0   ;;  %3040 = vset.pattern.permute.xlu2 %v3546_v62 }
 0x1ce   :  { %3038 = vset.pattern.permute.xlu1 %v3546_v62 }
 0x1d5   :  { %3047 = vset.pattern.permute.xlu0 %v3558_v1  ;;  %526 = vperm.xlu2 %3040, %v515_v60  }
 0x1d6   :  { %513 = vperm.xlu1 %3038, %v502_v61  }
 0x1dd   :  { %3042 = vset.pattern.permute.xlu2 %v3526_v31  ;;  %784 = vperm.xlu0 %3047, %v502_v61  }
 0x1de   :  { %539 = vperm.xlu1 %3038, %v528_v59  }
 0x1e5   :  { %546 = vperm.xlu2 %3042, %v541_v3   ;;  %3050 = vset.pattern.permute.xlu0 %v3526_v31 }
 0x1e6   :  { %552 = vperm.xlu1 %3038, %v541_v3  }
 0x1ed   :  { %559 = vperm.xlu2 %3042, %v554_v4   ;;  %598 = vperm.xlu0 %3050, %v3563_v5  }
 0x1ee   :  { %565 = vperm.xlu1 %3038, %v554_v4  }
 0x1f5   :  { %3044 = vset.pattern.permute.xlu2 %v3546_v62  ;;  %3053 = vset.pattern.permute.xlu0 %v3558_v1 }
 0x1f6   :  { %3043 = vset.pattern.permute.xlu1 %v3526_v31 }
 0x1fd   :  { %578 = vperm.xlu2 %3044, %v567_v6   ;;  %820 = vperm.xlu0 %3053, %v541_v3  }
 0x1fe   :  { %572 = vperm.xlu1 %3043, %v567_v6  }
 0x205   :  { %3046 = vset.pattern.permute.xlu2 %v3570_v7  ;;  %3056 = vset.pattern.permute.xlu0 %v3570_v7 }
 0x206   :  { %3045 = vset.pattern.permute.xlu1 %v3546_v62 }
 0x20d   :  { %850 = vperm.xlu0 %3056, %v3552_v0   ;;  %778 = vperm.xlu2 %3046, %v502_v61  }
 0x20e   :  { %591 = vperm.xlu1 %3045, %v3552_v0  }
 0x215   :  { %3059 = vset.pattern.permute.xlu0 %v3558_v1  ;;  %3049 = vset.pattern.permute.xlu2 %v3558_v1 }
 0x216   :  { %3048 = vset.pattern.permute.xlu1 %v3570_v7 }
 0x21d   :  { %868 = vperm.xlu0 %3059, %v3563_v5   ;;  %796 = vperm.xlu2 %3049, %v515_v60  }
 0x21e   :  { %790 = vperm.xlu1 %3048, %v515_v60  }
 0x21f   :  { %v3601_v21 = vpop.permute.xlu2 %520 }
 0x225   :  { %3062 = vset.pattern.permute.xlu0 %v3546_v62  ;;  %808 = vperm.xlu2 %3049, %v528_v59  }
 0x226   :  { %802 = vperm.xlu1 %3048, %v528_v59  }
 0x22d   :  { %3052 = vset.pattern.permute.xlu2 %v3570_v7  ;;  %643 = vperm.xlu0 %3062, %v3583_v8  }
 0x22e   :  { %3051 = vset.pattern.permute.xlu1 %v3546_v62 }
 0x22f   :  { %v3612_v32 = vpop.permute.xlu2 %526 }
 0x235   :  { %814 = vperm.xlu2 %3052, %v541_v3   ;;  %3069 = vset.pattern.permute.xlu0 %v3570_v7  ;;  %v1005_v3 = vmul.f32 %v1002_v58, %v3511_v2 }
 0x236   :  { %604 = vperm.xlu1 %3051, %v3563_v5  }
 0x237   :  { %v3649_v13 = vpop.permute.xlu0 %533 }
 0x238   :  { %v3610_v30 = vpop.permute.xlu1 %507 }
 0x23d   :  { %3055 = vset.pattern.permute.xlu2 %v3558_v1  ;;  %898 = vperm.xlu0 %3069, %v3583_v8  }
 0x23e   :  { %3054 = vset.pattern.permute.xlu1 %v3570_v7 }
 0x23f   :  { %v3620_v48 = vpop.permute.xlu2 %546 }
 0x240   :  { %v296_v14 = vpop.f32.mrf.mxu0 }
 0x241   :  { %v297_v15 = vadd.f32 %v3596_v12, %v296_v14 }
 0x243   :  { %v312_v17 = vand.u32 2147483647, %v297_v15  ;;  %v310_v45 = vmax.f32 %v297_v15, 0.0 }
 0x245   :  { %v314_v18 = vsub.f32 0.0, %v312_v17  ;;  %832 = vperm.xlu2 %3055, %v554_v4   ;;  %3074 = vset.pattern.permute.xlu0 %v3558_v1 }
 0x246   :  { %826 = vperm.xlu1 %3054, %v554_v4  }
 0x247   :  { %v316_v19 = vmul.f32 1.442695, %v314_v18  ;;  %v3653_v18 = vperm.slane %v3548_v63, 0 }
 0x248   :  { %v514_v46 = vpop.permute.xlu1 %513 }
 0x249   :  { %3152 = vpow2.f32 %v316_v19 }
 0x24d   :  { %844 = vperm.xlu2 %3055, %v567_v6   ;;  %916 = vperm.xlu0 %3074, %v3604_v22  }
 0x24e   :  { %838 = vperm.xlu1 %3054, %v567_v6   ;;  %v3638_v6 = vpop.permute.xlu2 %559 }
 0x24f   :  { %v3153_v25 = vpop.eup %3152 }
 0x250   :  { %v320_v26 = vadd.f32 1.0, %v3153_v25  ;;  %v323_v28 = vmul.f32 -0.5, %v3153_v25  ;;  %v326_v36 = vand.u32 2147483647, %v3153_v25  ;;  %v3636_v4 = vpop.permute.xlu1 %539 }
 0x252   :  { %3154 = vlog2.f32 %v320_v26  ;;  %v324_v33 = vadd.f32 1.0, %v323_v28  ;;  %vm327_vm11 = vcmp.lt.f32.partialorder %v326_v36, 0.0004427343 }
 0x253   :  { %3156 = vpow2.f32 %v304_v27 }
 0x254   :  { %v325_v41 = vmul.f32 %v3153_v25, %v324_v33  ;;  %3158 = vpow2.f32 %v306_v38 }
 0x255   :  { %3058 = vset.pattern.permute.xlu2 %v3570_v7  ;;  %3077 = vset.pattern.permute.xlu0 %v3570_v7 }
 0x256   :  { %3057 = vset.pattern.permute.xlu1 %v3558_v1 }
 0x257   :  { %v3659_v23 = vpop.permute.xlu2 %578 }
 0x258   :  { %v3155_v37 = vpop.eup %3154  ;;  %v3662_v24 = vpop.permute.xlu1 %552 }
 0x259   :  { %v322_v40 = vmul.f32 0.6931472, %v3155_v37  ;;  %v3157_v44 = vpop.eup %3156 }
 0x25a   :  { %v3627_v54 = vsub.f32 0.0, %v3157_v44  ;;  %v3159_v61 = vpop.eup %3158  ;;  %v3674_v44 = vpop.permute.xlu0 %585 }
 0x25b   :  { %v328_v50 = vsel %vm327_vm11, %v325_v41, %v322_v40  ;;  %v3640_v10 = vsub.f32 0.0, %v3159_v61 }
 0x25c   :  { %v3625_v52 = vadd.f32 %v328_v50, %v310_v45 }
 0x25d   :  { %862 = vperm.xlu2 %3058, %v3563_v5   ;;  %946 = vperm.xlu0 %3077, %v3623_v51  }
 0x25e   :  { %856 = vperm.xlu1 %3057, %v3552_v0   ;;  %v356_v57 = vperm.slane %v3625_v52, 0  ;;  %v342_v59 = vrot.slane %v3625_v52, 1  ;;  %v343_v0 = vrot.slane %v3625_v52, 2  ;;  %v3657_v19 = vmul.f32 %v3625_v52, %v3531_v47 }
 0x25f   :  { %v344_v26 = vrot.slane %v3625_v52, 3 }
 0x260   :  { %v388_v60 = vmul.f32 %v356_v57, %v3627_v54  ;;  %v357_v5 = vperm.slane %v342_v59, 0  ;;  %v389_v2 = vmul.f32 %v356_v57, %v3640_v10  ;;  %v358_v14 = vperm.slane %v343_v0, 0 }
 0x261   :  { %v488_v29 = vrot.slane %v3657_v19, 1  ;;  %v710_v33 = vperm.slane %v3657_v19, 0  ;;  %v359_v37 = vperm.slane %v344_v26, 0  ;;  %v489_v59 = vrot.slane %v3657_v19, 2 }
 0x262   :  { %v420_v9 = vmul.f32 1.442695, %v388_v60  ;;  %v391_v11 = vmul.f32 %v357_v5, %v3640_v10  ;;  %v390_v15 = vmul.f32 %v357_v5, %v3627_v54  ;;  %v422_v17 = vmul.f32 1.442695, %v389_v2  ;;  %v3681_v60 = vpop.permute.xlu1 %565 }
 0x263   :  { %v393_v28 = vmul.f32 %v358_v14, %v3640_v10  ;;  %v392_v38 = vmul.f32 %v358_v14, %v3627_v54  ;;  %v711_v40 = vperm.slane %v488_v29, 0  ;;  %v742_v41 = vmul.f32 %v710_v33, %v3610_v30  ;;  %v299_v14 = vpop.f32.mrf.mxu2 }
 0x264   :  { %3160 = vpow2.f32 %v420_v9  ;;  %v426_v20 = vmul.f32 1.442695, %v391_v11  ;;  %v424_v27 = vmul.f32 1.442695, %v390_v15  ;;  %v743_v42 = vmul.f32 %v710_v33, %v514_v46 }
 0x265   :  { %3060 = vset.pattern.permute.xlu2 %v3526_v31  ;;  %1276 = vrot.lane.b32.xlu0 %v1005_v3, %s3359_s21  ;;  %3162 = vpow2.f32 %v422_v17  ;;  %v430_v39 = vmul.f32 1.442695, %v393_v28  ;;  %v428_v57 = vmul.f32 1.442695, %v392_v38  ;;  %v395_v58 = vmul.f32 %v359_v37, %v3640_v10  ;;  %v785_v17 = vpop.permute.xlu0 %784 }
 0x266   :  { %3061 = vset.pattern.permute.xlu1 %v3546_v62  ;;  %3082 = vset.pattern.permute.xlu0 %v3526_v31  ;;  %3164 = vpow2.f32 %v426_v20  ;;  %v745_v30 = vmul.f32 %v711_v40, %v3612_v32  ;;  %v394_v9 = vmul.f32 %v359_v37, %v3627_v54  ;;  %v712_v2 = vperm.slane %v489_v59, 0 }
 0x267   :  { %3166 = vpow2.f32 %v424_v27  ;;  %v779_v45 = vpop.permute.xlu2 %778  ;;  %v434_v0 = vmul.f32 1.442695, %v395_v58  ;;  %v744_v11 = vmul.f32 %v711_v40, %v3601_v21  ;;  %v3688_v27 = vadd.f32 %v3596_v12, %v299_v14 }
 0x268   :  { %3168 = vpow2.f32 %v430_v39  ;;  %v432_v26 = vmul.f32 1.442695, %v394_v9  ;;  %v490_v28 = vrot.slane %v3657_v19, 3  ;;  %v747_v29 = vmul.f32 %v712_v2, %v3636_v4 }
 0x269   :  { %3170 = vpow2.f32 %v428_v57  ;;  %v313_v38 = vand.u32 2147483647, %v3688_v27  ;;  %v746_v12 = vmul.f32 %v712_v2, %v3649_v13 }
 0x26a   :  { %v3161_v25 = vpop.eup %3160  ;;  %3172 = vpow2.f32 %v434_v0  ;;  %v713_v39 = vperm.slane %v490_v28, 0 }
 0x26b   :  { %v1012_v34 = vmul.f32 0.0, %v3161_v25  ;;  %v3163_v36 = vpop.eup %3162  ;;  %3174 = vpow2.f32 %v432_v26 }
 0x26c   :  { %v1013_v43 = vmul.f32 0.0, %v3163_v36  ;;  %v3165_v55 = vpop.eup %3164  ;;  %v749_v59 = vmul.f32 %v713_v39, %v3662_v24  ;;  %v748_v14 = vmul.f32 %v713_v39, %v3620_v48  ;;  %v347_v39 = vrot.slane %v3625_v52, 6 }
 0x26d   :  { %611 = vperm.xlu2 %3060, %v3653_v18   ;;  %v1014_v50 = vadd.f32 %v1012_v34, %v742_v41  ;;  %v3167_v61 = vpop.eup %3166  ;;  %v345_v34 = vrot.slane %v3625_v52, 4 }
 0x26e   :  { %617 = vperm.xlu1 %3061, %v3653_v18   ;;  %v1015_v53 = vadd.f32 %v1013_v43, %v743_v42  ;;  %v3169_v15 = vpop.eup %3168  ;;  %v3699_v42 = vpop.permute.xlu0 %598 }
 0x26f   :  { %v1027_v3 = vmul.f32 %v3167_v61, %v1014_v50  ;;  %v3171_v33 = vpop.eup %3170  ;;  %v360_v41 = vperm.slane %v345_v34, 0  ;;  %v1016_v13 = vmul.f32 %v1014_v50, %v779_v45 }
 0x270   :  { %v1028_v46 = vmul.f32 %v3165_v55, %v1015_v53  ;;  %v3692_v21 = vpop.permute.xlu1 %572  ;;  %v3173_v40 = vpop.eup %3172  ;;  %v315_v55 = vsub.f32 0.0, %v313_v38  ;;  %v1017_v58 = vmul.f32 %v1015_v53, %v785_v17  ;;  %v491_v38 = vrot.slane %v3657_v19, 4 }
 0x271   :  { %v1029_v32 = vadd.f32 %v1027_v3, %v744_v11  ;;  %v3175_v61 = vpop.eup %3174  ;;  %v397_v3 = vmul.f32 %v360_v41, %v3640_v10  ;;  %v396_v9 = vmul.f32 %v360_v41, %v3627_v54  ;;  %v1018_v24 = vsel %vm234_vm15, %v1016_v13, 0.0 }
 0x272   :  { %v1030_v5 = vadd.f32 %v1028_v46, %v745_v30  ;;  %v346_v30 = vrot.slane %v3625_v52, 5  ;;  %v318_v11 = vmul.f32 1.442695, %v315_v55  ;;  %v1019_v53 = vsel %vm234_vm15, %v1017_v58, 0.0 }
 0x273   :  { %v1042_v36 = vmul.f32 %v3171_v33, %v1029_v32  ;;  %v438_v17 = vmul.f32 1.442695, %v397_v3  ;;  %v436_v50 = vmul.f32 1.442695, %v396_v9  ;;  %v1020_v28 = vadd.f32 %v1019_v53, %v1018_v24 }
 0x274   :  { %v1043_v25 = vmul.f32 %v3169_v15, %v1030_v5  ;;  %v361_v15 = vperm.slane %v346_v30, 0  ;;  %3176 = vpow2.f32 %v318_v11  ;;  %v3727_v13 = vperm.slane %v3548_v63, 4 }
 0x275   :  { %624 = vperm.xlu2 %3060, %v3670_v35   ;;  %v3702_v4 = vadd.f32 %v1042_v36, %v746_v12  ;;  %3178 = vpow2.f32 %v438_v17  ;;  %v714_v9 = vperm.slane %v491_v38, 0  ;;  %v3735_v24 = vperm.slane %v3548_v63, 5 }
 0x276   :  { %630 = vperm.xlu1 %3061, %v3670_v35   ;;  %v3695_v37 = vadd.f32 %v1043_v25, %v747_v29  ;;  %v821_v45 = vpop.permute.xlu0 %820  ;;  %v399_v48 = vmul.f32 %v361_v15, %v3640_v10  ;;  %3180 = vpow2.f32 %v436_v50 }
 0x277   :  { %v797_v20 = vpop.permute.xlu2 %796  ;;  %v1057_v0 = vmul.f32 %v3175_v61, %v3702_v4  ;;  %v362_v61 = vperm.slane %v347_v39, 0 }
 0x278   :  { %v1058_v43 = vmul.f32 %v3173_v40, %v3695_v37  ;;  %v1032_v29 = vmul.f32 %v1030_v5, %v797_v20  ;;  %v398_v40 = vmul.f32 %v361_v15, %v3627_v54  ;;  %v1021_v5 = vrot.slane %v1020_v28, 4 }
 0x279   :  { %v1059_v25 = vadd.f32 %v1057_v0, %v748_v14 }
 0x27a   :  { %v1060_v2 = vadd.f32 %v1058_v43, %v749_v59  ;;  %v1034_v20 = vsel %vm234_vm15, %v1032_v29, 0.0  ;;  %v442_v59 = vmul.f32 1.442695, %v399_v48  ;;  %v3730_v3 = vpop.eup %3176  ;;  %v440_v0 = vmul.f32 1.442695, %v398_v40 }
 0x27b   :  { %v3179_v14 = vpop.eup %3178  ;;  %v1022_v53 = vadd.f32 %v1021_v5, %v1020_v28  ;;  %v750_v40 = vmul.f32 %v714_v9, %v3638_v6 }
 0x27c   :  { %v1062_v26 = vmul.f32 %v1060_v2, %v821_v45  ;;  %v3181_v17 = vpop.eup %3180  ;;  %v492_v45 = vrot.slane %v3657_v19, 5  ;;  %3182 = vpow2.f32 %v442_v59  ;;  %v1073_v50 = vmul.f32 %v3179_v14, %v1060_v2 }
 0x27d   :  { %637 = vperm.xlu2 %3060, %v3583_v8   ;;  %v1072_v28 = vmul.f32 %v3181_v17, %v1059_v25  ;;  %3184 = vpow2.f32 %v440_v0  ;;  %v1023_v38 = vrot.slane %v1022_v53, 2 }
 0x27e   :  { %3063 = vset.pattern.permute.xlu1 %v3526_v31  ;;  %v1064_v41 = vsel %vm234_vm15, %v1062_v26, 0.0 }
 0x27f   :  { %v809_v57 = vpop.permute.xlu2 %808 }
 0x280   :  { %v3708_v46 = vpop.permute.xlu1 %591  ;;  %v1047_v15 = vmul.f32 %v3695_v37, %v809_v57  ;;  %v751_v37 = vmul.f32 %v714_v9, %v3681_v60 }
 0x282   :  { %v1049_v39 = vsel %vm234_vm15, %v1047_v15, 0.0 }
 0x285   :  { %3064 = vset.pattern.permute.xlu2 %v3546_v62 }
 0x286   :  { %650 = vperm.xlu1 %3063, %v3604_v22  }
 0x28d   :  { %656 = vperm.xlu2 %3064, %v3604_v22  }
 0x28e   :  { %3066 = vset.pattern.permute.xlu1 %v3546_v62 }
 0x28f   :  { %v815_v33 = vpop.permute.xlu2 %814 }
 0x290   :  { %v1061_v34 = vmul.f32 %v1059_v25, %v815_v33  ;;  %v791_v36 = vpop.permute.xlu1 %790  ;;  %v401_v33 = vmul.f32 %v362_v61, %v3640_v10 }
 0x291   :  { %v1031_v12 = vmul.f32 %v1029_v32, %v791_v36  ;;  %v348_v36 = vrot.slane %v3625_v52, 7 }
 0x292   :  { %v1063_v43 = vsel %vm234_vm15, %v1061_v34, 0.0  ;;  %v446_v52 = vmul.f32 1.442695, %v401_v33  ;;  %v493_v33 = vrot.slane %v3657_v19, 6 }
 0x293   :  { %v1065_v55 = vadd.f32 %v1064_v41, %v1063_v43  ;;  %v1033_v58 = vsel %vm234_vm15, %v1031_v12, 0.0  ;;  %v400_v12 = vmul.f32 %v362_v61, %v3627_v54  ;;  %v329_v41 = vadd.f32 1.0, %v3730_v3 }
 0x294   :  { %v1035_v30 = vadd.f32 %v1034_v20, %v1033_v58  ;;  %v3747_v43 = vadd.f32 %v1073_v50, %v751_v37  ;;  %v363_v60 = vperm.slane %v348_v36, 0  ;;  %v3183_v20 = vpop.eup %3182  ;;  %v715_v58 = vperm.slane %v492_v45, 0 }
 0x295   :  { %v1066_v32 = vrot.slane %v1065_v55, 4  ;;  %3065 = vset.pattern.permute.xlu2 %v3526_v31  ;;  %v444_v6 = vmul.f32 1.442695, %v400_v12  ;;  %v3185_v61 = vpop.eup %3184  ;;  %3186 = vlog2.f32 %v329_v41 }
 0x296   :  { %v1036_v11 = vrot.slane %v1035_v30, 4  ;;  %669 = vperm.xlu1 %3066, %v3727_v13   ;;  %v1088_v9 = vmul.f32 %v3183_v20, %v3747_v43  ;;  %3188 = vpow2.f32 %v446_v52  ;;  %v403_v15 = vmul.f32 %v363_v60, %v3640_v10 }
 0x297   :  { %v1067_v48 = vadd.f32 %v1066_v32, %v1065_v55  ;;  %v3750_v55 = vadd.f32 %v1072_v28, %v750_v40  ;;  %v332_v32 = vmul.f32 -0.5, %v3730_v3  ;;  %v753_v17 = vmul.f32 %v715_v58, %v3659_v23 }
 0x298   :  { %v1037_v26 = vadd.f32 %v1036_v11, %v1035_v30  ;;  %v803_v29 = vpop.permute.xlu1 %802  ;;  %v1024_v30 = vadd.f32 %v1023_v38, %v1022_v53  ;;  %3190 = vpow2.f32 %v444_v6  ;;  %v402_v53 = vmul.f32 %v363_v60, %v3627_v54 }
 0x299   :  { %v1046_v34 = vmul.f32 %v3702_v4, %v803_v29  ;;  %v1068_v25 = vrot.slane %v1067_v48, 2  ;;  %v1087_v45 = vmul.f32 %v3185_v61, %v3750_v55  ;;  %v752_v29 = vmul.f32 %v715_v58, %v3692_v21 }
 0x29a   :  { %v1038_v57 = vrot.slane %v1037_v26, 2  ;;  %v450_v23 = vmul.f32 1.442695, %v403_v15  ;;  %v335_v21 = vand.u32 2147483647, %v3730_v3  ;;  %v716_v52 = vperm.slane %v493_v33, 0  ;;  %v3786_v15 = vpop.permute.xlu0 %850 }
 0x29b   :  { %v1048_v2 = vsel %vm234_vm15, %v1046_v34, 0.0  ;;  %v1069_v11 = vadd.f32 %v1068_v25, %v1067_v48  ;;  %v3761_v34 = vadd.f32 %v1088_v9, %v753_v17  ;;  %v333_v48 = vadd.f32 1.0, %v332_v32  ;;  %v3187_v38 = vpop.eup %3186 }
 0x29c   :  { %v1050_v4 = vadd.f32 %v1049_v39, %v1048_v2  ;;  %v1039_v5 = vadd.f32 %v1038_v57, %v1037_v26  ;;  %v1025_v26 = vrot.slane %v1024_v30, 1  ;;  %v3764_v39 = vadd.f32 %v1087_v45, %v752_v29  ;;  %v3189_v2 = vpop.eup %3188 }
 0x29d   :  { %663 = vperm.xlu2 %3065, %v3727_v13   ;;  %v1070_v28 = vrot.slane %v1069_v11, 1  ;;  %v448_v41 = vmul.f32 1.442695, %v402_v53  ;;  %v1103_v25 = vmul.f32 %v3189_v2, %v3761_v34  ;;  %v334_v20 = vmul.f32 %v3730_v3, %v333_v48 }
 0x29e   :  { %v1051_v59 = vrot.slane %v1050_v4, 4  ;;  %682 = vperm.xlu1 %3066, %v3735_v24   ;;  %v1040_v14 = vrot.slane %v1039_v5, 1  ;;  %v1026_v40 = vadd.f32 %v1025_v26, %v1024_v30  ;;  %v3191_v60 = vpop.eup %3190  ;;  %3192 = vpow2.f32 %v450_v23 }
 0x29f   :  { %v833_v57 = vpop.permute.xlu2 %832  ;;  %v1071_v58 = vadd.f32 %v1070_v28, %v1069_v11  ;;  %v331_v6 = vmul.f32 0.6931472, %v3187_v38  ;;  %v755_v61 = vmul.f32 %v716_v52, %v3708_v46  ;;  %v1102_v32 = vmul.f32 %v3191_v60, %v3764_v39 }
 0x2a0   :  { %v1052_v0 = vadd.f32 %v1051_v59, %v1050_v4  ;;  %v1041_v37 = vadd.f32 %v1040_v14, %v1039_v5  ;;  %v494_v4 = vrot.slane %v3657_v19, 7  ;;  %vm3775_vm14 = vcmp.lt.f32.partialorder %v335_v21, 0.0004427343 }
 0x2a1   :  { %3194 = vpow2.f32 %v448_v41  ;;  %v3782_v11 = vadd.f32 %v1103_v25, %v755_v61  ;;  %v754_v14 = vmul.f32 %v716_v52, %v3674_v44  ;;  %v311_v46 = vmax.f32 %v3688_v27, 0.0 }
 0x2a2   :  { %v1053_v50 = vrot.slane %v1052_v0, 2  ;;  %v1252_v59 = vsel %vm144_vm8, %v1026_v40, %v1041_v37  ;;  %v717_v3 = vperm.slane %v494_v4, 0  ;;  %v337_v17 = vsel %vm3775_vm14, %v334_v20, %v331_v6  ;;  %v869_v37 = vpop.permute.xlu0 %868 }
 0x2a3   :  { %v3791_v45 = vadd.f32 %v1102_v32, %v754_v14  ;;  %v3795_v44 = vadd.f32 %v337_v17, %v311_v46  ;;  %v1077_v23 = vmul.f32 %v3747_v43, %v833_v57 }
 0x2a4   :  { %v1054_v36 = vadd.f32 %v1053_v50, %v1052_v0  ;;  %v3193_v26 = vpop.eup %3192  ;;  %v756_v28 = vmul.f32 %v717_v3, %v3699_v42 }
 0x2a5   :  { %676 = vperm.xlu2 %3065, %v3735_v24   ;;  %v1118_v29 = vmul.f32 %v3193_v26, %v3782_v11  ;;  %v364_v48 = vperm.slane %v3795_v44, 0  ;;  %v349_v40 = vrot.slane %v3795_v44, 1  ;;  %v1079_v52 = vsel %vm234_vm15, %v1077_v23, 0.0 }
 0x2a6   :  { %v1055_v12 = vrot.slane %v1054_v36, 1  ;;  %695 = vperm.xlu1 %3066, %v3623_v51   ;;  %v350_v61 = vrot.slane %v3795_v44, 2 }
 0x2a7   :  { %v845_v53 = vpop.permute.xlu2 %844  ;;  %v3195_v33 = vpop.eup %3194  ;;  %v404_v21 = vmul.f32 %v364_v48, %v3627_v54  ;;  %v3812_v20 = vperm.slane %v349_v40, 0 }
 0x2a8   :  { %v1056_v5 = vadd.f32 %v1055_v12, %v1054_v36  ;;  %v605_v9 = vpop.permute.xlu1 %604  ;;  %v1117_v36 = vmul.f32 %v3195_v33, %v3791_v45  ;;  %v3827_v46 = vperm.slane %v350_v61, 0 }
 0x2a9   :  { %v757_v50 = vmul.f32 %v717_v3, %v605_v9  ;;  %v452_v60 = vmul.f32 1.442695, %v404_v21  ;;  %v406_v6 = vmul.f32 %v3812_v20, %v3627_v54  ;;  %v3823_v9 = vmul.f32 %v3795_v44, %v3535_v56 }
 0x2aa   :  { %v1253_v30 = vsel %vm151_vm9, %v1252_v59, %v1056_v5  ;;  %v1119_v12 = vadd.f32 %v1117_v36, %v756_v28 }
 0x2ab   :  { %v3780_v0 = vsel %vm158_vm10, %v1253_v30, %v1071_v58  ;;  %v1120_v27 = vadd.f32 %v1118_v29, %v757_v50  ;;  %3196 = vpow2.f32 %v452_v60 }
 0x2ad   :  { %689 = vperm.xlu2 %3065, %v3623_v51   ;;  %v1122_v38 = vmul.f32 %v1120_v27, %v869_v37  ;;  %v408_v27 = vmul.f32 %v3827_v46, %v3627_v54 }
 0x2ae   :  { %3067 = vset.pattern.permute.xlu1 %v3570_v7 }
 0x2af   :  { %v1124_v43 = vsel %vm234_vm15, %v1122_v38, 0.0  ;;  %v495_v38 = vrot.slane %v3823_v9, 1 }
 0x2b1   :  { %v3197_v26 = vpop.eup %3196 }
 0x2b2   :  { %v1132_v37 = vmul.f32 0.0, %v3197_v26 }
 0x2b5   :  { %3068 = vset.pattern.permute.xlu2 %v3558_v1 }
 0x2b6   :  { %874 = vperm.xlu1 %3067, %v3653_v18  }
 0x2b7   :  { %v863_v2 = vpop.permute.xlu2 %862 }
 0x2b8   :  { %v1121_v41 = vmul.f32 %v1119_v12, %v863_v2  ;;  %v827_v4 = vpop.permute.xlu1 %826  ;;  %v460_v12 = vmul.f32 1.442695, %v408_v27 }
 0x2b9   :  { %v1076_v42 = vmul.f32 %v3750_v55, %v827_v4  ;;  %v1092_v55 = vmul.f32 %v3761_v34, %v845_v53  ;;  %v456_v34 = vmul.f32 1.442695, %v406_v6  ;;  %v496_v6 = vrot.slane %v3823_v9, 2 }
 0x2ba   :  { %v1123_v25 = vsel %vm234_vm15, %v1121_v41, 0.0 }
 0x2bb   :  { %v1125_v57 = vadd.f32 %v1124_v43, %v1123_v25  ;;  %v1078_v5 = vsel %vm234_vm15, %v1076_v42, 0.0  ;;  %v1094_v3 = vsel %vm234_vm15, %v1092_v55, 0.0  ;;  %3198 = vpow2.f32 %v456_v34 }
 0x2bc   :  { %v1080_v58 = vadd.f32 %v1079_v52, %v1078_v5  ;;  %v3841_v42 = vperm.slane %v495_v38, 0  ;;  %v1106_v52 = vmul.f32 %v3791_v45, %v3786_v15  ;;  %3200 = vpow2.f32 %v460_v12 }
 0x2bd   :  { %880 = vperm.xlu2 %3068, %v3653_v18   ;;  %v1126_v41 = vrot.slane %v1125_v57, 4  ;;  %v405_v15 = vmul.f32 %v364_v48, %v3640_v10 }
 0x2be   :  { %v1081_v59 = vrot.slane %v1080_v58, 4  ;;  %886 = vperm.xlu1 %3067, %v3670_v35  }
 0x2bf   :  { %v1127_v55 = vadd.f32 %v1126_v41, %v1125_v57 }
 0x2c0   :  { %v1082_v32 = vadd.f32 %v1081_v59, %v1080_v58  ;;  %v839_v30 = vpop.permute.xlu1 %838 }
 0x2c1   :  { %v1091_v19 = vmul.f32 %v3764_v39, %v839_v30  ;;  %v718_v39 = vperm.slane %v3823_v9, 0  ;;  %v3199_v40 = vpop.eup %3198  ;;  %v3860_v30 = vperm.slane %v3548_v63, 7 }
 0x2c2   :  { %v1083_v18 = vrot.slane %v1082_v32, 2 }
 0x2c3   :  { %v1093_v14 = vsel %vm234_vm15, %v1091_v19, 0.0  ;;  %v3201_v19 = vpop.eup %3200 }
 0x2c4   :  { %v1084_v17 = vadd.f32 %v1083_v18, %v1082_v32  ;;  %v1095_v50 = vadd.f32 %v1094_v3, %v1093_v14  ;;  %v720_v18 = vperm.slane %v496_v6, 0  ;;  %v454_v14 = vmul.f32 1.442695, %v405_v15  ;;  %v644_v15 = vpop.permute.xlu0 %643 }
 0x2c5   :  { %892 = vperm.xlu2 %3068, %v3670_v35  }
 0x2c6   :  { %v1096_v53 = vrot.slane %v1095_v50, 4  ;;  %3070 = vset.pattern.permute.xlu1 %v3558_v1  ;;  %v1085_v29 = vrot.slane %v1084_v17, 1  ;;  %3202 = vpow2.f32 %v454_v14 }
 0x2c7   :  { %v612_v33 = vpop.permute.xlu2 %611 }
 0x2c8   :  { %v1097_v36 = vadd.f32 %v1096_v53, %v1095_v50  ;;  %v758_v28 = vmul.f32 %v718_v39, %v612_v33  ;;  %v1086_v35 = vadd.f32 %v1085_v29, %v1084_v17  ;;  %v351_v53 = vrot.slane %v3795_v44, 3 }
 0x2c9   :  { %v407_v33 = vmul.f32 %v3812_v20, %v3640_v10 }
 0x2ca   :  { %v1098_v23 = vrot.slane %v1097_v36, 2  ;;  %v3837_v21 = vadd.f32 %v1132_v37, %v758_v28  ;;  %v1256_v43 = vsel %vm1255_vm1, %v3780_v0, %v1086_v35  ;;  %v1108_v0 = vsel %vm234_vm15, %v1106_v52, 0.0 }
 0x2cb   :  { %v409_v37 = vmul.f32 %v3827_v46, %v3640_v10  ;;  %v367_v38 = vperm.slane %v351_v53, 0  ;;  %v966_v35 = vsub.f32 0.0, %v3496_v49 }
 0x2cc   :  { %v1099_v2 = vadd.f32 %v1098_v23, %v1097_v36  ;;  %v1147_v59 = vmul.f32 %v3199_v40, %v3837_v21  ;;  %v458_v23 = vmul.f32 1.442695, %v407_v33  ;;  %v3203_v12 = vpop.eup %3202 }
 0x2cd   :  { %3071 = vset.pattern.permute.xlu2 %v3526_v31  ;;  %v411_v52 = vmul.f32 %v367_v38, %v3640_v10  ;;  %v968_v46 = vmul.f32 1.442695, %v966_v35 }
 0x2ce   :  { %v1100_v4 = vrot.slane %v1099_v2, 1  ;;  %904 = vperm.xlu1 %3070, %v3583_v8   ;;  %3204 = vpow2.f32 %v458_v23 }
 0x2cf   :  { %v625_v25 = vpop.permute.xlu2 %624 }
 0x2d0   :  { %v1101_v5 = vadd.f32 %v1100_v4, %v1099_v2  ;;  %v857_v60 = vpop.permute.xlu1 %856  ;;  %v760_v58 = vmul.f32 %v3841_v42, %v625_v25  ;;  %v462_v4 = vmul.f32 1.442695, %v409_v37 }
 0x2d1   :  { %v1107_v8 = vmul.f32 %v3782_v11, %v857_v60  ;;  %v1128_v11 = vrot.slane %v1127_v55, 2 }
 0x2d2   :  { %v3851_v61 = vadd.f32 %v1147_v59, %v760_v58  ;;  %v1258_v45 = vsel %vm1257_vm2, %v1256_v43, %v1101_v5  ;;  %v1133_v43 = vmul.f32 0.0, %v3203_v12  ;;  %3206 = vpow2.f32 %v462_v4 }
 0x2d3   :  { %v1109_v32 = vsel %vm234_vm15, %v1107_v8, 0.0  ;;  %v1129_v26 = vadd.f32 %v1128_v11, %v1127_v55  ;;  %v352_v58 = vrot.slane %v3795_v44, 4  ;;  %3208 = vpow2.f32 %v968_v46 }
 0x2d4   :  { %v1110_v57 = vadd.f32 %v1109_v32, %v1108_v0  ;;  %v1162_v50 = vmul.f32 %v3201_v19, %v3851_v61  ;;  %v3205_v59 = vpop.eup %3204  ;;  %v498_v12 = vrot.slane %v3823_v9, 4 }
 0x2d5   :  { %702 = vperm.xlu2 %3071, %v3860_v30   ;;  %v1130_v36 = vrot.slane %v1129_v26, 1  ;;  %v368_v0 = vperm.slane %v352_v58, 0 }
 0x2d6   :  { %v1111_v3 = vrot.slane %v1110_v57, 4  ;;  %3072 = vset.pattern.permute.xlu1 %v3546_v62 }
 0x2d7   :  { %v638_v48 = vpop.permute.xlu2 %637  ;;  %v1131_v41 = vadd.f32 %v1130_v36, %v1129_v26 }
 0x2d8   :  { %v1112_v34 = vadd.f32 %v1111_v3, %v1110_v57  ;;  %v762_v17 = vmul.f32 %v720_v18, %v638_v48  ;;  %v497_v57 = vrot.slane %v3823_v9, 3  ;;  %v3207_v19 = vpop.eup %3206  ;;  %v763_v3 = vmul.f32 %v720_v18, %v644_v15 }
 0x2d9   :  { %v3209_v11 = vpop.eup %3208 }
 0x2da   :  { %v1113_v63 = vrot.slane %v1112_v34, 2  ;;  %v3866_v29 = vadd.f32 %v1162_v50, %v762_v17  ;;  %v721_v50 = vperm.slane %v497_v57, 0 }
 0x2dc   :  { %v1114_v27 = vadd.f32 %v1113_v63, %v1112_v34  ;;  %v412_v34 = vmul.f32 %v368_v0, %v3627_v54  ;;  %v3902_v63 = vadd.f32 1.0, %v3209_v11 }
 0x2dd   :  { %3073 = vset.pattern.permute.xlu2 %v3570_v7 }
 0x2de   :  { %v1115_v28 = vrot.slane %v1114_v27, 1  ;;  %708 = vperm.xlu1 %3072, %v3860_v30   ;;  %v468_v36 = vmul.f32 1.442695, %v412_v34  ;;  %vm979_vm7 = vweird.f32 %v3902_v63 }
 0x2e0   :  { %v1116_v2 = vadd.f32 %v1115_v28, %v1114_v27  ;;  %v618_v40 = vpop.permute.xlu1 %617  ;;  %v354_v27 = vrot.slane %v3795_v44, 6 }
 0x2e1   :  { %v759_v20 = vmul.f32 %v718_v39, %v618_v40  ;;  %v466_v39 = vmul.f32 1.442695, %v411_v52 }
 0x2e2   :  { %v1260_v25 = vsel %vm1259_vm3, %v1258_v45, %v1116_v2  ;;  %v410_v45 = vmul.f32 %v367_v38, %v3627_v54  ;;  %v3912_v23 = vperm.slane %v354_v27, 0 }
 0x2e3   :  { %v3880_v5 = vsel %vm1261_vm4, %v1260_v25, %v1131_v41  ;;  %v3882_v60 = vadd.f32 %v1133_v43, %v759_v20  ;;  %3210 = vpow2.f32 %v466_v39  ;;  %v413_v25 = vmul.f32 %v368_v0, %v3640_v10 }
 0x2e4   :  { %v464_v48 = vmul.f32 1.442695, %v410_v45  ;;  %v416_v4 = vmul.f32 %v3912_v23, %v3627_v54  ;;  %v722_v43 = vperm.slane %v498_v12, 0 }
 0x2e5   :  { %910 = vperm.xlu2 %3073, %v3604_v22   ;;  %v1148_v6 = vmul.f32 %v3205_v59, %v3882_v60  ;;  %v353_v22 = vrot.slane %v3795_v44, 5  ;;  %v470_v15 = vmul.f32 1.442695, %v413_v25 }
 0x2e6   :  { %3075 = vset.pattern.permute.xlu1 %v3570_v7  ;;  %3212 = vpow2.f32 %v464_v48 }
 0x2e7   :  { %v3898_v17 = vperm.slane %v353_v22, 0  ;;  %3214 = vrcp.f32 %v3902_v63 }
 0x2e8   :  { %v631_v55 = vpop.permute.xlu1 %630  ;;  %3216 = vpow2.f32 %v468_v36 }
 0x2e9   :  { %v761_v8 = vmul.f32 %v3841_v42, %v631_v55  ;;  %v657_v42 = vpop.permute.xlu2 %656  ;;  %v3211_v53 = vpop.eup %3210  ;;  %v414_v28 = vmul.f32 %v3898_v17, %v3627_v54  ;;  %v476_v55 = vmul.f32 1.442695, %v416_v4 }
 0x2ea   :  { %v765_v33 = vmul.f32 %v721_v50, %v657_v42 }
 0x2eb   :  { %v3891_v32 = vadd.f32 %v1148_v6, %v761_v8  ;;  %v472_v38 = vmul.f32 1.442695, %v414_v28 }
 0x2ec   :  { %v3213_v2 = vpop.eup %3212 }
 0x2ed   :  { %v1163_v14 = vmul.f32 %v3207_v19, %v3891_v32  ;;  %3076 = vset.pattern.permute.xlu2 %v3558_v1  ;;  %v1177_v41 = vmul.f32 %v3213_v2, %v3866_v29  ;;  %v3215_v52 = vpop.eup %3214  ;;  %3218 = vpow2.f32 %v472_v38 }
 0x2ee   :  { %922 = vperm.xlu1 %3075, %v3727_v13   ;;  %v3217_v39 = vpop.eup %3216  ;;  %v975_v8 = vmul.f32 %v3215_v52, %v3902_v63  ;;  %3220 = vpow2.f32 %v476_v55  ;;  %vm980_vm6 = vweird.f32 %v3215_v52 }
 0x2ef   :  { %v3900_v26 = vadd.f32 %v1163_v14, %v763_v3  ;;  %3222 = vpow2.f32 %v470_v15  ;;  %vm981_vm11 = vmor %vm979_vm7, %vm980_vm6 }
 0x2f0   :  { %v976_v11 = vsub.f32 1.0, %v975_v8 }
 0x2f1   :  { %v1178_v18 = vmul.f32 %v3211_v53, %v3900_v26 }
 0x2f2   :  { %v977_v14 = vmul.f32 %v3215_v52, %v976_v11 }
 0x2f3   :  { %v3908_v37 = vadd.f32 %v1178_v18, %v765_v33  ;;  %v3219_v22 = vpop.eup %3218 }
 0x2f4   :  { %v3221_v48 = vpop.eup %3220  ;;  %v978_v36 = vadd.f32 %v3215_v52, %v977_v14 }
 0x2f5   :  { %928 = vperm.xlu2 %3076, %v3727_v13   ;;  %v499_v13 = vrot.slane %v3823_v9, 5 }
 0x2f6   :  { %934 = vperm.xlu1 %3075, %v3735_v24   ;;  %v982_v2 = vsel %vm981_vm11, %v3215_v52, %v978_v36 }
 0x2f7   :  { %v664_v35 = vpop.permute.xlu2 %663  ;;  %v3927_v6 = vperm.slane %v499_v13, 0 }
 0x2f8   :  { %v651_v40 = vpop.permute.xlu1 %650  ;;  %v766_v58 = vmul.f32 %v722_v43, %v664_v35  ;;  %v985_v35 = vand.u32 2147483648, %v3902_v63 }
 0x2f9   :  { %v764_v20 = vmul.f32 %v721_v50, %v651_v40  ;;  %v3223_v50 = vpop.eup %3222 }
 0x2fa   :  { %v1193_v28 = vmul.f32 %v3223_v50, %v3908_v37  ;;  %v986_v40 = vor.u32 1.1754944e-38, %v985_v35 }
 0x2fb   :  { %v3921_v46 = vadd.f32 %v1177_v41, %v764_v20 }
 0x2fd   :  { %v1192_v59 = vmul.f32 %v3217_v39, %v3921_v46  ;;  %940 = vperm.xlu2 %3076, %v3735_v24   ;;  %v500_v24 = vrot.slane %v3823_v9, 6 }
 0x2fe   :  { %3078 = vset.pattern.permute.xlu1 %v3558_v1 }
 0x2ff   :  { %v3929_v45 = vadd.f32 %v1192_v59, %v766_v58  ;;  %v677_v0 = vpop.permute.xlu2 %676  ;;  %v3938_v42 = vperm.slane %v500_v24, 0 }
 0x300   :  { %v768_v57 = vmul.f32 %v3927_v6, %v677_v0 }
 0x301   :  { %v1207_v19 = vmul.f32 %v3219_v22, %v3929_v45 }
 0x303   :  { %v3934_v3 = vadd.f32 %v1207_v19, %v768_v57 }
 0x305   :  { %3079 = vset.pattern.permute.xlu2 %v3570_v7  ;;  %v1222_v18 = vmul.f32 %v3221_v48, %v3934_v3 }
 0x306   :  { %952 = vperm.xlu1 %3078, %v3623_v51   ;;  %v983_v51 = vand.u32 2147483647, %v3902_v63 }
 0x307   :  { %v690_v34 = vpop.permute.xlu2 %689 }
 0x308   :  { %v670_v53 = vpop.permute.xlu1 %669  ;;  %v770_v33 = vmul.f32 %v3938_v42, %v690_v34  ;;  %vm984_vm12 = vcmp.eq.f32.partialorder %v983_v51, 8.507059e+37 }
 0x309   :  { %v767_v27 = vmul.f32 %v722_v43, %v670_v53  ;;  %v987_v20 = vsel %vm984_vm12, %v986_v40, %v982_v2 }
 0x30a   :  { %v3943_v38 = vadd.f32 %v1222_v18, %v770_v33  ;;  %v1004_v41 = vmul.f32 %v987_v20, %v3496_v49 }
 0x30b   :  { %v3948_v12 = vadd.f32 %v1193_v28, %v767_v27 }
 0x30d   :  { %958 = vperm.xlu2 %3079, %v3860_v30  }
 0x30e   :  { %964 = vperm.xlu1 %3078, %v3860_v30  }
 0x310   :  { %v3954_v4 = vpop.permute.xlu1 %682 }
 0x315   :  { %1274 = vrot.lane.b32.xlu2 %v1004_v41, %s3359_s21 }
 0x316   :  { %3080 = vset.pattern.permute.xlu1 %v3526_v31  ;;  %3081 = vset.pattern.permute.xlu2 %v3546_v62 }
 0x317   :  { %v881_v63 = vpop.permute.xlu2 %880 }
 0x318   :  { %v1137_v13 = vmul.f32 %v3882_v60, %v881_v63  ;;  %v3959_v25 = vpop.permute.xlu1 %695 }
 0x31a   :  { %v1139_v43 = vsel %vm234_vm15, %v1137_v13, 0.0 }
 0x31f   :  { %v893_v39 = vpop.permute.xlu2 %892 }
 0x320   :  { %v1152_v55 = vmul.f32 %v3891_v32, %v893_v39 }
 0x322   :  { %v1154_v60 = vsel %vm234_vm15, %v1152_v55, 0.0 }
 0x328   :  { %v875_v52 = vpop.permute.xlu1 %874 }
 0x329   :  { %v1136_v30 = vmul.f32 %v3837_v21, %v875_v52  ;;  %v899_v21 = vpop.permute.xlu0 %898 }
 0x32b   :  { %v1138_v49 = vsel %vm234_vm15, %v1136_v30, 0.0 }
 0x32c   :  { %v1140_v58 = vadd.f32 %v1139_v43, %v1138_v49 }
 0x32e   :  { %v1141_v59 = vrot.slane %v1140_v58, 4 }
 0x32f   :  { %v3968_v24 = vpop.permute.xlu2 %702 }
 0x330   :  { %v1142_v8 = vadd.f32 %v1141_v59, %v1140_v58  ;;  %v887_v15 = vpop.permute.xlu1 %886 }
 0x331   :  { %v1151_v0 = vmul.f32 %v3851_v61, %v887_v15  ;;  %v917_v32 = vpop.permute.xlu0 %916  ;;  %v1166_v61 = vmul.f32 %v3866_v29, %v899_v21  ;;  %v415_v21 = vmul.f32 %v3898_v17, %v3640_v10  ;;  %v1283_v17 = vld [vmem:[%s4792_s10 + $0x8] sm:$0xff] }
 0x332   :  { %v1143_v57 = vrot.slane %v1142_v8, 2  ;;  %v1182_v33 = vmul.f32 %v3908_v37, %v917_v32  ;;  %v1282_v32 = vld [vmem:[%s4792_s10] sm:$0xff] }
 0x333   :  { %v1153_v22 = vsel %vm234_vm15, %v1151_v0, 0.0  ;;  %v1168_v63 = vsel %vm234_vm15, %v1166_v61, 0.0  ;;  %v1289_v0 = vld [vmem:[%s4792_s10 + $0x38] sm:$0xff] }
 0x334   :  { %v1155_v19 = vadd.f32 %v1154_v60, %v1153_v22  ;;  %v1144_v14 = vadd.f32 %v1143_v57, %v1142_v8  ;;  %v1184_v41 = vsel %vm234_vm15, %v1182_v33, 0.0  ;;  %v1288_v60 = vld [vmem:[%s4792_s10 + $0x30] sm:$0xff]  ;;  %1304 = vmatpush.msra.mxu3 %v1289_v0  ;;  %v1287_v57 = vld [vmem:[%s4792_s10 + $0x28] sm:$0xff] }
 0x336   :  { %v1156_v11 = vrot.slane %v1155_v19, 4  ;;  %v1145_v50 = vrot.slane %v1144_v14, 1  ;;  %1305 = vmatpush.msra.mxu3 %v1288_v60 }
 0x338   :  { %v1157_v48 = vadd.f32 %v1156_v11, %v1155_v19  ;;  %v1146_v36 = vadd.f32 %v1145_v50, %v1144_v14  ;;  %1306 = vmatpush.msra.mxu3 %v1287_v57  ;;  %v1285_v50 = vld [vmem:[%s4792_s10 + $0x18] sm:$0xff] }
 0x33a   :  { %v1158_v34 = vrot.slane %v1157_v48, 2 }
 0x33c   :  { %v1159_v53 = vadd.f32 %v1158_v34, %v1157_v48  ;;  %v474_v48 = vmul.f32 1.442695, %v415_v21  ;;  %v1286_v34 = vld [vmem:[%s4792_s10 + $0x20] sm:$0xff] }
 0x33d   :  { %1307 = vmatpush.msra.mxu3 %v1286_v34  ;;  %v947_v34 = vpop.permute.xlu0 %946 }
 0x33e   :  { %v1160_v18 = vrot.slane %v1159_v53, 1  ;;  %3224 = vpow2.f32 %v474_v48 }
 0x33f   :  { %v911_v27 = vpop.permute.xlu2 %910  ;;  %1308 = vmatpush.msra.mxu3 %v1285_v50 }
 0x340   :  { %v1161_v28 = vadd.f32 %v1160_v18, %v1159_v53  ;;  %v905_v35 = vpop.permute.xlu1 %904  ;;  %v1181_v51 = vmul.f32 %v3921_v46, %v911_v27  ;;  %v1284_v53 = vld [vmem:[%s4792_s10 + $0x10] sm:$0xff]  ;;  %v769_v27 = vmul.f32 %v3927_v6, %v3954_v4 }
 0x341   :  { %v1167_v2 = vmul.f32 %v3900_v26, %v905_v35  ;;  %1309 = vmatpush.msra.mxu3 %v1284_v53  ;;  %v1226_v53 = vmul.f32 %v3943_v38, %v947_v34 }
 0x342   :  { %v1263_v40 = vsel %vm144_vm8, %v1146_v36, %v1161_v28  ;;  %v1183_v20 = vsel %vm234_vm15, %v1181_v51, 0.0 }
 0x343   :  { %v1169_v37 = vsel %vm234_vm15, %v1167_v2, 0.0  ;;  %v1185_v13 = vadd.f32 %v1184_v41, %v1183_v20  ;;  %1310 = vmatpush.msra.mxu3 %v1283_v17  ;;  %v355_v20 = vrot.slane %v3795_v44, 7 }
 0x344   :  { %v1170_v29 = vadd.f32 %v1169_v37, %v1168_v63  ;;  %v3225_v28 = vpop.eup %3224  ;;  %v417_v37 = vmul.f32 %v3912_v23, %v3640_v10 }
 0x345   :  { %v1186_v52 = vrot.slane %v1185_v13, 4  ;;  %1311 = vmatpush.msra.mxu3 %v1282_v32  ;;  %v1208_v51 = vmul.f32 %v3225_v28, %v3948_v12 }
 0x346   :  { %v1171_v30 = vrot.slane %v1170_v29, 4 }
 0x347   :  { %v1187_v43 = vadd.f32 %v1186_v52, %v1185_v13  ;;  %v1210_v41 = vadd.f32 %v1208_v51, %v769_v27  ;;  %v4022_v52 = vld [vmem:[%s4786_s9] ss:$0 sm:$0xff] }
 0x348   :  { %v1172_v49 = vadd.f32 %v1171_v30, %v1170_v29  ;;  %v371_v29 = vperm.slane %v355_v20, 0 }
 0x349   :  { %v1188_v39 = vrot.slane %v1187_v43, 2 }
 0x34a   :  { %v1173_v46 = vrot.slane %v1172_v49, 2 }
 0x34b   :  { %v1189_v58 = vadd.f32 %v1188_v39, %v1187_v43  ;;  %v478_v43 = vmul.f32 1.442695, %v417_v37 }
 0x34c   :  { %v1174_v26 = vadd.f32 %v1173_v46, %v1172_v49  ;;  %v418_v46 = vmul.f32 %v371_v29, %v3627_v54 }
 0x34d   :  { %v1190_v59 = vrot.slane %v1189_v58, 1  ;;  %3226 = vpow2.f32 %v478_v43 }
 0x34e   :  { %v1175_v55 = vrot.slane %v1174_v26, 1  ;;  %v480_v60 = vmul.f32 1.442695, %v418_v46 }
 0x34f   :  { %v1191_v8 = vadd.f32 %v1190_v59, %v1189_v58  ;;  %v929_v11 = vpop.permute.xlu2 %928  ;;  %v1010_v58 = vmul.f32 %v4022_v52, %v3531_v47  ;;  %v771_v47 = vmul.f32 %v3938_v42, %v3959_v25 }
 0x350   :  { %v1176_v15 = vadd.f32 %v1175_v55, %v1174_v26  ;;  %v3992_v14 = vpop.permute.xlu1 %708  ;;  %v1197_v33 = vmul.f32 %v3948_v12, %v929_v11  ;;  %v419_v26 = vmul.f32 %v371_v29, %v3640_v10  ;;  %v501_v10 = vrot.slane %v3823_v9, 7 }
 0x351   :  { %3228 = vpow2.f32 %v480_v60 }
 0x352   :  { %v1264_v22 = vsel %vm151_vm9, %v1263_v40, %v1176_v15  ;;  %v1199_v35 = vsel %vm234_vm15, %v1197_v33, 0.0  ;;  %v482_v21 = vmul.f32 1.442695, %v419_v26  ;;  %v725_v17 = vperm.slane %v501_v10, 0  ;;  %v1361_v10 = vld [vmem:[%s4794_s12 + $0x10] sm:$0xff] }
 0x353   :  { %v1265_v19 = vsel %vm158_vm10, %v1264_v22, %v1191_v8  ;;  %v1270_v8 = vadd.f32 %v3880_v5, %v1010_v58  ;;  %v3227_v11 = vpop.eup %3226  ;;  %v1011_v58 = vmul.f32 %v4022_v52, %v3535_v56  ;;  %v3357_v52 = vld [vmem:[%s4802_s23 + $0x8] sm:$0xff] }
 0x354   :  { %v1223_v5 = vmul.f32 %v3227_v11, %v1210_v41  ;;  %3230 = vpow2.f32 %v482_v21  ;;  %v773_v9 = vmul.f32 %v725_v17, %v3992_v14  ;;  %v1360_v11 = vld [vmem:[%s4794_s12 + $0x8] sm:$0xff] }
 0x356   :  { %v1225_v32 = vadd.f32 %v1223_v5, %v771_v47  ;;  %v1362_v47 = vld [vmem:[%s4794_s12 + $0x18] sm:$0xff]  ;;  %v3000_v5 = vld [vmem:[%s4789_s6 + $0x2] sm:$0x3] }
 0x357   :  { %v941_v18 = vpop.permute.xlu2 %940  ;;  %v3229_v27 = vpop.eup %3228  ;;  %1381 = vmatpush.msrb.mxu2 %v1362_v47 }
 0x358   :  { %v1212_v13 = vmul.f32 %v1210_v41, %v941_v18  ;;  %v1237_v25 = vmul.f32 %v3229_v27, %v3943_v38  ;;  %v3129_v27 = vld [vmem:[%s4793_s11] ss:$0 sm:$0xff] }
 0x359   :  { %1382 = vmatpush.msrb.mxu2 %v1361_v10 }
 0x35a   :  { %v1214_v44 = vsel %vm234_vm15, %v1212_v13, 0.0 }
 0x35b   :  { %1383 = vmatpush.msrb.mxu2 %v1360_v11 }
 0x360   :  { %v923_v61 = vpop.permute.xlu1 %922 }
 0x361   :  { %v1196_v36 = vmul.f32 %v3929_v45, %v923_v61 }
 0x363   :  { %v1198_v2 = vsel %vm234_vm15, %v1196_v36, 0.0  ;;  %v1228_v36 = vsel %vm234_vm15, %v1226_v53, 0.0 }
 0x364   :  { %v1200_v40 = vadd.f32 %v1199_v35, %v1198_v2  ;;  %v3231_v35 = vpop.eup %3230 }
 0x366   :  { %v1201_v63 = vrot.slane %v1200_v40, 4 }
 0x367   :  { %v959_v6 = vpop.permute.xlu2 %958 }
 0x368   :  { %v1202_v4 = vadd.f32 %v1201_v63, %v1200_v40  ;;  %v935_v45 = vpop.permute.xlu1 %934  ;;  %v1238_v40 = vmul.f32 %v3231_v35, %v1225_v32 }
 0x369   :  { %v1211_v12 = vmul.f32 %v3934_v3, %v935_v45 }
 0x36a   :  { %v1203_v30 = vrot.slane %v1202_v4, 2  ;;  %v1240_v63 = vadd.f32 %v1238_v40, %v773_v9 }
 0x36b   :  { %v1213_v49 = vsel %vm234_vm15, %v1211_v12, 0.0 }
 0x36c   :  { %v1204_v39 = vadd.f32 %v1203_v30, %v1202_v4  ;;  %v1215_v23 = vadd.f32 %v1214_v44, %v1213_v49 }
 0x36e   :  { %v1205_v59 = vrot.slane %v1204_v39, 1  ;;  %v1216_v55 = vrot.slane %v1215_v23, 4 }
 0x36f   :  { %v1275_v3 = vpop.permute.xlu2 %1274 }
 0x370   :  { %v1206_v15 = vadd.f32 %v1205_v59, %v1204_v39  ;;  %v1217_v0 = vadd.f32 %v1216_v55, %v1215_v23  ;;  %v1280_v22 = vmul.f32 %v1275_v3, %v1270_v8  ;;  %v1277_v55 = vpop.permute.xlu0 %1276 }
 0x372   :  { %v1218_v57 = vrot.slane %v1217_v0, 2  ;;  %2975 = vmatmul.msk.f32.vlgmr.msra.gmra.mxu3 %vm234_vm15, %v1280_v22  ;;  %v1266_v54 = vsel %vm1255_vm1, %v1265_v19, %v1206_v15  ;;  %v772_v19 = vmul.f32 %v725_v17, %v3968_v24  ;;  %v3356_v15 = vld [vmem:[%s4802_s23] sm:$0xff] }
 0x374   :  { %v1219_v48 = vadd.f32 %v1218_v57, %v1217_v0  ;;  %v1239_v2 = vadd.f32 %v1237_v25, %v772_v19 }
 0x376   :  { %v1220_v50 = vrot.slane %v1219_v48, 1  ;;  %v1241_v41 = vmul.f32 %v1239_v2, %v959_v6 }
 0x378   :  { %v1221_v33 = vadd.f32 %v1220_v50, %v1219_v48  ;;  %v953_v18 = vpop.permute.xlu1 %952  ;;  %v1243_v45 = vsel %vm234_vm15, %v1241_v41, 0.0  ;;  %v1359_v48 = vld [vmem:[%s4794_s12] sm:$0xff] }
 0x379   :  { %v1227_v61 = vmul.f32 %v1225_v32, %v953_v18  ;;  %1384 = vmatpush.msrb.mxu2 %v1359_v48 }
 0x37a   :  { %v1267_v42 = vsel %vm1257_vm2, %v1266_v54, %v1221_v33 }
 0x37b   :  { %v1229_v28 = vsel %vm234_vm15, %v1227_v61, 0.0  ;;  %3002 = vmatpush.msk.msra.mxu2 %vm151_vm9, %v3000_v5 }
 0x37c   :  { %v1230_v51 = vadd.f32 %v1229_v28, %v1228_v36 }
 0x37e   :  { %v1231_v20 = vrot.slane %v1230_v51, 4 }
 0x380   :  { %v1232_v24 = vadd.f32 %v1231_v20, %v1230_v51  ;;  %v965_v37 = vpop.permute.xlu1 %964 }
 0x381   :  { %v1242_v13 = vmul.f32 %v1240_v63, %v965_v37 }
 0x382   :  { %v1233_v4 = vrot.slane %v1232_v24, 2 }
 0x383   :  { %v1244_v14 = vsel %vm234_vm15, %v1242_v13, 0.0 }
 0x384   :  { %v1234_v38 = vadd.f32 %v1233_v4, %v1232_v24  ;;  %v1245_v29 = vadd.f32 %v1244_v14, %v1243_v45 }
 0x386   :  { %v1235_v12 = vrot.slane %v1234_v38, 1  ;;  %v1246_v30 = vrot.slane %v1245_v29, 4 }
 0x388   :  { %v1236_v43 = vadd.f32 %v1235_v12, %v1234_v38  ;;  %v1247_v44 = vadd.f32 %v1246_v30, %v1245_v29 }
 0x38a   :  { %v1248_v49 = vrot.slane %v1247_v44, 2  ;;  %v1268_v39 = vsel %vm1259_vm3, %v1267_v42, %v1236_v43 }
 0x38c   :  { %v1249_v23 = vadd.f32 %v1248_v49, %v1247_v44 }
 0x38e   :  { %v1250_v6 = vrot.slane %v1249_v23, 1 }
 0x390   :  { %v1251_v46 = vadd.f32 %v1250_v6, %v1249_v23 }
 0x392   :  { %v1269_v26 = vsel %vm1261_vm4, %v1268_v39, %v1251_v46 }
 0x393   :  { %v1271_v59 = vadd.f32 %v1269_v26, %v1011_v58 }
 0x395   :  { %v1281_v8 = vmul.f32 %v1277_v55, %v1271_v59 }
 0x397   :  { %2976 = vmatmul.msk.f32.gmra.mxu3 %vm234_vm15, %v1281_v8  ;;  %v1445_v8 = vld [vmem:[%s4795_s13 + $0x18] sm:$0xff] }
 0x398   :  { %1464 = vmatpush.msra.mxu0 %v1445_v8  ;;  %v2997_v8 = vld [vmem:[%s4787_s5 + $0x78] sm:$0xff] }
 0x399   :  { %1660 = vmatpush.msrb.mxu3 %v2997_v8 }
 0x3f5   :  { %v1313_v3 = vpop.f32.mrf.mxu3 }
 0x3f6   :  { %v4054_v0 = vadd.f32 %v3356_v15, %v1313_v3  ;;  %v1444_v3 = vld [vmem:[%s4795_s13 + $0x10] sm:$0xff] }
 0x3f7   :  { %1465 = vmatpush.msra.mxu0 %v1444_v3  ;;  %v2996_v3 = vld [vmem:[%s4787_s5 + $0x70] sm:$0xff] }
 0x3f8   :  { %v1320_v60 = vmul.f32 %v4054_v0, %v4054_v0  ;;  %1661 = vmatpush.msrb.mxu3 %v2996_v3 }
 0x3fa   :  { %v1322_v22 = vsel %vm4800_vm0, %v1320_v60, 0.0  ;;  %v1443_v60 = vld [vmem:[%s4795_s13 + $0x8] sm:$0xff] }
 0x3fb   :  { %1323 = vadd.xlane.f32.xlu1 %v1322_v22  ;;  %1466 = vmatpush.msra.mxu0 %v1443_v60  ;;  %v4153_v60 = vld [vmem:[%s4788_s3 + $0x4] sm:$0xf] }
 0x41a   :  { %v1316_v56 = vpop.f32.mrf.mxu3 }
 0x41b   :  { %v4062_v57 = vadd.f32 %v3357_v52, %v1316_v56 }
 0x41d   :  { %v1321_v21 = vmul.f32 %v4062_v57, %v4062_v57 }
 0x41f   :  { %v1325_v54 = vsel %vm4800_vm0, %v1321_v21, 0.0 }
 0x420   :  { %1326 = vadd.xlane.f32.xlu2 %v1325_v54 }
 0x46e   :  { %v1324_v34 = vpop.xlane.xlu1 %1323 }
 0x46f   :  { %v1328_v50 = vmul.f32 %v1324_v34, %v3466_v16 }
 0x471   :  { %v1330_v53 = vadd.f32 1e-05, %v1328_v50 }
 0x473   :  { %3232 = vrsqrt.f32 %v1330_v53  ;;  %vm1338_vm14 = vweird.f32 %v1330_v53 }
 0x479   :  { %v3233_v17 = vpop.eup %3232 }
 0x47a   :  { %v1333_v32 = vmul.f32 %v3233_v17, %v1330_v53  ;;  %vm1339_vm13 = vweird.f32 %v3233_v17 }
 0x47b   :  { %vm1340_vm6 = vmor %vm1338_vm14, %vm1339_vm13 }
 0x47c   :  { %v1334_v33 = vmul.f32 %v3233_v17, %v1333_v32 }
 0x47e   :  { %v1335_v18 = vmul.f32 0.5, %v1334_v33 }
 0x480   :  { %v1336_v19 = vsub.f32 1.5, %v1335_v18 }
 0x482   :  { %v1337_v61 = vmul.f32 %v3233_v17, %v1336_v19 }
 0x484   :  { %v1341_v42 = vsel %vm1340_vm6, %v3233_v17, %v1337_v61  ;;  %v1442_v17 = vld [vmem:[%s4795_s13] sm:$0xff] }
 0x485   :  { %v1352_v9 = vmul.f32 %v1341_v42, %v4054_v0  ;;  %1467 = vmatpush.msra.mxu0 %v1442_v17 }
 0x487   :  { %v1357_v25 = vmul.f32 %v3129_v27, %v1352_v9 }
 0x489   :  { %2977 = vmatmul.msk.f32.vlgmr.msrb.gmra.mxu2 %vm4800_vm0, %v1357_v25 }
 0x493   :  { %v1327_v36 = vpop.xlane.xlu2 %1326 }
 0x494   :  { %v1329_v28 = vmul.f32 %v1327_v36, %v3466_v16 }
 0x496   :  { %v1331_v35 = vadd.f32 1e-05, %v1329_v28 }
 0x498   :  { %3234 = vrsqrt.f32 %v1331_v35  ;;  %vm1348_vm11 = vweird.f32 %v1331_v35 }
 0x49e   :  { %v3235_v51 = vpop.eup %3234 }
 0x49f   :  { %v1343_v2 = vmul.f32 %v3235_v51, %v1331_v35  ;;  %vm1349_vm7 = vweird.f32 %v3235_v51 }
 0x4a0   :  { %vm1350_vm12 = vmor %vm1348_vm11, %vm1349_vm7 }
 0x4a1   :  { %v1344_v40 = vmul.f32 %v3235_v51, %v1343_v2  ;;  %v2982_v2 = vld [vmem:[%s4784_s2 + $0x20] sm:$0xff] }
 0x4a3   :  { %v1345_v20 = vmul.f32 0.5, %v1344_v40 }
 0x4a5   :  { %v1346_v41 = vsub.f32 1.5, %v1345_v20 }
 0x4a7   :  { %v1347_v63 = vmul.f32 %v3235_v51, %v1346_v41 }
 0x4a9   :  { %v1351_v24 = vsel %vm1350_vm12, %v3235_v51, %v1347_v63  ;;  %v2984_v51 = vld [vmem:[%s4784_s2 + $0x30] sm:$0xff] }
 0x4aa   :  { %v1353_v37 = vmul.f32 %v1351_v24, %v4062_v57 }
 0x4ac   :  { %v1358_v13 = vmul.f32 %v3129_v27, %v1353_v37 }
 0x4ae   :  { %2978 = vmatmul.msk.f32.gmra.mxu2 %vm4800_vm0, %v1358_v13 }
 0x50c   :  { %v1386_v4 = vpop.f32.mrf.mxu2 }
 0x50d   :  { %v1392_v45 = vsub.f32 0.0, %v1386_v4 }
 0x50f   :  { %v1394_v14 = vmul.f32 1.442695, %v1392_v45 }
 0x511   :  { %3236 = vpow2.f32 %v1394_v14  ;;  %v3124_v14 = vld [vmem:[%s4783_s1 + $0x1] ss:$0 sm:$0xff] }
 0x517   :  { %v3237_v38 = vpop.eup %3236 }
 0x518   :  { %v1398_v29 = vadd.f32 1.0, %v3237_v38 }
 0x51a   :  { %3238 = vrcp.f32 %v1398_v29  ;;  %v1411_v44 = vand.u32 2147483648, %v1398_v29  ;;  %v1409_v39 = vand.u32 2147483647, %v1398_v29  ;;  %vm1405_vm14 = vweird.f32 %v1398_v29 }
 0x51c   :  { %v1412_v6 = vor.u32 1.1754944e-38, %v1411_v44  ;;  %vm1410_vm7 = vcmp.eq.f32.partialorder %v1409_v39, 8.507059e+37 }
 0x520   :  { %v3239_v12 = vpop.eup %3238 }
 0x521   :  { %v1401_v30 = vmul.f32 %v3239_v12, %v1398_v29  ;;  %vm1406_vm13 = vweird.f32 %v3239_v12 }
 0x522   :  { %vm1407_vm6 = vmor %vm1405_vm14, %vm1406_vm13 }
 0x523   :  { %v1402_v43 = vsub.f32 1.0, %v1401_v30 }
 0x525   :  { %v1403_v49 = vmul.f32 %v3239_v12, %v1402_v43 }
 0x527   :  { %v1404_v23 = vadd.f32 %v3239_v12, %v1403_v49 }
 0x529   :  { %v1408_v46 = vsel %vm1407_vm6, %v3239_v12, %v1404_v23 }
 0x52a   :  { %v1413_v58 = vsel %vm1410_vm7, %v1412_v6, %v1408_v46 }
 0x52b   :  { %v1430_v26 = vmul.f32 %v1413_v58, %v1386_v4 }
 0x52d   :  { %1434 = vrot.lane.b32.xlu0 %v1430_v26, %s3360_s29 }
 0x531   :  { %v1389_v59 = vpop.f32.mrf.mxu2 }
 0x532   :  { %v1393_v55 = vsub.f32 0.0, %v1389_v59 }
 0x534   :  { %v1396_v15 = vmul.f32 1.442695, %v1393_v55 }
 0x536   :  { %3240 = vpow2.f32 %v1396_v15  ;;  %v2995_v15 = vld [vmem:[%s4787_s5 + $0x68] sm:$0xff] }
 0x537   :  { %1662 = vmatpush.msrb.mxu3 %v2995_v15 }
 0x53c   :  { %v3241_v22 = vpop.eup %3240 }
 0x53d   :  { %v1399_v56 = vadd.f32 1.0, %v3241_v22 }
 0x53f   :  { %3242 = vrcp.f32 %v1399_v56  ;;  %v1426_v47 = vand.u32 2147483648, %v1399_v56  ;;  %v1424_v11 = vand.u32 2147483647, %v1399_v56  ;;  %vm1420_vm12 = vweird.f32 %v1399_v56 }
 0x541   :  { %v1427_v5 = vor.u32 1.1754944e-38, %v1426_v47  ;;  %vm1425_vm14 = vcmp.eq.f32.partialorder %v1424_v11, 8.507059e+37 }
 0x545   :  { %v3243_v52 = vpop.eup %3242 }
 0x546   :  { %v1416_v21 = vmul.f32 %v3243_v52, %v1399_v56  ;;  %vm1421_vm11 = vweird.f32 %v3243_v52  ;;  %v1552_v56 = vperm.slane %v4153_v60, 3 }
 0x547   :  { %vm1422_vm13 = vmor %vm1420_vm12, %vm1421_vm11 }
 0x548   :  { %v1417_v54 = vsub.f32 1.0, %v1416_v21 }
 0x54a   :  { %v1418_v10 = vmul.f32 %v3243_v52, %v1417_v54 }
 0x54c   :  { %v1419_v48 = vadd.f32 %v3243_v52, %v1418_v10  ;;  %v1564_v10 = vperm.slane %v4153_v60, 1 }
 0x54e   :  { %v1423_v34 = vsel %vm1422_vm13, %v3243_v52, %v1419_v48  ;;  %v1558_v52 = vperm.slane %v4153_v60, 2 }
 0x54f   :  { %v1428_v50 = vsel %vm1425_vm14, %v1427_v5, %v1423_v34 }
 0x550   :  { %v1431_v53 = vmul.f32 %v1428_v50, %v1389_v59  ;;  %v1570_v50 = vperm.slane %v4153_v60, 0 }
 0x552   :  { %1436 = vrot.lane.b32.xlu0 %v1431_v53, %s3360_s29 }
 0x59f   :  { %v1435_v32 = vpop.permute.xlu0 %1434 }
 0x5a0   :  { %v1440_v33 = vmul.f32 %v1435_v32, %v1386_v4 }
 0x5a2   :  { %2979 = vmatmul.msk.f32.vlgmr.msra.gmra.mxu0 %vm4800_vm0, %v1440_v33  ;;  %v3126_v33 = vld [vmem:[%s4785_s4 + $0x1] ss:$0 sm:$0xff] }
 0x5c4   :  { %v1437_v18 = vpop.permute.xlu0 %1436 }
 0x5c5   :  { %v1441_v19 = vmul.f32 %v1437_v18, %v1389_v59 }
 0x5c7   :  { %2980 = vmatmul.msk.f32.gmra.mxu0 %vm4800_vm0, %v1441_v19 }
 0x61f   :  { %v1469_v61 = vpop.f32.mrf.mxu0 }
 0x620   :  { %v4109_v27 = vadd.f32 %v1469_v61, %v4054_v0  ;;  %v2985_v0 = vld [vmem:[%s4784_s2 + $0x38] sm:$0xff] }
 0x621   :  { %1539 = vmatpush.msrb.mxu1 %v2985_v0  ;;  %v2992_v0 = vld [vmem:[%s4787_s5 + $0x50] sm:$0xff] }
 0x622   :  { %v1477_v42 = vmul.f32 %v4109_v27, %v4109_v27 }
 0x623   :  { %1540 = vmatpush.msrb.mxu1 %v2984_v51 }
 0x624   :  { %v1479_v9 = vsel %vm4800_vm0, %v1477_v42, 0.0 }
 0x625   :  { %1480 = vadd.xlane.f32.xlu0 %v1479_v9 }
 0x644   :  { %v1472_v25 = vpop.f32.mrf.mxu0 }
 0x645   :  { %v4115_v36 = vadd.f32 %v1472_v25, %v4062_v57  ;;  %v2983_v57 = vld [vmem:[%s4784_s2 + $0x28] sm:$0xff] }
 0x646   :  { %1541 = vmatpush.msrb.mxu1 %v2983_v57  ;;  %v2991_v57 = vld [vmem:[%s4787_s5 + $0x48] sm:$0xff] }
 0x647   :  { %v1478_v28 = vmul.f32 %v4115_v36, %v4115_v36 }
 0x648   :  { %1542 = vmatpush.msrb.mxu1 %v2982_v2 }
 0x649   :  { %v1482_v35 = vsel %vm4800_vm0, %v1478_v28, 0.0  ;;  %v2994_v28 = vld [vmem:[%s4787_s5 + $0x60] sm:$0xff] }
 0x64a   :  { %1483 = vadd.xlane.f32.xlu2 %v1482_v35  ;;  %v2993_v35 = vld [vmem:[%s4787_s5 + $0x58] sm:$0xff]  ;;  %1663 = vmatpush.msrb.mxu3 %v2994_v28 }
 0x64c   :  { %1664 = vmatpush.msrb.mxu3 %v2993_v35 }
 0x64e   :  { %1665 = vmatpush.msrb.mxu3 %v2992_v0 }
 0x650   :  { %1666 = vmatpush.msrb.mxu3 %v2991_v57 }
 0x698   :  { %v1481_v40 = vpop.xlane.xlu0 %1480 }
 0x699   :  { %v1485_v20 = vmul.f32 %v1481_v40, %v3466_v16  ;;  %v2990_v40 = vld [vmem:[%s4787_s5 + $0x40] sm:$0xff] }
 0x69a   :  { %1667 = vmatpush.msrb.mxu3 %v2990_v40 }
 0x69b   :  { %v1487_v41 = vadd.f32 1e-05, %v1485_v20 }
 0x69d   :  { %3244 = vrsqrt.f32 %v1487_v41  ;;  %vm1495_vm7 = vweird.f32 %v1487_v41 }
 0x6a3   :  { %v3245_v63 = vpop.eup %3244 }
 0x6a4   :  { %v1490_v24 = vmul.f32 %v3245_v63, %v1487_v41  ;;  %vm1496_vm6 = vweird.f32 %v3245_v63 }
 0x6a5   :  { %vm1497_vm11 = vmor %vm1495_vm7, %vm1496_vm6 }
 0x6a6   :  { %v1491_v37 = vmul.f32 %v3245_v63, %v1490_v24 }
 0x6a8   :  { %v1492_v13 = vmul.f32 0.5, %v1491_v37 }
 0x6aa   :  { %v1493_v4 = vsub.f32 1.5, %v1492_v13 }
 0x6ac   :  { %v1494_v45 = vmul.f32 %v3245_v63, %v1493_v4 }
 0x6ae   :  { %v1498_v38 = vsel %vm1497_vm11, %v3245_v63, %v1494_v45 }
 0x6af   :  { %v1509_v29 = vmul.f32 %v1498_v38, %v4109_v27 }
 0x6b1   :  { %v1514_v12 = vmul.f32 %v3124_v14, %v1509_v29 }
 0x6b3   :  { %2986 = vmatmul.msk.f32.vlgmr.msrb.gmra.mxu1 %vm4800_vm0, %v1514_v12 }
 0x6bd   :  { %v1484_v30 = vpop.xlane.xlu2 %1483 }
 0x6be   :  { %v1486_v43 = vmul.f32 %v1484_v30, %v3466_v16 }
 0x6c0   :  { %v1488_v44 = vadd.f32 1e-05, %v1486_v43 }
 0x6c2   :  { %3246 = vrsqrt.f32 %v1488_v44  ;;  %vm1505_vm13 = vweird.f32 %v1488_v44 }
 0x6c8   :  { %v3247_v49 = vpop.eup %3246 }
 0x6c9   :  { %v1500_v39 = vmul.f32 %v3247_v49, %v1488_v44  ;;  %vm1506_vm12 = vweird.f32 %v3247_v49 }
 0x6ca   :  { %vm1507_vm14 = vmor %vm1505_vm13, %vm1506_vm12 }
 0x6cb   :  { %v1501_v23 = vmul.f32 %v3247_v49, %v1500_v39 }
 0x6cd   :  { %v1502_v6 = vmul.f32 0.5, %v1501_v23 }
 0x6cf   :  { %v1503_v46 = vsub.f32 1.5, %v1502_v6 }
 0x6d1   :  { %v1504_v58 = vmul.f32 %v3247_v49, %v1503_v46 }
 0x6d3   :  { %v1508_v26 = vsel %vm1507_vm14, %v3247_v49, %v1504_v58 }
 0x6d4   :  { %v1510_v59 = vmul.f32 %v1508_v26, %v4115_v36 }
 0x6d6   :  { %v1515_v55 = vmul.f32 %v3124_v14, %v1510_v59 }
 0x6d8   :  { %2987 = vmatmul.msk.f32.gmra.mxu1 %vm4800_vm0, %v1515_v55 }
 0x730   :  { %v4155_v22 = vpop.f32.mrf.mxu1 }
 0x731   :  { %v1555_v21 = vrot.slane %v4155_v22, 7  ;;  %v1561_v54 = vrot.slane %v4155_v22, 6  ;;  %v1567_v47 = vrot.slane %v4155_v22, 5  ;;  %v1553_v5 = vmul.f32 %v1552_v56, %v4155_v22 }
 0x733   :  { %v1557_v11 = vsel %vm144_vm8, 0.0, %v1555_v21  ;;  %v1563_v48 = vsel %vm151_vm9, 0.0, %v1561_v54  ;;  %v1569_v53 = vsel %vm158_vm10, 0.0, %v1567_v47 }
 0x734   :  { %v1559_v34 = vmul.f32 %v1558_v52, %v1557_v11  ;;  %v1565_v32 = vmul.f32 %v1564_v10, %v1563_v48  ;;  %v1571_v19 = vmul.f32 %v1570_v50, %v1569_v53 }
 0x736   :  { %v1560_v17 = vadd.f32 %v1559_v34, %v1553_v5 }
 0x738   :  { %v1566_v18 = vadd.f32 %v1565_v32, %v1560_v17 }
 0x73a   :  { %v1572_v61 = vadd.f32 %v1571_v19, %v1566_v18 }
 0x73c   :  { %v1595_v42 = vadd.f32 %v3126_v33, %v1572_v61 }
 0x73e   :  { %v1597_v9 = vsub.f32 0.0, %v1595_v42 }
 0x740   :  { %v1599_v25 = vmul.f32 1.442695, %v1597_v9 }
 0x742   :  { %3248 = vpow2.f32 %v1599_v25 }
 0x748   :  { %v3249_v51 = vpop.eup %3248 }
 0x749   :  { %v1603_v2 = vadd.f32 1.0, %v3249_v51 }
 0x74b   :  { %3250 = vrcp.f32 %v1603_v2  ;;  %v1616_v45 = vand.u32 2147483648, %v1603_v2  ;;  %v1614_v38 = vand.u32 2147483647, %v1603_v2  ;;  %vm1610_vm7 = vweird.f32 %v1603_v2 }
 0x74d   :  { %v1617_v49 = vor.u32 1.1754944e-38, %v1616_v45  ;;  %vm1615_vm12 = vcmp.eq.f32.partialorder %v1614_v38, 8.507059e+37 }
 0x751   :  { %v3251_v20 = vpop.eup %3250 }
 0x752   :  { %v1606_v41 = vmul.f32 %v3251_v20, %v1603_v2  ;;  %vm1611_vm6 = vweird.f32 %v3251_v20 }
 0x753   :  { %vm1612_vm11 = vmor %vm1610_vm7, %vm1611_vm6 }
 0x754   :  { %v1607_v63 = vsub.f32 1.0, %v1606_v41 }
 0x755   :  { %v4186_v24 = vpop.f32.mrf.mxu1 }
 0x756   :  { %v1575_v37 = vrot.slane %v4186_v24, 7  ;;  %v1580_v13 = vrot.slane %v4186_v24, 6  ;;  %v1585_v4 = vrot.slane %v4186_v24, 5  ;;  %v1608_v14 = vmul.f32 %v3251_v20, %v1607_v63 }
 0x757   :  { %v1573_v30 = vmul.f32 %v1552_v56, %v4186_v24 }
 0x758   :  { %v1577_v29 = vsel %vm144_vm8, 0.0, %v1575_v37  ;;  %v1582_v12 = vsel %vm151_vm9, 0.0, %v1580_v13  ;;  %v1609_v43 = vadd.f32 %v3251_v20, %v1608_v14  ;;  %v1587_v39 = vsel %vm158_vm10, 0.0, %v1585_v4  ;;  %v4279_v37 = vld [vmem:[%s4790_s7 + $0x1] ss:$0 sm:$0xff] }
 0x759   :  { %v1578_v44 = vmul.f32 %v1577_v29, %v1558_v52  ;;  %v1583_v46 = vmul.f32 %v1582_v12, %v1564_v10  ;;  %v1588_v55 = vmul.f32 %v1587_v39, %v1570_v50  ;;  %v3006_v12 = vld [vmem:[%s4791_s8 + $0x18] sm:$0xff] }
 0x75a   :  { %v1613_v23 = vsel %vm1612_vm11, %v3251_v20, %v1609_v43 }
 0x75b   :  { %v1579_v6 = vadd.f32 %v1578_v44, %v1573_v30  ;;  %v1618_v58 = vsel %vm1615_vm12, %v1617_v49, %v1613_v23  ;;  %v1719_v44 = vmul.f32 1.442695, %v3006_v12 }
 0x75c   :  { %v4195_v26 = vmul.f32 %v1618_v58, %v1595_v42 }
 0x75d   :  { %v1584_v59 = vadd.f32 %v1583_v46, %v1579_v6  ;;  %v3005_v6 = vld [vmem:[%s4791_s8 + $0x10] sm:$0xff] }
 0x75e   :  { %2998 = vmatmul.msk.f32.vlgmr.msrb.gmra.mxu3 %vm234_vm15, %v4195_v26  ;;  %v1717_v58 = vmul.f32 1.442695, %v3005_v6 }
 0x75f   :  { %v1589_v8 = vadd.f32 %v1588_v55, %v1584_v59 }
 0x761   :  { %v1596_v3 = vadd.f32 %v3126_v33, %v1589_v8 }
 0x763   :  { %v1598_v15 = vsub.f32 0.0, %v1596_v3 }
 0x765   :  { %v1601_v60 = vmul.f32 1.442695, %v1598_v15 }
 0x767   :  { %3252 = vpow2.f32 %v1601_v60 }
 0x76d   :  { %v3253_v56 = vpop.eup %3252 }
 0x76e   :  { %v1604_v52 = vadd.f32 1.0, %v3253_v56 }
 0x770   :  { %3254 = vrcp.f32 %v1604_v52  ;;  %v1631_v10 = vand.u32 2147483648, %v1604_v52  ;;  %v1629_v48 = vand.u32 2147483647, %v1604_v52  ;;  %vm1625_vm14 = vweird.f32 %v1604_v52 }
 0x772   :  { %v1632_v34 = vor.u32 1.1754944e-38, %v1631_v10  ;;  %vm1630_vm7 = vcmp.eq.f32.partialorder %v1629_v48, 8.507059e+37 }
 0x776   :  { %v3255_v21 = vpop.eup %3254 }
 0x777   :  { %v1621_v54 = vmul.f32 %v3255_v21, %v1604_v52  ;;  %vm1626_vm13 = vweird.f32 %v3255_v21 }
 0x778   :  { %vm1627_vm6 = vmor %vm1625_vm14, %vm1626_vm13 }
 0x779   :  { %v1622_v47 = vsub.f32 1.0, %v1621_v54 }
 0x77b   :  { %v1623_v11 = vmul.f32 %v3255_v21, %v1622_v47 }
 0x77d   :  { %v1624_v5 = vadd.f32 %v3255_v21, %v1623_v11 }
 0x77f   :  { %v1628_v50 = vsel %vm1627_vm6, %v3255_v21, %v1624_v5 }
 0x780   :  { %v1633_v53 = vsel %vm1630_vm7, %v1632_v34, %v1628_v50 }
 0x781   :  { %v4199_v17 = vmul.f32 %v1633_v53, %v1596_v3 }
 0x783   :  { %2999 = vmatmul.msk.f32.gmra.mxu3 %vm234_vm15, %v4199_v17 }
 0x7e1   :  { %v1669_v32 = vpop.f32.mrf.mxu3 }
 0x7e2   :  { %3003 = vmatmul.msk.f32.vlgmr.msra.gmra.mxu2 %vm269_vm5, %v1669_v32  ;;  %v1928_v33 = vperm.slane %v1669_v32, 1  ;;  %v1915_v18 = vperm.slane %v1669_v32, 0  ;;  %v4207_v19 = vperm.slane %v1669_v32, 4  ;;  %v1941_v61 = vperm.slane %v1669_v32, 2 }
 0x7e3   :  { %v4210_v42 = vperm.slane %v1669_v32, 3  ;;  %v4220_v25 = vperm.slane %v1669_v32, 5  ;;  %v4234_v35 = vperm.slane %v1669_v32, 6  ;;  %v4256_v2 = vperm.slane %v1669_v32, 7 }
 0x7e4   :  { %1933 = vperm.xlu0 %3082, %v1928_v33   ;;  %1926 = vperm.xlu2 %3081, %v1915_v18  }
 0x7e5   :  { %1920 = vperm.xlu1 %3080, %v1915_v18  }
 0x7ec   :  { %3085 = vset.pattern.permute.xlu0 %v3546_v62  ;;  %3084 = vset.pattern.permute.xlu2 %v3526_v31 }
 0x7ed   :  { %3083 = vset.pattern.permute.xlu1 %v3546_v62 }
 0x7f4   :  { %1978 = vperm.xlu0 %3085, %v4207_v19   ;;  %1946 = vperm.xlu2 %3084, %v1941_v61  }
 0x7f5   :  { %1939 = vperm.xlu1 %3083, %v1928_v33  }
 0x7fc   :  { %3092 = vset.pattern.permute.xlu0 %v3570_v7  ;;  %1959 = vperm.xlu2 %3084, %v4210_v42  }
 0x7fd   :  { %1952 = vperm.xlu1 %3083, %v1941_v61  }
 0x804   :  { %2215 = vperm.xlu0 %3092, %v1941_v61   ;;  %1972 = vperm.xlu2 %3084, %v4207_v19  }
 0x805   :  { %1965 = vperm.xlu1 %3083, %v4210_v42  }
 0x806   :  { %v4216_v9 = vpop.f32.mrf.mxu3 }
 0x807   :  { %3004 = vmatmul.msk.f32.gmra.mxu2 %vm269_vm5, %v4216_v9  ;;  %v4229_v28 = vperm.slane %v4216_v9, 3  ;;  %v4240_v0 = vperm.slane %v4216_v9, 4  ;;  %v4246_v51 = vperm.slane %v4216_v9, 5  ;;  %v4250_v57 = vperm.slane %v4216_v9, 6 }
 0x808   :  { %v4259_v40 = vperm.slane %v4216_v9, 1  ;;  %v4269_v41 = vperm.slane %v4216_v9, 7 }
 0x80c   :  { %2251 = vperm.xlu0 %3092, %v4220_v25   ;;  %3087 = vset.pattern.permute.xlu2 %v3546_v62 }
 0x80d   :  { %3086 = vset.pattern.permute.xlu1 %v3526_v31 }
 0x814   :  { %3106 = vset.pattern.permute.xlu0 %v3526_v31  ;;  %1991 = vperm.xlu2 %3087, %v4220_v25  }
 0x815   :  { %1985 = vperm.xlu1 %3086, %v4220_v25  }
 0x81c   :  { %3088 = vset.pattern.permute.xlu2 %v3526_v31  ;;  %2063 = vperm.xlu0 %3106, %v4229_v28  }
 0x81d   :  { %3089 = vset.pattern.permute.xlu1 %v3546_v62 }
 0x824   :  { %1998 = vperm.xlu2 %3088, %v4234_v35   ;;  %3109 = vset.pattern.permute.xlu0 %v3546_v62 }
 0x825   :  { %2004 = vperm.xlu1 %3089, %v4234_v35  }
 0x82c   :  { %3091 = vset.pattern.permute.xlu2 %v3558_v1  ;;  %2082 = vperm.xlu0 %3109, %v4240_v0  }
 0x82d   :  { %3090 = vset.pattern.permute.xlu1 %v3570_v7 }
 0x834   :  { %2197 = vperm.xlu2 %3091, %v1915_v18   ;;  %2095 = vperm.xlu0 %3109, %v4246_v51  }
 0x835   :  { %2191 = vperm.xlu1 %3090, %v1915_v18  }
 0x83c   :  { %2209 = vperm.xlu2 %3091, %v1928_v33   ;;  %2108 = vperm.xlu0 %3109, %v4250_v57  }
 0x83d   :  { %2203 = vperm.xlu1 %3090, %v1928_v33  }
 0x83e   :  { %v4266_v20 = vpop.permute.xlu2 %1926 }
 0x844   :  { %3094 = vset.pattern.permute.xlu2 %v3526_v31  ;;  %3112 = vset.pattern.permute.xlu0 %v3570_v7 }
 0x845   :  { %3093 = vset.pattern.permute.xlu1 %v3558_v1 }
 0x84c   :  { %2011 = vperm.xlu2 %3094, %v4256_v2   ;;  %2299 = vperm.xlu0 %3112, %v4259_v40  }
 0x84d   :  { %2221 = vperm.xlu1 %3093, %v1941_v61  }
 0x84e   :  { %v4274_v63 = vpop.permute.xlu2 %1946 }
 0x854   :  { %3097 = vset.pattern.permute.xlu2 %v3558_v1  ;;  %3116 = vset.pattern.permute.xlu0 %v3546_v62 }
 0x855   :  { %3095 = vset.pattern.permute.xlu1 %v3546_v62 }
 0x856   :  { %v4285_v38 = vpop.permute.xlu2 %1959 }
 0x857   :  { %v4293_v30 = vpop.permute.xlu1 %1920 }
 0x85c   :  { %2233 = vperm.xlu2 %3097, %v4210_v42   ;;  %2121 = vperm.xlu0 %3116, %v4269_v41  }
 0x85d   :  { %2017 = vperm.xlu1 %3095, %v4256_v2  }
 0x85e   :  { %v4298_v39 = vpop.permute.xlu2 %1972 }
 0x864   :  { %2245 = vperm.xlu2 %3097, %v4207_v19   ;;  %3119 = vset.pattern.permute.xlu0 %v3570_v7 }
 0x865   :  { %3096 = vset.pattern.permute.xlu1 %v3570_v7  ;;  %v1708_v13 = vpop.f32.mrf.mxu2 }
 0x866   :  { %v1709_v4 = vadd.f32 %v4279_v37, %v1708_v13 }
 0x867   :  { %v4303_v55 = vpop.permute.xlu1 %1939 }
 0x868   :  { %v1725_v45 = vand.u32 2147483647, %v1709_v4  ;;  %v1723_v52 = vmax.f32 %v1709_v4, 0.0 }
 0x86a   :  { %v1727_v14 = vsub.f32 0.0, %v1725_v45 }
 0x86c   :  { %v1729_v29 = vmul.f32 1.442695, %v1727_v14  ;;  %3099 = vset.pattern.permute.xlu2 %v3570_v7  ;;  %2347 = vperm.xlu0 %3119, %v4246_v51  }
 0x86d   :  { %2227 = vperm.xlu1 %3096, %v4210_v42  }
 0x86e   :  { %3256 = vpow2.f32 %v1729_v29  ;;  %v4308_v56 = vpop.permute.xlu2 %1991 }
 0x86f   :  { %v4319_v53 = vpop.permute.xlu1 %1952 }
 0x874   :  { %v3257_v43 = vpop.eup %3256  ;;  %2263 = vperm.xlu2 %3099, %v4234_v35   ;;  %3122 = vset.pattern.permute.xlu0 %v3558_v1 }
 0x875   :  { %v1733_v49 = vadd.f32 1.0, %v3257_v43  ;;  %2239 = vperm.xlu1 %3096, %v4207_v19   ;;  %v1736_v23 = vmul.f32 -0.5, %v3257_v43  ;;  %v1739_v59 = vand.u32 2147483647, %v3257_v43 }
 0x877   :  { %3258 = vlog2.f32 %v1733_v49  ;;  %v1737_v46 = vadd.f32 1.0, %v1736_v23  ;;  %vm1740_vm5 = vcmp.lt.f32.partialorder %v1739_v59, 0.0004427343 }
 0x878   :  { %3260 = vpow2.f32 %v1719_v44 }
 0x879   :  { %v1738_v60 = vmul.f32 %v3257_v43, %v1737_v46  ;;  %3262 = vpow2.f32 %v1717_v58 }
 0x87c   :  { %3101 = vset.pattern.permute.xlu2 %v3558_v1  ;;  %2377 = vperm.xlu0 %3122, %v4269_v41  }
 0x87d   :  { %v3259_v8 = vpop.eup %3258  ;;  %3098 = vset.pattern.permute.xlu1 %v3558_v1 }
 0x87e   :  { %v3261_v3 = vpop.eup %3260  ;;  %v1735_v15 = vmul.f32 0.6931472, %v3259_v8  ;;  %v4322_v33 = vpop.permute.xlu2 %1998 }
 0x87f   :  { %v4312_v47 = vsub.f32 0.0, %v3261_v3  ;;  %v3263_v5 = vpop.eup %3262 }
 0x880   :  { %v1741_v21 = vsel %vm1740_vm5, %v1738_v60, %v1735_v15  ;;  %v4325_v61 = vsub.f32 0.0, %v3263_v5  ;;  %v1966_v15 = vpop.permute.xlu1 %1965 }
 0x881   :  { %v4310_v54 = vadd.f32 %v1741_v21, %v1723_v52 }
 0x883   :  { %v1755_v10 = vrot.slane %v4310_v54, 1  ;;  %v1769_v11 = vperm.slane %v4310_v54, 0  ;;  %v1756_v48 = vrot.slane %v4310_v54, 2  ;;  %v1757_v42 = vrot.slane %v4310_v54, 3 }
 0x884   :  { %2281 = vperm.xlu2 %3101, %v4256_v2   ;;  %v4330_v13 = vmul.f32 %v4310_v54, %v4195_v26  ;;  %v1759_v60 = vrot.slane %v4310_v54, 5  ;;  %v1760_v5 = vrot.slane %v4310_v54, 6 }
 0x885   :  { %v1770_v34 = vperm.slane %v1755_v10, 0  ;;  %v1802_v50 = vmul.f32 %v1769_v11, %v4312_v47  ;;  %2257 = vperm.xlu1 %3098, %v4220_v25   ;;  %v1771_v32 = vperm.slane %v1756_v48, 0  ;;  %v1758_v25 = vrot.slane %v4310_v54, 4 }
 0x886   :  { %v1772_v14 = vperm.slane %v1757_v42, 0  ;;  %v1801_v29 = vmul.f32 %v1769_v11, %v4325_v61  ;;  %v1901_v12 = vrot.slane %v4330_v13, 1  ;;  %v2123_v43 = vperm.slane %v4330_v13, 0 }
 0x887   :  { %v1804_v18 = vmul.f32 %v1770_v34, %v4312_v47  ;;  %v1835_v19 = vmul.f32 1.442695, %v1802_v50  ;;  %v1806_v45 = vmul.f32 %v1771_v32, %v4312_v47  ;;  %v1803_v44 = vmul.f32 %v1770_v34, %v4325_v61 }
 0x888   :  { %v1833_v23 = vmul.f32 1.442695, %v1801_v29  ;;  %v1773_v6 = vperm.slane %v1758_v25, 0  ;;  %v1808_v46 = vmul.f32 %v1772_v14, %v4312_v47  ;;  %v1805_v8 = vmul.f32 %v1771_v32, %v4325_v61 }
 0x889   :  { %3264 = vpow2.f32 %v1835_v19  ;;  %v1839_v4 = vmul.f32 1.442695, %v1804_v18  ;;  %v1843_v49 = vmul.f32 1.442695, %v1806_v45  ;;  %v1837_v3 = vmul.f32 1.442695, %v1803_v44 }
 0x88a   :  { %v2124_v52 = vperm.slane %v1901_v12, 0  ;;  %v2156_v21 = vmul.f32 %v2123_v43, %v4266_v20  ;;  %v1902_v11 = vrot.slane %v4330_v13, 2  ;;  %v1847_v48 = vmul.f32 1.442695, %v1808_v46 }
 0x88b   :  { %3266 = vpow2.f32 %v1839_v4  ;;  %v4348_v50 = vperm.slane %v4216_v9, 0  ;;  %v1807_v18 = vmul.f32 %v1772_v14, %v4325_v61  ;;  %v1841_v19 = vmul.f32 1.442695, %v1805_v8 }
 0x88c   :  { %3102 = vset.pattern.permute.xlu2 %v3526_v31  ;;  %3268 = vpow2.f32 %v1833_v23  ;;  %v1774_v42 = vperm.slane %v1759_v60, 0  ;;  %v2158_v20 = vmul.f32 %v2124_v52, %v4303_v55  ;;  %v2125_v45 = vperm.slane %v1902_v11, 0 }
 0x88d   :  { %2269 = vperm.xlu1 %3098, %v4234_v35   ;;  %3270 = vpow2.f32 %v1843_v49  ;;  %v1810_v35 = vmul.f32 %v1773_v6, %v4312_v47  ;;  %v1903_v25 = vrot.slane %v4330_v13, 3  ;;  %v1775_v49 = vperm.slane %v1760_v5, 0 }
 0x88e   :  { %v2198_v58 = vpop.permute.xlu2 %2197  ;;  %3272 = vpow2.f32 %v1837_v3  ;;  %v1904_v14 = vrot.slane %v4330_v13, 4  ;;  %v2155_v46 = vmul.f32 %v2123_v43, %v4293_v30  ;;  %v1934_v3 = vpop.permute.xlu0 %1933  ;;  %v1845_v60 = vmul.f32 1.442695, %v1807_v18 }
 0x88f   :  { %v3265_v59 = vpop.eup %3264  ;;  %3274 = vpow2.f32 %v1847_v48  ;;  %v1851_v12 = vmul.f32 1.442695, %v1810_v35  ;;  %v2160_v11 = vmul.f32 %v2125_v45, %v4319_v53  ;;  %v2126_v5 = vperm.slane %v1903_v25, 0 }
 0x890   :  { %v2427_v10 = vmul.f32 0.0, %v3265_v59  ;;  %3276 = vpow2.f32 %v1841_v19  ;;  %v1814_v43 = vmul.f32 %v1775_v49, %v4312_v47  ;;  %v2157_v18 = vmul.f32 %v2124_v52, %v1934_v3 }
 0x891   :  { %v3267_v32 = vpop.eup %3266  ;;  %3278 = vpow2.f32 %v1851_v12  ;;  %v1811_v53 = vmul.f32 %v1774_v42, %v4325_v61  ;;  %v2127_v25 = vperm.slane %v1904_v14, 0  ;;  %v2162_v12 = vmul.f32 %v2126_v5, %v1966_v15 }
 0x892   :  { %v2429_v34 = vadd.f32 %v2427_v10, %v2156_v21  ;;  %v3269_v29 = vpop.eup %3268  ;;  %v4359_v21 = vpop.permute.xlu1 %1985  ;;  %v1809_v10 = vmul.f32 %v1773_v6, %v4325_v61  ;;  %3280 = vpow2.f32 %v1845_v60 }
 0x893   :  { %v2426_v55 = vmul.f32 0.0, %v3269_v29  ;;  %v3271_v8 = vpop.eup %3270  ;;  %v1853_v60 = vmul.f32 1.442695, %v1811_v53 }
 0x894   :  { %v2442_v4 = vmul.f32 %v3267_v32, %v2429_v34  ;;  %2024 = vperm.xlu2 %3102, %v4348_v50   ;;  %v4354_v44 = vmul.f32 %v2429_v34, %v2198_v58  ;;  %v1812_v58 = vmul.f32 %v1774_v42, %v4312_v47  ;;  %v3273_v34 = vpop.eup %3272  ;;  %v1849_v29 = vmul.f32 1.442695, %v1809_v10 }
 0x895   :  { %3100 = vset.pattern.permute.xlu1 %v3570_v7  ;;  %v4364_v48 = vadd.f32 %v2426_v55, %v2155_v46  ;;  %v1859_v55 = vmul.f32 1.442695, %v1814_v43  ;;  %v1813_v10 = vmul.f32 %v1775_v49, %v4325_v61  ;;  %v2161_v43 = vmul.f32 %v2126_v5, %v4285_v38 }
 0x896   :  { %v2444_v23 = vadd.f32 %v2442_v4, %v2158_v20  ;;  %v2210_v59 = vpop.permute.xlu2 %2209  ;;  %v1855_v32 = vmul.f32 1.442695, %v1812_v58  ;;  %v3275_v20 = vpop.eup %3274  ;;  %v1905_v4 = vrot.slane %v4330_v13, 5  ;;  %v1761_v58 = vrot.slane %v4310_v54, 7 }
 0x897   :  { %v2441_v6 = vmul.f32 %v3273_v34, %v4364_v48  ;;  %v3277_v52 = vpop.eup %3276  ;;  %v1979_v14 = vpop.permute.xlu0 %1978  ;;  %v1857_v49 = vmul.f32 1.442695, %v1813_v10  ;;  %v2163_v38 = vmul.f32 %v2127_v25, %v4298_v39 }
 0x898   :  { %v2457_v35 = vmul.f32 %v3271_v8, %v2444_v23  ;;  %v4366_v30 = vmul.f32 %v2444_v23, %v2210_v59  ;;  %3282 = vpow2.f32 %v1855_v32  ;;  %v2159_v59 = vmul.f32 %v2125_v45, %v4274_v63  ;;  %v3279_v42 = vpop.eup %3278 }
 0x899   :  { %v4374_v46 = vadd.f32 %v2441_v6, %v2157_v18  ;;  %3284 = vpow2.f32 %v1849_v29  ;;  %v3281_v63 = vpop.eup %3280  ;;  %v1906_v18 = vrot.slane %v4330_v13, 6  ;;  %v4393_v54 = vperm.slane %v1761_v58, 0 }
 0x89a   :  { %v4369_v19 = vadd.f32 %v2457_v35, %v2160_v11  ;;  %v2005_v15 = vpop.permute.xlu1 %2004  ;;  %v2164_v11 = vmul.f32 %v2127_v25, %v1979_v14  ;;  %v2128_v35 = vperm.slane %v1905_v4, 0  ;;  %3286 = vpow2.f32 %v1859_v55 }
 0x89b   :  { %v2456_v8 = vmul.f32 %v3277_v52, %v4374_v46  ;;  %3288 = vpow2.f32 %v1853_v60  ;;  %v2129_v5 = vperm.slane %v1906_v18, 0  ;;  %v4413_v25 = vperm.slane %v4216_v9, 2 }
 0x89c   :  { %v2472_v23 = vmul.f32 %v3275_v20, %v4369_v19  ;;  %2037 = vperm.xlu2 %3102, %v4259_v40   ;;  %v2166_v20 = vmul.f32 %v2128_v35, %v4308_v56  ;;  %3290 = vpow2.f32 %v1857_v49  ;;  %v1815_v56 = vmul.f32 %v4393_v54, %v4325_v61 }
 0x89d   :  { %2275 = vperm.xlu1 %3100, %v4256_v2   ;;  %v4385_v34 = vadd.f32 %v2456_v8, %v2159_v59  ;;  %v2168_v8 = vmul.f32 %v2129_v5, %v2005_v15  ;;  %v2165_v39 = vmul.f32 %v2128_v35, %v4359_v21  ;;  %v2433_v58 = vsel %vm234_vm15, %v4354_v44, 0.0 }
 0x89e   :  { %v4381_v3 = vadd.f32 %v2472_v23, %v2162_v12  ;;  %v3283_v6 = vpop.eup %3282  ;;  %v2167_v9 = vmul.f32 %v2129_v5, %v4322_v33 }
 0x89f   :  { %v2471_v45 = vmul.f32 %v3281_v63, %v4385_v34  ;;  %v3285_v29 = vpop.eup %3284  ;;  %v1861_v63 = vmul.f32 1.442695, %v1815_v56 }
 0x8a0   :  { %v2487_v2 = vmul.f32 %v3279_v42, %v4381_v3  ;;  %v3287_v52 = vpop.eup %3286 }
 0x8a1   :  { %v4396_v4 = vadd.f32 %v2471_v45, %v2161_v43  ;;  %v3289_v60 = vpop.eup %3288  ;;  %3292 = vpow2.f32 %v1861_v63 }
 0x8a2   :  { %v4390_v32 = vadd.f32 %v2487_v2, %v2164_v11 }
 0x8a3   :  { %v2486_v12 = vmul.f32 %v3285_v29, %v4396_v4  ;;  %v2448_v29 = vsel %vm234_vm15, %v4366_v30, 0.0 }
 0x8a4   :  { %v2502_v53 = vmul.f32 %v3283_v6, %v4390_v32  ;;  %3105 = vset.pattern.permute.xlu2 %v3546_v62 }
 0x8a5   :  { %3103 = vset.pattern.permute.xlu1 %v3546_v62  ;;  %v4407_v59 = vadd.f32 %v2486_v12, %v2163_v38 }
 0x8a6   :  { %v4403_v23 = vadd.f32 %v2502_v53, %v2166_v20  ;;  %v2012_v35 = vpop.permute.xlu2 %2011  ;;  %v1907_v20 = vrot.slane %v4330_v13, 7 }
 0x8a7   :  { %v2192_v55 = vpop.permute.xlu1 %2191  ;;  %v2501_v10 = vmul.f32 %v3289_v60, %v4407_v59 }
 0x8a8   :  { %v2517_v42 = vmul.f32 %v3287_v52, %v4403_v23  ;;  %v2430_v14 = vmul.f32 %v4364_v48, %v2192_v55  ;;  %v3291_v48 = vpop.eup %3290  ;;  %v2130_v5 = vperm.slane %v1907_v20, 0 }
 0x8a9   :  { %v4421_v45 = vadd.f32 %v2501_v10, %v2165_v39  ;;  %v3293_v33 = vpop.eup %3292  ;;  %v2216_v10 = vpop.permute.xlu0 %2215 }
 0x8aa   :  { %v4418_v11 = vadd.f32 %v2517_v42, %v2168_v8  ;;  %v2432_v2 = vsel %vm234_vm15, %v2430_v14, 0.0 }
 0x8ab   :  { %v2434_v15 = vadd.f32 %v2433_v58, %v2432_v2  ;;  %v2516_v43 = vmul.f32 %v3291_v48, %v4421_v45  ;;  %v2460_v58 = vmul.f32 %v4385_v34, %v2216_v10 }
 0x8ac   :  { %2056 = vperm.xlu2 %3105, %v4413_v25  }
 0x8ad   :  { %v2435_v21 = vrot.slane %v2434_v15, 4  ;;  %2030 = vperm.xlu1 %3103, %v4348_v50   ;;  %v2518_v49 = vadd.f32 %v2516_v43, %v2167_v9  ;;  %v2462_v43 = vsel %vm234_vm15, %v2460_v58, 0.0 }
 0x8af   :  { %v2204_v44 = vpop.permute.xlu1 %2203  ;;  %v2436_v18 = vadd.f32 %v2435_v21, %v2434_v15  ;;  %v2531_v56 = vmul.f32 %v3293_v33, %v2518_v49 }
 0x8b0   :  { %v2445_v6 = vmul.f32 %v4374_v46, %v2204_v44  ;;  %v2169_v46 = vmul.f32 %v2130_v5, %v2012_v35  ;;  %v1816_v35 = vmul.f32 %v4393_v54, %v4312_v47 }
 0x8b1   :  { %v2437_v38 = vrot.slane %v2436_v18, 2 }
 0x8b2   :  { %v2447_v53 = vsel %vm234_vm15, %v2445_v6, 0.0  ;;  %v4435_v60 = vadd.f32 %v2531_v56, %v2169_v46 }
 0x8b3   :  { %v2449_v12 = vadd.f32 %v2448_v29, %v2447_v53  ;;  %v2438_v8 = vadd.f32 %v2437_v38, %v2436_v18 }
 0x8b4   :  { %3108 = vset.pattern.permute.xlu2 %v3526_v31 }
 0x8b5   :  { %2043 = vperm.xlu1 %3103, %v4259_v40   ;;  %v2450_v52 = vrot.slane %v2449_v12, 4  ;;  %v2439_v30 = vrot.slane %v2438_v8, 1 }
 0x8b6   :  { %v2234_v55 = vpop.permute.xlu2 %2233 }
 0x8b7   :  { %v2451_v42 = vadd.f32 %v2450_v52, %v2449_v12  ;;  %v2476_v13 = vmul.f32 %v4381_v3, %v2234_v55  ;;  %v2440_v21 = vadd.f32 %v2439_v30, %v2438_v8 }
 0x8b9   :  { %v2452_v14 = vrot.slane %v2451_v42, 2 }
 0x8bb   :  { %v2453_v39 = vadd.f32 %v2452_v14, %v2451_v42 }
 0x8bc   :  { %2076 = vperm.xlu2 %3108, %v4240_v0  }
 0x8bd   :  { %3104 = vset.pattern.permute.xlu1 %v3526_v31  ;;  %v2454_v2 = vrot.slane %v2453_v39, 1 }
 0x8be   :  { %v2246_v15 = vpop.permute.xlu2 %2245 }
 0x8bf   :  { %v2491_v63 = vmul.f32 %v4390_v32, %v2246_v15  ;;  %v2222_v48 = vpop.permute.xlu1 %2221  ;;  %v2455_v9 = vadd.f32 %v2454_v2, %v2453_v39  ;;  %v1863_v32 = vmul.f32 1.442695, %v1816_v35 }
 0x8c0   :  { %v2461_v3 = vmul.f32 %v4369_v19, %v2222_v48 }
 0x8c1   :  { %v2666_v44 = vsel %vm144_vm8, %v2440_v21, %v2455_v9  ;;  %3294 = vpow2.f32 %v1863_v32  ;;  %v2493_v21 = vsel %vm234_vm15, %v2491_v63, 0.0 }
 0x8c2   :  { %v2463_v18 = vsel %vm234_vm15, %v2461_v3, 0.0 }
 0x8c3   :  { %v2464_v6 = vadd.f32 %v2463_v18, %v2462_v43 }
 0x8c4   :  { %2089 = vperm.xlu2 %3108, %v4246_v51  }
 0x8c5   :  { %v2465_v34 = vrot.slane %v2464_v6, 4  ;;  %2050 = vperm.xlu1 %3104, %v4413_v25  }
 0x8c7   :  { %v2466_v20 = vadd.f32 %v2465_v34, %v2464_v6  ;;  %v3295_v38 = vpop.eup %3294 }
 0x8c8   :  { %v2532_v56 = vmul.f32 %v3295_v38, %v4418_v11 }
 0x8c9   :  { %v2467_v53 = vrot.slane %v2466_v20, 2 }
 0x8cb   :  { %v2468_v19 = vadd.f32 %v2467_v53, %v2466_v20 }
 0x8cc   :  { %2102 = vperm.xlu2 %3108, %v4250_v57  }
 0x8cd   :  { %v2469_v54 = vrot.slane %v2468_v19, 1  ;;  %3107 = vset.pattern.permute.xlu1 %v3546_v62 }
 0x8ce   :  { %v2264_v29 = vpop.permute.xlu2 %2263 }
 0x8cf   :  { %v2470_v12 = vadd.f32 %v2469_v54, %v2468_v19  ;;  %v2520_v33 = vmul.f32 %v2518_v49, %v2264_v29  ;;  %v2018_v52 = vpop.permute.xlu1 %2017 }
 0x8d0   :  { %v2170_v55 = vmul.f32 %v2130_v5, %v2018_v52  ;;  %v2478_v5 = vsel %vm234_vm15, %v2476_v13, 0.0 }
 0x8d1   :  { %v2667_v46 = vsel %vm151_vm9, %v2666_v44, %v2470_v12 }
 0x8d2   :  { %v2534_v8 = vadd.f32 %v2532_v56, %v2170_v55 }
 0x8d4   :  { %3111 = vset.pattern.permute.xlu2 %v3558_v1 }
 0x8d5   :  { %2069 = vperm.xlu1 %3107, %v4229_v28  }
 0x8dc   :  { %2293 = vperm.xlu2 %3111, %v4348_v50  }
 0x8dd   :  { %3110 = vset.pattern.permute.xlu1 %v3570_v7 }
 0x8de   :  { %v2282_v62 = vpop.permute.xlu2 %2281 }
 0x8df   :  { %v4457_v42 = vmul.f32 %v2534_v8, %v2282_v62  ;;  %v2228_v14 = vpop.permute.xlu1 %2227 }
 0x8e0   :  { %v2475_v49 = vmul.f32 %v4396_v4, %v2228_v14 }
 0x8e2   :  { %v2477_v30 = vsel %vm234_vm15, %v2475_v49, 0.0 }
 0x8e3   :  { %v2479_v39 = vadd.f32 %v2478_v5, %v2477_v30 }
 0x8e4   :  { %3114 = vset.pattern.permute.xlu2 %v3570_v7 }
 0x8e5   :  { %v2480_v10 = vrot.slane %v2479_v39, 4  ;;  %2287 = vperm.xlu1 %3110, %v4348_v50  }
 0x8e7   :  { %v2481_v58 = vadd.f32 %v2480_v10, %v2479_v39  ;;  %v2240_v2 = vpop.permute.xlu1 %2239 }
 0x8e8   :  { %v2490_v15 = vmul.f32 %v4407_v59, %v2240_v2  ;;  %v2252_v59 = vpop.permute.xlu0 %2251 }
 0x8e9   :  { %v2482_v48 = vrot.slane %v2481_v58, 2  ;;  %v2505_v34 = vmul.f32 %v4421_v45, %v2252_v59  ;;  %v2379_v45 = vsub.f32 0.0, %v4155_v22 }
 0x8ea   :  { %v2492_v9 = vsel %vm234_vm15, %v2490_v15, 0.0 }
 0x8eb   :  { %v2483_v4 = vadd.f32 %v2482_v48, %v2481_v58  ;;  %v2494_v3 = vadd.f32 %v2493_v21, %v2492_v9  ;;  %v2507_v19 = vsel %vm234_vm15, %v2505_v34, 0.0  ;;  %v2381_v62 = vmul.f32 1.442695, %v2379_v45 }
 0x8ec   :  { %2311 = vperm.xlu2 %3114, %v4413_v25  }
 0x8ed   :  { %v2484_v13 = vrot.slane %v2483_v4, 1  ;;  %v2495_v35 = vrot.slane %v2494_v3, 4  ;;  %3113 = vset.pattern.permute.xlu1 %v3558_v1 }
 0x8ef   :  { %v2485_v43 = vadd.f32 %v2484_v13, %v2483_v4  ;;  %v2496_v44 = vadd.f32 %v2495_v35, %v2494_v3  ;;  %v1711_v3 = vpop.f32.mrf.mxu2  ;;  %v2538_v35 = vsel %vm234_vm15, %v4457_v42, 0.0 }
 0x8f1   :  { %v2497_v50 = vrot.slane %v2496_v44, 2  ;;  %v2668_v18 = vsel %vm158_vm10, %v2667_v46, %v2485_v43  ;;  %v2522_v46 = vsel %vm234_vm15, %v2520_v33, 0.0 }
 0x8f3   :  { %v2498_v6 = vadd.f32 %v2497_v50, %v2496_v44  ;;  %v4495_v50 = vadd.f32 %v4279_v37, %v1711_v3 }
 0x8f4   :  { %3115 = vset.pattern.permute.xlu2 %v3526_v31 }
 0x8f5   :  { %v2499_v63 = vrot.slane %v2498_v6, 1  ;;  %2305 = vperm.xlu1 %3113, %v4259_v40   ;;  %v2380_v40 = vsub.f32 0.0, %v4186_v24 }
 0x8f7   :  { %v2500_v32 = vadd.f32 %v2499_v63, %v2498_v6  ;;  %v2258_v20 = vpop.permute.xlu1 %2257  ;;  %v2383_v56 = vmul.f32 1.442695, %v2380_v40 }
 0x8f8   :  { %v2506_v53 = vmul.f32 %v4403_v23, %v2258_v20 }
 0x8f9   :  { %v2669_v29 = vsel %vm1255_vm1, %v2668_v18, %v2500_v32  ;;  %3296 = vpow2.f32 %v2383_v56 }
 0x8fa   :  { %v2508_v54 = vsel %vm234_vm15, %v2506_v53, 0.0  ;;  %3298 = vpow2.f32 %v2381_v62 }
 0x8fb   :  { %v2509_v38 = vadd.f32 %v2508_v54, %v2507_v19 }
 0x8fc   :  { %2115 = vperm.xlu2 %3115, %v4269_v41  }
 0x8fd   :  { %v2510_v31 = vrot.slane %v2509_v38, 4  ;;  %2317 = vperm.xlu1 %3113, %v4413_v25  }
 0x8ff   :  { %v2511_v12 = vadd.f32 %v2510_v31, %v2509_v38  ;;  %v2270_v52 = vpop.permute.xlu1 %2269  ;;  %v3297_v33 = vpop.eup %3296 }
 0x900   :  { %v2521_v23 = vmul.f32 %v4418_v11, %v2270_v52  ;;  %v3299_v2 = vpop.eup %3298  ;;  %v2386_v48 = vadd.f32 1.0, %v3297_v33  ;;  %v4505_v31 = vpop.permute.xlu2 %2024 }
 0x901   :  { %v2512_v55 = vrot.slane %v2511_v12, 2  ;;  %v2385_v4 = vadd.f32 1.0, %v3299_v2 }
 0x902   :  { %v2523_v8 = vsel %vm234_vm15, %v2521_v23, 0.0  ;;  %3300 = vrcp.f32 %v2386_v48  ;;  %v2413_v52 = vand.u32 2147483648, %v2386_v48  ;;  %vm2407_vm13 = vweird.f32 %v2386_v48 }
 0x903   :  { %v2513_v14 = vadd.f32 %v2512_v55, %v2511_v12  ;;  %v2524_v49 = vadd.f32 %v2523_v8, %v2522_v46  ;;  %3302 = vrcp.f32 %v2385_v4  ;;  %v2398_v23 = vand.u32 2147483648, %v2385_v4 }
 0x904   :  { %3118 = vset.pattern.permute.xlu2 %v3558_v1  ;;  %v2411_v55 = vand.u32 2147483647, %v2386_v48  ;;  %vm2392_vm14 = vweird.f32 %v2385_v4  ;;  %v2396_v56 = vand.u32 2147483647, %v2385_v4  ;;  %v2414_v62 = vor.u32 1.1754944e-38, %v2413_v52 }
 0x905   :  { %v2514_v25 = vrot.slane %v2513_v14, 1  ;;  %v2525_v5 = vrot.slane %v2524_v49, 4  ;;  %3117 = vset.pattern.permute.xlu1 %v3570_v7 }
 0x906   :  { %vm2412_vm5 = vcmp.eq.f32.partialorder %v2411_v55, 8.507059e+37  ;;  %vm2397_vm0 = vcmp.eq.f32.partialorder %v2396_v56, 8.507059e+37 }
 0x907   :  { %v2515_v30 = vadd.f32 %v2514_v25, %v2513_v14  ;;  %v2526_v39 = vadd.f32 %v2525_v5, %v2524_v49  ;;  %v2399_v49 = vor.u32 1.1754944e-38, %v2398_v23 }
 0x908   :  { %v3301_v59 = vpop.eup %3300  ;;  %v4511_v14 = vpop.permute.xlu2 %2037 }
 0x909   :  { %v2527_v11 = vrot.slane %v2526_v39, 2  ;;  %v2670_v10 = vsel %vm1257_vm2, %v2669_v29, %v2515_v30  ;;  %v3303_v63 = vpop.eup %3302  ;;  %v2403_v20 = vmul.f32 %v3301_v59, %v2386_v48  ;;  %vm2408_vm11 = vweird.f32 %v3301_v59 }
 0x90a   :  { %v2388_v53 = vmul.f32 %v3303_v63, %v2385_v4  ;;  %vm2393_vm12 = vweird.f32 %v3303_v63  ;;  %vm2409_vm6 = vmor %vm2407_vm13, %vm2408_vm11  ;;  %v1724_v48 = vmax.f32 %v4495_v50, 0.0 }
 0x90b   :  { %v2528_v58 = vadd.f32 %v2527_v11, %v2526_v39  ;;  %v2404_v54 = vsub.f32 1.0, %v2403_v20  ;;  %vm2394_vm7 = vmor %vm2392_vm14, %vm2393_vm12 }
 0x90c   :  { %2329 = vperm.xlu2 %3118, %v4229_v28   ;;  %v2389_v38 = vsub.f32 1.0, %v2388_v53 }
 0x90d   :  { %v2529_v15 = vrot.slane %v2528_v58, 1  ;;  %2323 = vperm.xlu1 %3117, %v4229_v28   ;;  %v2405_v40 = vmul.f32 %v3301_v59, %v2404_v54 }
 0x90f   :  { %v2530_v21 = vadd.f32 %v2529_v15, %v2528_v58  ;;  %v2276_v9 = vpop.permute.xlu1 %2275  ;;  %v2406_v45 = vadd.f32 %v3301_v59, %v2405_v40 }
 0x910   :  { %v2535_v13 = vmul.f32 %v4435_v60, %v2276_v9  ;;  %v1726_v60 = vand.u32 2147483647, %v4495_v50 }
 0x911   :  { %v2671_v44 = vsel %vm1259_vm3, %v2670_v10, %v2530_v21  ;;  %v2410_v8 = vsel %vm2409_vm6, %v3301_v59, %v2406_v45 }
 0x912   :  { %v2537_v43 = vsel %vm234_vm15, %v2535_v13, 0.0  ;;  %v1728_v34 = vsub.f32 0.0, %v1726_v60  ;;  %v2415_v25 = vsel %vm2412_vm5, %v2414_v62, %v2410_v8 }
 0x913   :  { %v2539_v18 = vadd.f32 %v2538_v35, %v2537_v43  ;;  %v2418_v30 = vmul.f32 %v2415_v25, %v4186_v24 }
 0x914   :  { %2341 = vperm.xlu2 %3118, %v4240_v0   ;;  %v1731_v19 = vmul.f32 1.442695, %v1728_v34 }
 0x915   :  { %v2540_v28 = vrot.slane %v2539_v18, 4  ;;  %2335 = vperm.xlu1 %3117, %v4240_v0  }
 0x916   :  { %3304 = vpow2.f32 %v1731_v19  ;;  %v4541_v19 = vpop.permute.xlu0 %2063 }
 0x917   :  { %v2541_v6 = vadd.f32 %v2540_v28, %v2539_v18 }
 0x919   :  { %v2542_v42 = vrot.slane %v2541_v6, 2 }
 0x91b   :  { %v2543_v32 = vadd.f32 %v2542_v42, %v2541_v6 }
 0x91c   :  { %3121 = vset.pattern.permute.xlu2 %v3570_v7  ;;  %v2390_v7 = vmul.f32 %v3303_v63, %v2389_v38 }
 0x91d   :  { %v2544_v37 = vrot.slane %v2543_v32, 1  ;;  %3120 = vset.pattern.permute.xlu1 %v3558_v1  ;;  %v3305_v1 = vpop.eup %3304 }
 0x91e   :  { %v2391_v12 = vadd.f32 %v3303_v63, %v2390_v7  ;;  %v1742_v46 = vadd.f32 1.0, %v3305_v1  ;;  %v1745_v39 = vmul.f32 -0.5, %v3305_v1  ;;  %v1748_v58 = vand.u32 2147483647, %v3305_v1 }
 0x91f   :  { %v2545_v29 = vadd.f32 %v2544_v37, %v2543_v32 }
 0x920   :  { %3306 = vlog2.f32 %v1742_v46  ;;  %v1746_v10 = vadd.f32 1.0, %v1745_v39  ;;  %vm1749_vm11 = vcmp.lt.f32.partialorder %v1748_v58, 0.0004427343  ;;  %v4555_v39 = vpop.permute.xlu0 %2082 }
 0x921   :  { %v4503_v0 = vsel %vm1261_vm4, %v2671_v44, %v2545_v29 }
 0x922   :  { %v1747_v2 = vmul.f32 %v3305_v1, %v1746_v10 }
 0x924   :  { %2359 = vperm.xlu2 %3121, %v4250_v57  }
 0x925   :  { %2353 = vperm.xlu1 %3120, %v4246_v51   ;;  %v2395_v51 = vsel %vm2394_vm7, %v3303_v63, %v2391_v12 }
 0x926   :  { %v2400_v5 = vsel %vm2397_vm0, %v2399_v49, %v2395_v51  ;;  %vm4805_vm0 = vcmask 261120  }
 0x927   :  { %v2417_v11 = vmul.f32 %v2400_v5, %v4155_v22  ;;  %v2031_v22 = vpop.permute.xlu1 %2030  ;;  %vm4808_vm12 = vmmov %vm4805_vm0 }
 0x92c   :  { %2371 = vperm.xlu2 %3121, %v4269_v41   ;;  %v4517_v41 = vpop.permute.xlu2 %2056 }
 0x92d   :  { %2365 = vperm.xlu1 %3120, %v4250_v57   ;;  %v3307_v57 = vpop.eup %3306 }
 0x92e   :  { %v1744_v33 = vmul.f32 0.6931472, %v3307_v57 }
 0x92f   :  { %v2044_v18 = vpop.permute.xlu1 %2043 }
 0x930   :  { %v1750_v15 = vsel %vm1749_vm11, %v1747_v2, %v1744_v33 }
 0x931   :  { %v4522_v24 = vadd.f32 %v1750_v15, %v1724_v48 }
 0x933   :  { %v1777_v9 = vperm.slane %v4522_v24, 0  ;;  %v1762_v4 = vrot.slane %v4522_v24, 1  ;;  %v1763_v50 = vrot.slane %v4522_v24, 2  ;;  %v4534_v6 = vmul.f32 %v4522_v24, %v4199_v17 }
 0x934   :  { %2686 = vrot.lane.b32.xlu2 %v2418_v30, %s3359_s21  ;;  %v4520_v21 = vpop.permute.xlu2 %2076  ;;  %v1764_v37 = vrot.slane %v4522_v24, 3  ;;  %v1765_v62 = vrot.slane %v4522_v24, 4 }
 0x935   :  { %2684 = vrot.lane.b32.xlu1 %v2417_v11, %s3359_s21  ;;  %v1818_v13 = vmul.f32 %v1777_v9, %v4312_v47  ;;  %v1817_v35 = vmul.f32 %v1777_v9, %v4325_v61  ;;  %v1778_v43 = vperm.slane %v1762_v4, 0  ;;  %v1779_v63 = vperm.slane %v1763_v50, 0 }
 0x936   :  { %v2131_v32 = vperm.slane %v4534_v6, 0  ;;  %v1908_v38 = vrot.slane %v4534_v6, 1  ;;  %v1780_v52 = vperm.slane %v1764_v37, 0  ;;  %v1909_v10 = vrot.slane %v4534_v6, 2  ;;  %v2096_v37 = vpop.permute.xlu0 %2095 }
 0x937   :  { %v1867_v44 = vmul.f32 1.442695, %v1818_v13  ;;  %v1865_v28 = vmul.f32 1.442695, %v1817_v35  ;;  %v1820_v60 = vmul.f32 %v1778_v43, %v4312_v47  ;;  %v1819_v59 = vmul.f32 %v1778_v43, %v4325_v61  ;;  %v2051_v20 = vpop.permute.xlu1 %2050 }
 0x938   :  { %v1822_v29 = vmul.f32 %v1779_v63, %v4312_v47  ;;  %v2172_v40 = vmul.f32 %v2131_v32, %v2031_v22  ;;  %v1821_v45 = vmul.f32 %v1779_v63, %v4325_v61  ;;  %v2171_v1 = vmul.f32 %v2131_v32, %v4505_v31 }
 0x939   :  { %3308 = vpow2.f32 %v1867_v44  ;;  %v1871_v34 = vmul.f32 1.442695, %v1820_v60  ;;  %v1869_v54 = vmul.f32 1.442695, %v1819_v59  ;;  %v2132_v46 = vperm.slane %v1908_v38, 0 }
 0x93a   :  { %3310 = vpow2.f32 %v1865_v28  ;;  %v1875_v55 = vmul.f32 1.442695, %v1822_v29  ;;  %v1873_v51 = vmul.f32 1.442695, %v1821_v45  ;;  %v1824_v30 = vmul.f32 %v1780_v52, %v4312_v47 }
 0x93b   :  { %3312 = vpow2.f32 %v1871_v34  ;;  %v2174_v25 = vmul.f32 %v2132_v46, %v2044_v18  ;;  %v1823_v11 = vmul.f32 %v1780_v52, %v4325_v61  ;;  %v2173_v57 = vmul.f32 %v2132_v46, %v4511_v14 }
 0x93c   :  { %v4526_v3 = vpop.permute.xlu2 %2089  ;;  %3314 = vpow2.f32 %v1869_v54  ;;  %v1781_v2 = vperm.slane %v1765_v62, 0  ;;  %v1879_v22 = vmul.f32 1.442695, %v1824_v30  ;;  %v2133_v35 = vperm.slane %v1909_v10, 0 }
 0x93d   :  { %3316 = vpow2.f32 %v1875_v55  ;;  %v1877_v4 = vmul.f32 1.442695, %v1823_v11  ;;  %v1766_v44 = vrot.slane %v4522_v24, 5  ;;  %v1910_v18 = vrot.slane %v4534_v6, 3 }
 0x93e   :  { %3318 = vpow2.f32 %v1873_v51  ;;  %v1826_v14 = vmul.f32 %v1781_v2, %v4312_v47  ;;  %v2175_v28 = vmul.f32 %v2133_v35, %v2051_v20  ;;  %v1825_v63 = vmul.f32 %v1781_v2, %v4325_v61 }
 0x93f   :  { %v3309_v53 = vpop.eup %3308  ;;  %3320 = vpow2.f32 %v1879_v22  ;;  %v2176_v34 = vmul.f32 %v2133_v35, %v4517_v41  ;;  %v1782_v54 = vperm.slane %v1766_v44, 0  ;;  %v2134_v29 = vperm.slane %v1910_v18, 0 }
 0x940   :  { %v3311_v7 = vpop.eup %3310  ;;  %v2547_v12 = vmul.f32 0.0, %v3309_v53  ;;  %3322 = vpow2.f32 %v1877_v4  ;;  %v1883_v53 = vmul.f32 1.442695, %v1826_v14  ;;  %v1767_v52 = vrot.slane %v4522_v24, 6 }
 0x941   :  { %v2546_v56 = vmul.f32 0.0, %v3311_v7  ;;  %v3313_v31 = vpop.eup %3312  ;;  %v1881_v7 = vmul.f32 1.442695, %v1825_v63  ;;  %v1828_v41 = vmul.f32 %v1782_v54, %v4312_v47  ;;  %v1911_v55 = vrot.slane %v4534_v6, 4 }
 0x942   :  { %v4549_v8 = vadd.f32 %v2547_v12, %v2172_v40  ;;  %v3315_v33 = vpop.eup %3314  ;;  %3324 = vpow2.f32 %v1883_v53  ;;  %v1827_v62 = vmul.f32 %v1782_v54, %v4325_v61  ;;  %v1783_v30 = vperm.slane %v1767_v52, 0 }
 0x943   :  { %v4552_v49 = vadd.f32 %v2546_v56, %v2171_v1  ;;  %v3317_v43 = vpop.eup %3316  ;;  %3326 = vpow2.f32 %v1881_v7  ;;  %v2135_v11 = vperm.slane %v1911_v55, 0  ;;  %v1768_v4 = vrot.slane %v4522_v24, 7 }
 0x944   :  { %v4537_v42 = vpop.permute.xlu2 %2102  ;;  %v2562_v58 = vmul.f32 %v3313_v31, %v4549_v8  ;;  %v3319_v59 = vpop.eup %3318  ;;  %v1887_v31 = vmul.f32 1.442695, %v1828_v41  ;;  %v1885_v2 = vmul.f32 1.442695, %v1827_v62  ;;  %v1829_v44 = vmul.f32 %v1783_v30, %v4325_v61 }
 0x945   :  { %v2561_v15 = vmul.f32 %v3315_v33, %v4552_v49  ;;  %v3321_v45 = vpop.eup %3320  ;;  %v2180_v35 = vmul.f32 %v2135_v11, %v4555_v39  ;;  %v2179_v18 = vmul.f32 %v2135_v11, %v4520_v21  ;;  %v1913_v52 = vrot.slane %v4534_v6, 6 }
 0x946   :  { %v4562_v48 = vadd.f32 %v2562_v58, %v2174_v25  ;;  %v3323_v12 = vpop.eup %3322  ;;  %v2177_v25 = vmul.f32 %v2134_v29, %v4541_v19  ;;  %v2109_v58 = vpop.permute.xlu0 %2108  ;;  %3328 = vpow2.f32 %v1887_v31  ;;  %v1830_v19 = vmul.f32 %v1783_v30, %v4312_v47 }
 0x947   :  { %v2070_v5 = vpop.permute.xlu1 %2069  ;;  %v4566_v13 = vadd.f32 %v2561_v15, %v2173_v57  ;;  %3330 = vpow2.f32 %v1885_v2  ;;  %v1889_v54 = vmul.f32 1.442695, %v1829_v44  ;;  %v1914_v2 = vrot.slane %v4534_v6, 7 }
 0x948   :  { %v2577_v60 = vmul.f32 %v3317_v43, %v4562_v48  ;;  %v2178_v1 = vmul.f32 %v2134_v29, %v2070_v5  ;;  %v3325_v10 = vpop.eup %3324  ;;  %v1912_v43 = vrot.slane %v4534_v6, 5  ;;  %v1891_v63 = vmul.f32 1.442695, %v1830_v19 }
 0x949   :  { %v2576_v32 = vmul.f32 %v3319_v59, %v4566_v13  ;;  %v3327_v22 = vpop.eup %3326  ;;  %v1784_v59 = vperm.slane %v1768_v4, 0  ;;  %v3014_v4 = vld [vmem:[%s4792_s10 + $0x70] sm:$0xff] }
 0x94a   :  { %v4579_v20 = vadd.f32 %v2577_v60, %v2176_v34  ;;  %v2136_v24 = vperm.slane %v1912_v43, 0  ;;  %3332 = vpow2.f32 %v1891_v63 }
 0x94b   :  { %v4577_v38 = vadd.f32 %v2576_v32, %v2175_v28  ;;  %3334 = vpow2.f32 %v1889_v54  ;;  %v1831_v21 = vmul.f32 %v1784_v59, %v4325_v61 }
 0x94c   :  { %v4547_v23 = vpop.permute.xlu2 %2293  ;;  %v2592_v46 = vmul.f32 %v3321_v45, %v4579_v20  ;;  %v3329_v32 = vpop.eup %3328  ;;  %v1832_v45 = vmul.f32 %v1784_v59, %v4312_v47  ;;  %v2181_v41 = vmul.f32 %v2136_v24, %v4526_v3  ;;  %v2137_v47 = vperm.slane %v1913_v52, 0  ;;  %v3010_v52 = vld [vmem:[%s4792_s10 + $0x50] sm:$0xff] }
 0x94d   :  { %v2591_v51 = vmul.f32 %v3323_v12, %v4577_v38  ;;  %v3331_v29 = vpop.eup %3330  ;;  %v1893_v31 = vmul.f32 1.442695, %v1831_v21 }
 0x94e   :  { %v4592_v5 = vadd.f32 %v2592_v46, %v2178_v1  ;;  %v2300_v53 = vpop.permute.xlu0 %2299  ;;  %v2182_v1 = vmul.f32 %v2136_v24, %v2096_v37  ;;  %v2184_v61 = vmul.f32 %v2137_v47, %v2109_v58 }
 0x94f   :  { %v4594_v57 = vadd.f32 %v2591_v51, %v2177_v25  ;;  %v1895_v51 = vmul.f32 1.442695, %v1832_v45 }
 0x950   :  { %v2607_v15 = vmul.f32 %v3325_v10, %v4592_v5  ;;  %v3333_v25 = vpop.eup %3332 }
 0x951   :  { %v2606_v14 = vmul.f32 %v3327_v22, %v4594_v57  ;;  %v3335_v11 = vpop.eup %3334  ;;  %3336 = vpow2.f32 %v1895_v51  ;;  %v3015_v22 = vld [vmem:[%s4792_s10 + $0x78] sm:$0xff] }
 0x952   :  { %v4606_v60 = vadd.f32 %v2607_v15, %v2180_v35  ;;  %3338 = vpow2.f32 %v1893_v31  ;;  %v2183_v15 = vmul.f32 %v2137_v47, %v4537_v42  ;;  %2715 = vmatpush.msrb.mxu0 %v3015_v22  ;;  %v2138_v35 = vperm.slane %v1914_v2, 0  ;;  %v3013_v42 = vld [vmem:[%s4792_s10 + $0x68] sm:$0xff]  ;;  %v3008_v2 = vld [vmem:[%s4792_s10 + $0x40] sm:$0xff] }
 0x953   :  { %v2608_v34 = vadd.f32 %v2606_v14, %v2179_v18  ;;  %v2565_v18 = vmul.f32 %v4566_v13, %v2300_v53  ;;  %v2551_v13 = vmul.f32 %v4549_v8, %v4547_v23  ;;  %v3012_v8 = vld [vmem:[%s4792_s10 + $0x60] sm:$0xff]  ;;  %v3009_v47 = vld [vmem:[%s4792_s10 + $0x48] sm:$0xff] }
 0x954   :  { %v4564_v9 = vpop.permute.xlu2 %2311  ;;  %v2622_v39 = vmul.f32 %v3329_v32, %v4606_v60  ;;  %2716 = vmatpush.msrb.mxu0 %v3014_v4 }
 0x955   :  { %v2621_v12 = vmul.f32 %v3331_v29, %v2608_v34 }
 0x956   :  { %v4613_v46 = vadd.f32 %v2622_v39, %v2182_v1  ;;  %v2122_v30 = vpop.permute.xlu0 %2121  ;;  %v2580_v39 = vmul.f32 %v4577_v38, %v4564_v9  ;;  %2717 = vmatpush.msrb.mxu0 %v3013_v42 }
 0x957   :  { %v4571_v50 = vpop.permute.xlu1 %2287  ;;  %v4615_v62 = vadd.f32 %v2621_v12, %v2181_v41  ;;  %v3337_v14 = vpop.eup %3336  ;;  %v2186_v54 = vmul.f32 %v2138_v35, %v2122_v30 }
 0x958   :  { %v2637_v37 = vmul.f32 %v3333_v25, %v4613_v46  ;;  %v2550_v63 = vmul.f32 %v4552_v49, %v4571_v50  ;;  %v3339_v32 = vpop.eup %3338  ;;  %2718 = vmatpush.msrb.mxu0 %v3012_v8 }
 0x959   :  { %v2636_v3 = vmul.f32 %v3335_v11, %v4615_v62 }
 0x95a   :  { %v4629_v19 = vadd.f32 %v2637_v37, %v2184_v61  ;;  %v2552_v9 = vsel %vm234_vm15, %v2550_v63, 0.0 }
 0x95b   :  { %v4633_v58 = vadd.f32 %v2636_v3, %v2183_v15 }
 0x95c   :  { %v4581_v40 = vpop.permute.xlu2 %2115 }
 0x95d   :  { %v2185_v24 = vmul.f32 %v2138_v35, %v4581_v40  ;;  %v2651_v50 = vmul.f32 %v3339_v32, %v4633_v58  ;;  %v2567_v40 = vsel %vm234_vm15, %v2565_v18, 0.0 }
 0x95e   :  { %v2348_v44 = vpop.permute.xlu0 %2347 }
 0x95f   :  { %v2625_v22 = vmul.f32 %v4615_v62, %v2348_v44 }
 0x966   :  { %v4596_v33 = vpop.permute.xlu2 %2329  ;;  %v2378_v41 = vpop.permute.xlu0 %2377 }
 0x967   :  { %v4586_v56 = vpop.permute.xlu1 %2305  ;;  %v2596_v49 = vmul.f32 %v4592_v5, %v4596_v33  ;;  %v3011_v5 = vld [vmem:[%s4792_s10 + $0x58] sm:$0xff]  ;;  %v2582_v33 = vsel %vm234_vm15, %v2580_v39, 0.0 }
 0x968   :  { %v2566_v6 = vmul.f32 %v4562_v48, %v4586_v56  ;;  %v2652_v56 = vmul.f32 %v3337_v14, %v4629_v19  ;;  %2719 = vmatpush.msrb.mxu0 %v3011_v5 }
 0x969   :  { %v2598_v1 = vsel %vm234_vm15, %v2596_v49, 0.0 }
 0x96a   :  { %v2654_v23 = vadd.f32 %v2652_v56, %v2186_v54  ;;  %2720 = vmatpush.msrb.mxu0 %v3010_v52 }
 0x96c   :  { %v2656_v31 = vmul.f32 %v2654_v23, %v2378_v41  ;;  %2721 = vmatpush.msrb.mxu0 %v3009_v47 }
 0x96e   :  { %v2342_v7 = vpop.permute.xlu2 %2341  ;;  %2722 = vmatpush.msrb.mxu0 %v3008_v2 }
 0x96f   :  { %v2318_v28 = vpop.permute.xlu1 %2317 }
 0x970   :  { %v2581_v59 = vmul.f32 %v4579_v20, %v2318_v28  ;;  %v2568_v20 = vsel %vm234_vm15, %v2566_v6, 0.0  ;;  %v2611_v28 = vmul.f32 %v4606_v60, %v2342_v7  ;;  %v2553_v7 = vsel %vm234_vm15, %v2551_v13, 0.0 }
 0x971   :  { %v2569_v45 = vadd.f32 %v2568_v20, %v2567_v40  ;;  %v2658_v6 = vsel %vm234_vm15, %v2656_v31, 0.0 }
 0x972   :  { %v2613_v51 = vsel %vm234_vm15, %v2611_v28, 0.0 }
 0x973   :  { %v2570_v37 = vrot.slane %v2569_v45, 4 }
 0x97e   :  { %v4618_v10 = vpop.permute.xlu2 %2359 }
 0x97f   :  { %v2324_v55 = vpop.permute.xlu1 %2323 }
 0x980   :  { %v2595_v48 = vmul.f32 %v4594_v57, %v2324_v55  ;;  %v2583_v57 = vsel %vm234_vm15, %v2581_v59, 0.0  ;;  %v2554_v55 = vadd.f32 %v2553_v7, %v2552_v9 }
 0x981   :  { %v2584_v12 = vadd.f32 %v2583_v57, %v2582_v33 }
 0x982   :  { %v2597_v38 = vsel %vm234_vm15, %v2595_v48, 0.0  ;;  %v2555_v3 = vrot.slane %v2554_v55, 4 }
 0x983   :  { %v2599_v25 = vadd.f32 %v2598_v1, %v2597_v38  ;;  %v2585_v11 = vrot.slane %v2584_v12, 4 }
 0x984   :  { %v2556_v59 = vadd.f32 %v2555_v3, %v2554_v55 }
 0x985   :  { %v2600_v15 = vrot.slane %v2599_v25, 4  ;;  %v2586_v18 = vadd.f32 %v2585_v11, %v2584_v12 }
 0x986   :  { %v2372_v53 = vpop.permute.xlu2 %2371 }
 0x987   :  { %v2336_v43 = vpop.permute.xlu1 %2335  ;;  %v2601_v63 = vadd.f32 %v2600_v15, %v2599_v25  ;;  %v2587_v54 = vrot.slane %v2586_v18, 2 }
 0x988   :  { %v2610_v29 = vmul.f32 %v2608_v34, %v2336_v43  ;;  %v2653_v34 = vadd.f32 %v2651_v50, %v2185_v24  ;;  %v2571_v43 = vadd.f32 %v2570_v37, %v2569_v45  ;;  %v2627_v24 = vsel %vm234_vm15, %v2625_v22, 0.0 }
 0x989   :  { %v2602_v13 = vrot.slane %v2601_v63, 2  ;;  %v2588_v9 = vadd.f32 %v2587_v54, %v2586_v18 }
 0x98a   :  { %v2612_v60 = vsel %vm234_vm15, %v2610_v29, 0.0  ;;  %v2655_v21 = vmul.f32 %v2653_v34, %v2372_v53  ;;  %v2572_v62 = vrot.slane %v2571_v43, 2  ;;  %v2557_v29 = vrot.slane %v2556_v59, 2  ;;  %v3132_v53 = vld [vmem:[%s4786_s9 + $0x1] ss:$0 sm:$0xff] }
 0x98b   :  { %v2614_v30 = vadd.f32 %v2613_v51, %v2612_v60  ;;  %v2603_v23 = vadd.f32 %v2602_v13, %v2601_v63  ;;  %v2424_v60 = vmul.f32 %v3132_v53, %v4195_v26  ;;  %v2589_v7 = vrot.slane %v2588_v9, 1 }
 0x98c   :  { %v2657_v61 = vsel %vm234_vm15, %v2655_v21, 0.0  ;;  %v2573_v40 = vadd.f32 %v2572_v62, %v2571_v43  ;;  %v2558_v34 = vadd.f32 %v2557_v29, %v2556_v59  ;;  %v2425_v59 = vmul.f32 %v3132_v53, %v4199_v17 }
 0x98d   :  { %v2615_v4 = vrot.slane %v2614_v30, 4  ;;  %v2659_v14 = vadd.f32 %v2658_v6, %v2657_v61  ;;  %v2604_v21 = vrot.slane %v2603_v23, 1  ;;  %v2680_v52 = vadd.f32 %v4503_v0, %v2424_v60 }
 0x98e   :  { %v2574_v33 = vrot.slane %v2573_v40, 1  ;;  %v2559_v12 = vrot.slane %v2558_v34, 1  ;;  %v2590_v37 = vadd.f32 %v2589_v7, %v2588_v9 }
 0x98f   :  { %v2616_v56 = vadd.f32 %v2615_v4, %v2614_v30  ;;  %v2660_v44 = vrot.slane %v2659_v14, 4  ;;  %v2605_v2 = vadd.f32 %v2604_v21, %v2603_v23 }
 0x990   :  { %v2575_v25 = vadd.f32 %v2574_v33, %v2573_v40  ;;  %v2560_v61 = vadd.f32 %v2559_v12, %v2558_v34  ;;  %v3020_v40 = vld [vmem:[%s4794_s12 + $0x28] sm:$0xff] }
 0x991   :  { %v2617_v20 = vrot.slane %v2616_v56, 2  ;;  %v2661_v28 = vadd.f32 %v2660_v44, %v2659_v14 }
 0x992   :  { %v2673_v15 = vsel %vm144_vm8, %v2560_v61, %v2575_v25  ;;  %vm4806_vm8 = vmmov %vm4805_vm0 }
 0x993   :  { %v2674_v0 = vsel %vm151_vm9, %v2673_v15, %v2590_v37  ;;  %v3026_v15 = vld [vmem:[%s4795_s13 + $0x28] sm:$0xff] }
 0x994   :  { %v2675_v6 = vsel %vm158_vm10, %v2674_v0, %v2605_v2  ;;  %v3028_v2 = vld [vmem:[%s4795_s13 + $0x38] sm:$0xff] }
 0x995   :  { %2878 = vmatpush.msra.mxu3 %v3028_v2 }
 0x997   :  { %v2354_v35 = vpop.permute.xlu1 %2353 }
 0x998   :  { %v2626_v42 = vmul.f32 %v4613_v46, %v2354_v35  ;;  %v2640_v46 = vmul.f32 %v4633_v58, %v4618_v10  ;;  %v2618_v10 = vadd.f32 %v2617_v20, %v2616_v56  ;;  %v2687_v56 = vpop.permute.xlu2 %2686 }
 0x99a   :  { %v2628_v48 = vsel %vm234_vm15, %v2626_v42, 0.0  ;;  %v2642_v8 = vsel %vm234_vm15, %v2640_v46, 0.0  ;;  %v2619_v41 = vrot.slane %v2618_v10, 1 }
 0x99b   :  { %v2629_v32 = vadd.f32 %v2628_v48, %v2627_v24 }
 0x99c   :  { %v2620_v26 = vadd.f32 %v2619_v41, %v2618_v10 }
 0x99d   :  { %v2630_v39 = vrot.slane %v2629_v32, 4 }
 0x99e   :  { %v2676_v42 = vsel %vm1255_vm1, %v2675_v6, %v2620_v26  ;;  %vm4807_vm1 = vmmov %vm4805_vm0  ;;  %v3027_v26 = vld [vmem:[%s4795_s13 + $0x30] sm:$0xff] }
 0x99f   :  { %v2631_v49 = vadd.f32 %v2630_v39, %v2629_v32  ;;  %v2366_v50 = vpop.permute.xlu1 %2365  ;;  %2879 = vmatpush.msra.mxu3 %v3027_v26 }
 0x9a0   :  { %v2641_v57 = vmul.f32 %v4629_v19, %v2366_v50  ;;  %v2662_v19 = vrot.slane %v2661_v28, 2  ;;  %v3021_v50 = vld [vmem:[%s4794_s12 + $0x30] sm:$0xff] }
 0x9a1   :  { %v2632_v38 = vrot.slane %v2631_v49, 2  ;;  %2880 = vmatpush.msra.mxu3 %v3026_v15 }
 0x9a2   :  { %v2643_v5 = vsel %vm234_vm15, %v2641_v57, 0.0  ;;  %v2663_v47 = vadd.f32 %v2662_v19, %v2661_v28  ;;  %v3019_v57 = vld [vmem:[%s4794_s12 + $0x20] sm:$0xff] }
 0x9a3   :  { %v2644_v58 = vadd.f32 %v2643_v5, %v2642_v8  ;;  %v2633_v45 = vadd.f32 %v2632_v38, %v2631_v49  ;;  %v3022_v49 = vld [vmem:[%s4794_s12 + $0x38] sm:$0xff] }
 0x9a4   :  { %v2664_v4 = vrot.slane %v2663_v47, 1  ;;  %2794 = vmatpush.msra.mxu1 %v3022_v49 }
 0x9a5   :  { %v2645_v1 = vrot.slane %v2644_v58, 4  ;;  %v2634_v30 = vrot.slane %v2633_v45, 1 }
 0x9a6   :  { %v2665_v14 = vadd.f32 %v2664_v4, %v2663_v47  ;;  %2795 = vmatpush.msra.mxu1 %v3021_v50  ;;  %v3025_v50 = vld [vmem:[%s4795_s13 + $0x20] sm:$0xff] }
 0x9a7   :  { %v2646_v55 = vadd.f32 %v2645_v1, %v2644_v58  ;;  %v2685_v51 = vpop.permute.xlu1 %2684  ;;  %v2635_v22 = vadd.f32 %v2634_v30, %v2633_v45  ;;  %v3130_v58 = vld [vmem:[%s4793_s11 + $0x1] ss:$0 sm:$0xff]  ;;  %2881 = vmatpush.msra.mxu3 %v3025_v50 }
 0x9a8   :  { %v2690_v31 = vmul.f32 %v2685_v51, %v2680_v52  ;;  %2796 = vmatpush.msra.mxu1 %v3020_v40 }
 0x9a9   :  { %v2647_v11 = vrot.slane %v2646_v55, 2  ;;  %v2677_v18 = vsel %vm1257_vm2, %v2676_v42, %v2635_v22 }
 0x9aa   :  { %3016 = vmatmul.msk.f32.vlgmr.msrb.gmra.mxu0 %vm234_vm15, %v2690_v31  ;;  %2797 = vmatpush.msra.mxu1 %v3019_v57 }
 0x9ab   :  { %v2648_v3 = vadd.f32 %v2647_v11, %v2646_v55 }
 0x9ad   :  { %v2649_v35 = vrot.slane %v2648_v3, 1 }
 0x9af   :  { %v2650_v43 = vadd.f32 %v2649_v35, %v2648_v3 }
 0x9b1   :  { %v2678_v63 = vsel %vm1259_vm3, %v2677_v18, %v2650_v43 }
 0x9b2   :  { %v2679_v24 = vsel %vm1261_vm4, %v2678_v63, %v2665_v14 }
 0x9b3   :  { %v2681_v48 = vadd.f32 %v2679_v24, %v2425_v59 }
 0x9b5   :  { %v2691_v32 = vmul.f32 %v2687_v56, %v2681_v48 }
 0x9b7   :  { %3017 = vmatmul.msk.f32.gmra.mxu0 %vm234_vm15, %v2691_v32 }
 0xa27   :  { %v2724_v62 = vpop.f32.mrf.mxu0 }
 0xa28   :  { %v4705_v44 = vadd.f32 %v2724_v62, %v4109_v27 }
 0xa2a   :  { %v2732_v54 = vmul.f32 %v4705_v44, %v4705_v44 }
 0xa2c   :  { %v2734_v39 = vsel %vm4805_vm0, %v2732_v54, 0.0 }
 0xa2d   :  { %2735 = vadd.xlane.f32.xlu1 %v2734_v39 }
 0xa34   :  { %v2727_v17 = vpop.f32.mrf.mxu0 }
 0xa35   :  { %v4711_v29 = vadd.f32 %v2727_v17, %v4115_v36 }
 0xa37   :  { %v2733_v13 = vmul.f32 %v4711_v29, %v4711_v29 }
 0xa39   :  { %v2737_v46 = vsel %vm4806_vm8, %v2733_v13, 0.0 }
 0xa3a   :  { %2738 = vadd.xlane.f32.xlu2 %v2737_v46 }
 0xaa0   :  { %v2736_v20 = vpop.xlane.xlu1 %2735 }
 0xaa1   :  { %v2740_v27 = vmul.f32 %v2736_v20, %v3466_v16 }
 0xaa3   :  { %v2742_v36 = vadd.f32 1e-05, %v2740_v27 }
 0xaa5   :  { %3340 = vrsqrt.f32 %v2742_v36  ;;  %vm2750_vm10 = vweird.f32 %v2742_v36 }
 0xaab   :  { %v3341_v28 = vpop.eup %3340 }
 0xaac   :  { %v2745_v53 = vmul.f32 %v3341_v28, %v2742_v36  ;;  %vm2751_vm9 = vweird.f32 %v3341_v28 }
 0xaad   :  { %v2739_v9 = vpop.xlane.xlu2 %2738  ;;  %vm2752_vm15 = vmor %vm2750_vm10, %vm2751_vm9 }
 0xaae   :  { %v2746_v38 = vmul.f32 %v3341_v28, %v2745_v53  ;;  %v2741_v34 = vmul.f32 %v2739_v9, %v3466_v16  ;;  %vm4809_vm9 = vmmov %vm4807_vm1 }
 0xaaf   :  { %vm4810_vm10 = vmmov %vm4807_vm1 }
 0xab0   :  { %v2747_v23 = vmul.f32 0.5, %v2746_v38  ;;  %v2743_v8 = vadd.f32 1e-05, %v2741_v34 }
 0xab2   :  { %v2748_v5 = vsub.f32 1.5, %v2747_v23  ;;  %3342 = vrsqrt.f32 %v2743_v8  ;;  %vm2760_vm3 = vweird.f32 %v2743_v8 }
 0xab4   :  { %v2749_v10 = vmul.f32 %v3341_v28, %v2748_v5 }
 0xab6   :  { %v2753_v33 = vsel %vm2752_vm15, %v3341_v28, %v2749_v10  ;;  %vm4811_vm15 = vmmov %vm4807_vm1 }
 0xab7   :  { %v2764_v45 = vmul.f32 %v2753_v33, %v4705_v44 }
 0xab8   :  { %v3343_v60 = vpop.eup %3342 }
 0xab9   :  { %v2769_v19 = vmul.f32 %v3130_v58, %v2764_v45  ;;  %v2755_v7 = vmul.f32 %v3343_v60, %v2743_v8  ;;  %vm2761_vm2 = vweird.f32 %v3343_v60  ;;  %v2932_v45 = vld [vmem:[%s4797_s15 + $0x18] sm:$0xff] }
 0xaba   :  { %vm2762_vm4 = vmor %vm2760_vm3, %vm2761_vm2  ;;  %2951 = vmatpush.msrb.mxu2 %v2932_v45 }
 0xabb   :  { %v2756_v1 = vmul.f32 %v3343_v60, %v2755_v7  ;;  %3023 = vmatmul.msk.f32.vlgmr.msra.gmra.mxu1 %vm4807_vm1, %v2769_v19  ;;  %v2929_v19 = vld [vmem:[%s4797_s15] sm:$0xff] }
 0xabd   :  { %v2757_v12 = vmul.f32 0.5, %v2756_v1 }
 0xabf   :  { %v2758_v21 = vsub.f32 1.5, %v2757_v12 }
 0xac1   :  { %v2759_v52 = vmul.f32 %v3343_v60, %v2758_v21 }
 0xac3   :  { %v2763_v41 = vsel %vm2762_vm4, %v3343_v60, %v2759_v52 }
 0xac4   :  { %v2765_v55 = vmul.f32 %v2763_v41, %v4711_v29 }
 0xac6   :  { %v2770_v51 = vmul.f32 %v3130_v58, %v2765_v55 }
 0xac8   :  { %3024 = vmatmul.msk.f32.gmra.mxu1 %vm4808_vm12, %v2770_v51  ;;  %vm4812_vm12 = vmmov %vm4807_vm1 }
 0xb38   :  { %v2799_v25 = vpop.f32.mrf.mxu1 }
 0xb39   :  { %v2805_v30 = vsub.f32 0.0, %v2799_v25 }
 0xb3b   :  { %v2807_v31 = vmul.f32 1.442695, %v2805_v30  ;;  %v3133_v30 = vld [vmem:[%s4796_s14] ss:$0 sm:$0xff] }
 0xb3d   :  { %3344 = vpow2.f32 %v2807_v31 }
 0xb43   :  { %v3345_v47 = vpop.eup %3344 }
 0xb44   :  { %v2811_v37 = vadd.f32 1.0, %v3345_v47 }
 0xb45   :  { %v2802_v11 = vpop.f32.mrf.mxu1 }
 0xb46   :  { %3346 = vrcp.f32 %v2811_v37  ;;  %v2806_v61 = vsub.f32 0.0, %v2802_v11  ;;  %v2824_v35 = vand.u32 2147483648, %v2811_v37  ;;  %v2822_v42 = vand.u32 2147483647, %v2811_v37 }
 0xb47   :  { %vm2818_vm14 = vweird.f32 %v2811_v37 }
 0xb48   :  { %v2809_v3 = vmul.f32 1.442695, %v2806_v61  ;;  %v2825_v59 = vor.u32 1.1754944e-38, %v2824_v35  ;;  %vm2823_vm7 = vcmp.eq.f32.partialorder %v2822_v42, 8.507059e+37 }
 0xb4a   :  { %3348 = vpow2.f32 %v2809_v3 }
 0xb4c   :  { %v3347_v22 = vpop.eup %3346 }
 0xb4d   :  { %v2814_v4 = vmul.f32 %v3347_v22, %v2811_v37  ;;  %vm2819_vm13 = vweird.f32 %v3347_v22 }
 0xb4e   :  { %vm2820_vm6 = vmor %vm2818_vm14, %vm2819_vm13 }
 0xb4f   :  { %v2815_v0 = vsub.f32 1.0, %v2814_v4 }
 0xb50   :  { %v3349_v6 = vpop.eup %3348 }
 0xb51   :  { %v2816_v43 = vmul.f32 %v3347_v22, %v2815_v0  ;;  %v2812_v14 = vadd.f32 1.0, %v3349_v6 }
 0xb53   :  { %v2817_v18 = vadd.f32 %v3347_v22, %v2816_v43  ;;  %3350 = vrcp.f32 %v2812_v14  ;;  %v2839_v54 = vand.u32 2147483648, %v2812_v14  ;;  %v2837_v17 = vand.u32 2147483647, %v2812_v14 }
 0xb54   :  { %vm2833_vm11 = vweird.f32 %v2812_v14 }
 0xb55   :  { %v2821_v63 = vsel %vm2820_vm6, %v3347_v22, %v2817_v18  ;;  %v2840_v46 = vor.u32 1.1754944e-38, %v2839_v54  ;;  %vm2838_vm8 = vcmp.eq.f32.partialorder %v2837_v17, 8.507059e+37 }
 0xb56   :  { %v2826_v24 = vsel %vm2823_vm7, %v2825_v59, %v2821_v63  ;;  %vm4813_vm7 = vmmov %vm4807_vm1 }
 0xb57   :  { %v2843_v48 = vmul.f32 %v2826_v24, %v2799_v25 }
 0xb59   :  { %2847 = vrot.lane.b32.xlu0 %v2843_v48, %s3360_s29  ;;  %v3351_v56 = vpop.eup %3350 }
 0xb5a   :  { %v2829_v32 = vmul.f32 %v3351_v56, %v2812_v14  ;;  %vm2834_vm5 = vweird.f32 %v3351_v56 }
 0xb5b   :  { %vm2835_vm0 = vmor %vm2833_vm11, %vm2834_vm5 }
 0xb5c   :  { %v2830_v62 = vsub.f32 1.0, %v2829_v32 }
 0xb5e   :  { %v2831_v39 = vmul.f32 %v3351_v56, %v2830_v62 }
 0xb60   :  { %v2832_v13 = vadd.f32 %v3351_v56, %v2831_v39 }
 0xb62   :  { %v2836_v20 = vsel %vm2835_vm0, %v3351_v56, %v2832_v13 }
 0xb63   :  { %v2841_v27 = vsel %vm2838_vm8, %v2840_v46, %v2836_v20 }
 0xb64   :  { %v2844_v49 = vmul.f32 %v2841_v27, %v2802_v11 }
 0xb66   :  { %2849 = vrot.lane.b32.xlu0 %v2844_v49, %s3360_s29 }
 0xbcb   :  { %v2848_v36 = vpop.permute.xlu0 %2847 }
 0xbcc   :  { %v2853_v40 = vmul.f32 %v2848_v36, %v2799_v25 }
 0xbce   :  { %3029 = vmatmul.msk.f32.vlgmr.msra.gmra.mxu3 %vm4809_vm9, %v2853_v40 }
 0xbd8   :  { %v2850_v57 = vpop.permute.xlu0 %2849 }
 0xbd9   :  { %v2854_v28 = vmul.f32 %v2850_v57, %v2802_v11 }
 0xbdb   :  { %3030 = vmatmul.msk.f32.gmra.mxu3 %vm4810_vm10, %v2854_v28 }
 0xc51   :  { %v2883_v53 = vpop.f32.mrf.mxu3 }
 0xc52   :  { %v2884_v9 = vadd.f32 %v2883_v53, %v4705_v44  ;;  %v2931_v44 = vld [vmem:[%s4797_s15 + $0x10] sm:$0xff] }
 0xc53   :  { %2952 = vmatpush.msrb.mxu2 %v2931_v44 }
 0xc54   :  { %v2890_v38 = vmul.f32 %v2884_v9, %v2884_v9 }
 0xc56   :  { %v2892_v34 = vsel %vm4811_vm15, %v2890_v38, 0.0 }
 0xc57   :  { %2893 = vadd.xlane.f32.xlu0 %v2892_v34 }
 0xc5e   :  { %v2886_v23 = vpop.f32.mrf.mxu3 }
 0xc5f   :  { %v2887_v8 = vadd.f32 %v2886_v23, %v4711_v29  ;;  %v2930_v29 = vld [vmem:[%s4797_s15 + $0x8] sm:$0xff] }
 0xc60   :  { %2953 = vmatpush.msrb.mxu2 %v2930_v29 }
 0xc61   :  { %v2891_v5 = vmul.f32 %v2887_v8, %v2887_v8 }
 0xc62   :  { %2954 = vmatpush.msrb.mxu2 %v2929_v19 }
 0xc63   :  { %v2895_v10 = vsel %vm4807_vm1, %v2891_v5, 0.0 }
 0xc64   :  { %2896 = vadd.xlane.f32.xlu1 %v2895_v10 }
 0xcca   :  { %v2894_v58 = vpop.xlane.xlu0 %2893 }
 0xccb   :  { %v2898_v33 = vmul.f32 %v2894_v58, %v3466_v16 }
 0xccd   :  { %v2900_v60 = vadd.f32 1e-05, %v2898_v33 }
 0xccf   :  { %3352 = vrsqrt.f32 %v2900_v60  ;;  %vm2908_vm3 = vweird.f32 %v2900_v60 }
 0xcd5   :  { %v3353_v7 = vpop.eup %3352 }
 0xcd6   :  { %v2903_v1 = vmul.f32 %v3353_v7, %v2900_v60  ;;  %vm2909_vm2 = vweird.f32 %v3353_v7 }
 0xcd7   :  { %v2897_v21 = vpop.xlane.xlu1 %2896  ;;  %vm2910_vm4 = vmor %vm2908_vm3, %vm2909_vm2 }
 0xcd8   :  { %v2904_v12 = vmul.f32 %v3353_v7, %v2903_v1  ;;  %v2899_v52 = vmul.f32 %v2897_v21, %v3466_v16 }
 0xcda   :  { %v2905_v41 = vmul.f32 0.5, %v2904_v12  ;;  %v2901_v55 = vadd.f32 1e-05, %v2899_v52 }
 0xcdc   :  { %v2906_v51 = vsub.f32 1.5, %v2905_v41  ;;  %3354 = vrsqrt.f32 %v2901_v55  ;;  %vm2918_vm14 = vweird.f32 %v2901_v55 }
 0xcde   :  { %v2907_v25 = vmul.f32 %v3353_v7, %v2906_v51 }
 0xce0   :  { %v2911_v31 = vsel %vm2910_vm4, %v3353_v7, %v2907_v25 }
 0xce1   :  { %v2922_v47 = vmul.f32 %v2911_v31, %v2884_v9 }
 0xce2   :  { %v3355_v37 = vpop.eup %3354 }
 0xce3   :  { %v2927_v11 = vmul.f32 %v3133_v30, %v2922_v47  ;;  %v2913_v61 = vmul.f32 %v3355_v37, %v2901_v55  ;;  %vm2919_vm13 = vweird.f32 %v3355_v37 }
 0xce4   :  { %vm2920_vm6 = vmor %vm2918_vm14, %vm2919_vm13 }
 0xce5   :  { %3031 = vmatmul.msk.f32.vlgmr.msrb.gmra.mxu2 %vm4812_vm12, %v2927_v11  ;;  %v2914_v16 = vmul.f32 %v3355_v37, %v2913_v61 }
 0xce7   :  { %v2915_v2 = vmul.f32 0.5, %v2914_v16 }
 0xce9   :  { %v2916_v26 = vsub.f32 1.5, %v2915_v2 }
 0xceb   :  { %v2917_v3 = vmul.f32 %v3355_v37, %v2916_v26 }
 0xced   :  { %v2921_v15 = vsel %vm2920_vm6, %v3355_v37, %v2917_v3 }
 0xcee   :  { %v2923_v22 = vmul.f32 %v2921_v15, %v2887_v8 }
 0xcf0   :  { %v2928_v4 = vmul.f32 %v3133_v30, %v2923_v22 }
 0xcf2   :  { %3032 = vmatmul.msk.f32.gmra.mxu2 %vm4813_vm7, %v2928_v4 }
 0xd68   :  { %v2956_v0 = vpop.f32.mrf.mxu2 }
 0xd69   :  { %2962 = vst [vmem:[%s4798_s16] sm:$0xff] %v2956_v0 }
 0xd75   :  { %v2959_v35 = vpop.f32.mrf.mxu2 }
 0xd76   :  { %2963 = vst [vmem:[%s4798_s16 + $0x8] sm:$0xff] %v2959_v35 }

</bundles_post_ra>
